<compile_context>
chip_gen: v7x
topology: tpu7x:2x2x1
jax: 0.10.0
libtpu: 0.0.40
codegen_flags: <defaults>
</compile_context>

<pallas_src>
import functools

import jax
import jax.numpy as jnp
from jax.experimental import pallas as pl
from jax.experimental.pallas import tpu as pltpu

SLACK = 8  # zero rows appended to each flattened padded map (tap-slice headroom)


# ------------------------------ fused kernel -------------------------------- #

def _cnn_fused_kernel(h0, w0, cin, bt,
                      x_ref, w1_ref, s1_ref, w2_ref, s2_ref, w3_ref, s3_ref,
                      fw1_ref, fb1_ref, fw2_ref, fb2_ref,
                      o_ref,
                      c1_scr, p1_scr, c2_scr, p2_scr):
    """Whole CNN forward for one batch tile of `bt` images, all in VMEM.

    Activation layout between layers: zero-padded, row-major-flattened NHWC map
    of shape (rows, channels) with channels on lanes; row index = i*(w+2)+j.
    Border / slack / j>=w rows are exactly zero and act as the next conv's
    SAME-padding halo (or are never selected by pooling / GAP).
    """
    wp0 = w0 + 2
    r1 = h0 * wp0                        # conv1 rows computed (incl. pad columns)
    h1, w1 = h0 // 2, w0 // 2
    wp1 = w1 + 2
    r2 = h1 * wp1
    R1 = (h1 + 2) * wp1 + SLACK          # pool1 map rows per image
    h2, w2 = h1 // 2, w1 // 2
    wp2 = w2 + 2
    r3 = h2 * wp2
    R2 = (h2 + 2) * wp2 + SLACK          # pool2 map rows per image

    # Zero the padded inter-layer maps (their borders are the next conv's halo).
    p1_scr[...] = jnp.zeros(p1_scr.shape, p1_scr.dtype)
    p2_scr[...] = jnp.zeros(p2_scr.shape, p2_scr.dtype)

    # ------------- conv1 + BN + ReLU (VPU broadcast-FMA, cin is tiny) --------
    # Chunked over a few spatial rows so acc + broadcast temps stay ~10-15 vregs.
    i_chunk = max(1, 96 // wp0)
    for b in range(bt):
        for i0 in range(0, h0, i_chunk):
            nrow = min(i_chunk, h0 - i0) * wp0
            acc = jnp.zeros((nrow, 32), jnp.float32)
            for t in range(9):
                kh, kw = t // 3, t % 3
                off = (i0 + kh) * wp0 + kw
                for ci in range(cin):
                    patch = x_ref[b, off:off + nrow, ci:ci + 1]         # (nrow, 1)
                    wrow = w1_ref[t * cin + ci:t * cin + ci + 1, :]     # (1, 32)
                    acc = acc + patch * wrow
            dst = b * r1 + i0 * wp0
            c1_scr[dst:dst + nrow, :] = jnp.maximum(acc + s1_ref[...], 0.0)

    # ------------- pool1: 2x2 max via stride-2 sublane reads -----------------
    for b in range(bt):
        for io in range(h1):
            base = b * r1 + 2 * io * wp0
            pooled = jnp.maximum(
                jnp.maximum(c1_scr[pl.ds(base, w1, stride=2), :],
                            c1_scr[pl.ds(base + 1, w1, stride=2), :]),
                jnp.maximum(c1_scr[pl.ds(base + wp0, w1, stride=2), :],
                            c1_scr[pl.ds(base + wp0 + 1, w1, stride=2), :]))
            dst = b * R1 + (io + 1) * wp1 + 1
            p1_scr[dst:dst + w1, :] = pooled                            # (w1, 32)

    # ------------- conv2 + BN + ReLU (MXU, K = 32 real channels) -------------
    for b in range(bt):
        acc = jnp.zeros((r2, 64), jnp.float32)
        for t in range(9):
            off = b * R1 + (t // 3) * wp1 + (t % 3)
            lhs = p1_scr[off:off + r2, :].astype(jnp.bfloat16)          # (r2, 32)
            acc = acc + jnp.dot(lhs, w2_ref[t * 32:(t + 1) * 32, :],
                                preferred_element_type=jnp.float32)
        c2_scr[b * r2:(b + 1) * r2, :] = jnp.maximum(acc + s2_ref[...], 0.0)

    # ------------- pool2 ------------------------------------------------------
    for b in range(bt):
        for io in range(h2):
            base = b * r2 + 2 * io * wp1
            pooled = jnp.maximum(
                jnp.maximum(c2_scr[pl.ds(base, w2, stride=2), :],
                            c2_scr[pl.ds(base + 1, w2, stride=2), :]),
                jnp.maximum(c2_scr[pl.ds(base + wp1, w2, stride=2), :],
                            c2_scr[pl.ds(base + wp1 + 1, w2, stride=2), :]))
            dst = b * R2 + (io + 1) * wp2 + 1
            p2_scr[dst:dst + w2, :] = pooled                            # (w2, 64)

    # ------------- conv3 + BN + ReLU + global average pool -------------------
    feats = []
    for b in range(bt):
        acc = jnp.zeros((r3, 128), jnp.float32)
        for t in range(9):
            off = b * R2 + (t // 3) * wp2 + (t % 3)
            lhs = p2_scr[off:off + r3, :].astype(jnp.bfloat16)          # (r3, 64)
            acc = acc + jnp.dot(lhs, w3_ref[t * 64:(t + 1) * 64, :],
                                preferred_element_type=jnp.float32)
        y3 = jnp.maximum(acc + s3_ref[...], 0.0)                        # (r3, 128)
        gap = jnp.zeros((1, 128), jnp.float32)
        for i in range(h2):   # sum only valid columns j < w2 of every row band
            gap = gap + jnp.sum(y3[i * wp2:i * wp2 + w2, :], axis=0, keepdims=True)
        feats.append(gap * (1.0 / (h2 * w2)))
    feats = feats[0] if bt == 1 else jnp.concatenate(feats, axis=0)     # (bt, 128)

    # ------------- head: fc1 -> ReLU -> dropout (eval: identity) -> fc2 ------
    hid = jnp.dot(feats.astype(jnp.bfloat16), fw1_ref[...],
                  preferred_element_type=jnp.float32) + fb1_ref[...]
    hid = jnp.maximum(hid, 0.0)
    # TODO(synk): nn.Dropout is identity in eval mode; no dropout mask applied.
    out = jnp.dot(hid.astype(jnp.bfloat16), fw2_ref[...],
                  preferred_element_type=jnp.float32) + fb2_ref[...]
    o_ref[:, 0, :] = out


# ------------------------------- call wrapper -------------------------------- #

def _pick_batch_tile(n):
    # Prefer >= 2 grid steps so the "parallel" axis can shard across TensorCores.
    for bt in (8, 4, 2, 1):
        if n % bt == 0 and n // bt >= 2:
            return bt
    return n   # n == 1


@jax.jit
def cnn_forward(x_nchw, params):
    n, cin, h, w = x_nchw.shape
    # Two 2x2 max-pools (PyTorch floor mode); even dims keep the layouts exact.
    assert h % 4 == 0 and w % 4 == 0, "spatial dims must be divisible by 4"
    num_classes = params["fc2_w"].shape[1]
    bt = _pick_batch_tile(n)

    # SAME halo + row-major flatten: (N, Cin, H, W) -> (N, (H+2)*(W+2)+SLACK, Cin).
    # Tiny prep (one fused XLA pad/reshape); for Cin=1 the transpose is free.
    xp = jnp.transpose(x_nchw, (0, 2, 3, 1)).astype(jnp.float32)
    xp = jnp.pad(xp, ((0, 0), (1, 1), (1, 1), (0, 0)))
    x_flat = jnp.pad(xp.reshape(n, (h + 2) * (w + 2), cin),
                     ((0, 0), (0, SLACK), (0, 0)))
    R0 = (h + 2) * (w + 2) + SLACK

    r1 = h * (w + 2)
    h1, w1 = h // 2, w // 2
    r2 = h1 * (w1 + 2)
    R1 = (h1 + 2) * (w1 + 2) + SLACK
    h2, w2 = h1 // 2, w1 // 2
    r3 = h2 * (w2 + 2)
    R2 = (h2 + 2) * (w2 + 2) + SLACK

    kernel = functools.partial(_cnn_fused_kernel, h, w, cin, bt)
    inv2 = lambda i: (0, 0)   # grid-invariant 2-D operands (weights / shifts)

    out = pl.pallas_call(
        kernel,
        grid=(n // bt,),
        in_specs=[
            pl.BlockSpec((bt, R0, cin), lambda i: (i, 0, 0)),
            pl.BlockSpec((9 * cin, 32), inv2),
            pl.BlockSpec((1, 32), inv2),
            pl.BlockSpec((9 * 32, 64), inv2),
            pl.BlockSpec((1, 64), inv2),
            pl.BlockSpec((9 * 64, 128), inv2),
            pl.BlockSpec((1, 128), inv2),
            pl.BlockSpec((128, 64), inv2),
            pl.BlockSpec((1, 64), inv2),
            pl.BlockSpec((64, num_classes), inv2),
            pl.BlockSpec((1, num_classes), inv2),
        ],
        out_specs=pl.BlockSpec((bt, 1, num_classes), lambda i: (i, 0, 0)),
        out_shape=jax.ShapeDtypeStruct((n, 1, num_classes), jnp.float32),
        scratch_shapes=[
            pltpu.VMEM((bt * r1, 32), jnp.float32),   # conv1 output map
            pltpu.VMEM((bt * R1, 32), jnp.float32),   # pool1 / conv2-input padded map
            pltpu.VMEM((bt * r2, 64), jnp.float32),   # conv2 output map
            pltpu.VMEM((bt * R2, 64), jnp.float32),   # pool2 / conv3-input padded map
        ],
        compiler_params=pltpu.CompilerParams(dimension_semantics=("parallel",)),
    )(x_flat,
      params["conv1_w"], params["bn1_shift"],
      params["conv2_w"], params["bn2_shift"],
      params["conv3_w"], params["bn3_shift"],
      params["fc1_w"], params["fc1_b"],
      params["fc2_w"], params["fc2_b"])
    return out.reshape(n, num_classes)


# --------------------------------- params ------------------------------------ #

def _fold_bn(w_hwio, b, gamma, beta, mean, var, eps=1e-5):
    """Fold conv bias + BatchNorm (inference) into the weights + a per-channel shift."""
    s = gamma / jnp.sqrt(var + eps)
    return w_hwio * s, (s * (b - mean) + beta).reshape(1, -1)


def init_params(key, in_channels=1, num_classes=10):
    ks = jax.random.split(key, 10)
    p = {}
    cins, couts = (in_channels, 32, 64), (32, 64, 128)
    wdt = (jnp.float32, jnp.bfloat16, jnp.bfloat16)   # conv1 stays f32 (VPU FMA path)
    for i in range(3):
        cin, cout = cins[i], couts[i]
        w = jax.random.normal(ks[2 * i], (3, 3, cin, cout), jnp.float32) * 0.1   # HWIO
        b = jax.random.normal(ks[2 * i + 1], (cout,), jnp.float32) * 0.01
        # PyTorch BatchNorm2d defaults: gamma=1, beta=0, running_mean=0, running_var=1.
        wf, shift = _fold_bn(w, b,
                             jnp.ones((cout,), jnp.float32),
                             jnp.zeros((cout,), jnp.float32),
                             jnp.zeros((cout,), jnp.float32),
                             jnp.ones((cout,), jnp.float32))
        # (kh,kw,ci)-major rows match the kernel's tap indexing (row = t*cin + ci).
        p[f"conv{i + 1}_w"] = wf.reshape(9 * cin, cout).astype(wdt[i])
        p[f"bn{i + 1}_shift"] = shift.astype(jnp.float32)
    p["fc1_w"] = (jax.random.normal(ks[6], (128, 64), jnp.float32) * 0.1
                  ).astype(jnp.bfloat16)
    p["fc1_b"] = (jax.random.normal(ks[7], (64,), jnp.float32) * 0.01).reshape(1, 64)
    p["fc2_w"] = (jax.random.normal(ks[8], (64, num_classes), jnp.float32) * 0.1
                  ).astype(jnp.bfloat16)
    p["fc2_b"] = (jax.random.normal(ks[9], (num_classes,), jnp.float32) * 0.01
                  ).reshape(1, num_classes)
    return p


if __name__ == "__main__":
    key = jax.random.PRNGKey(0)
    pkey, xkey = jax.random.split(key)
    params = init_params(pkey, in_channels=1, num_classes=10)
    # (batch, channels, n_mels, time) — small synthetic mel spectrogram
    x = jax.random.normal(xkey, (2, 1, 16, 16), jnp.float32)
    out = cnn_forward(x, params)
    out = jax.block_until_ready(out)
    assert out.shape == (2, 10) and out.dtype == jnp.float32
    assert bool(jnp.all(jnp.isfinite(out)))
    print("KERNEL_OK")
</pallas_src>

<mosaic_0001>
module attributes {stable_mosaic.version = 11 : i64} {
  func.func @_cnn_fused_kernel(%arg0: i32, %arg1: memref<1x332x1xf32, #tpu.memory_space<vmem>>, %arg2: memref<9x32xf32, #tpu.memory_space<vmem>>, %arg3: memref<1x32xf32, #tpu.memory_space<vmem>>, %arg4: memref<288x64xbf16, #tpu.memory_space<vmem>>, %arg5: memref<1x64xf32, #tpu.memory_space<vmem>>, %arg6: memref<576x128xbf16, #tpu.memory_space<vmem>>, %arg7: memref<1x128xf32, #tpu.memory_space<vmem>>, %arg8: memref<128x64xbf16, #tpu.memory_space<vmem>>, %arg9: memref<1x64xf32, #tpu.memory_space<vmem>>, %arg10: memref<64x10xbf16, #tpu.memory_space<vmem>>, %arg11: memref<1x10xf32, #tpu.memory_space<vmem>>, %arg12: memref<1x1x10xf32, #tpu.memory_space<vmem>>, %arg13: memref<288x32xf32, #tpu.memory_space<vmem>>, %arg14: memref<108x32xf32, #tpu.memory_space<vmem>>, %arg15: memref<80x64xf32, #tpu.memory_space<vmem>>, %arg16: memref<44x64xf32, #tpu.memory_space<vmem>>) attributes {dimension_semantics = [#tpu.dimension_semantics<parallel>], iteration_bounds = array<i64: 2>, scalar_prefetch = 0 : i64, scratch_operands = 4 : i64, tpu.core_type = #tpu.core_type<tc>, window_params = [{transform_indices = @transform_0, window_bounds = array<i64: 1, 332, 1>}, {pipeline_mode = #tpu.pipeline_mode<synchronous>, transform_indices = @transform_1, window_bounds = array<i64: 9, 32>}, {pipeline_mode = #tpu.pipeline_mode<synchronous>, transform_indices = @transform_2, window_bounds = array<i64: 1, 32>}, {pipeline_mode = #tpu.pipeline_mode<synchronous>, transform_indices = @transform_3, window_bounds = array<i64: 288, 64>}, {pipeline_mode = #tpu.pipeline_mode<synchronous>, transform_indices = @transform_4, window_bounds = array<i64: 1, 64>}, {pipeline_mode = #tpu.pipeline_mode<synchronous>, transform_indices = @transform_5, window_bounds = array<i64: 576, 128>}, {pipeline_mode = #tpu.pipeline_mode<synchronous>, transform_indices = @transform_6, window_bounds = array<i64: 1, 128>}, {pipeline_mode = #tpu.pipeline_mode<synchronous>, transform_indices = @transform_7, window_bounds = array<i64: 128, 64>}, {pipeline_mode = #tpu.pipeline_mode<synchronous>, transform_indices = @transform_8, window_bounds = array<i64: 1, 64>}, {pipeline_mode = #tpu.pipeline_mode<synchronous>, transform_indices = @transform_9, window_bounds = array<i64: 64, 10>}, {pipeline_mode = #tpu.pipeline_mode<synchronous>, transform_indices = @transform_10, window_bounds = array<i64: 1, 10>}, {transform_indices = @transform_11, window_bounds = array<i64: 1, 1, 10>}]} {
    %cst = arith.constant 0.000000e+00 : f32
    %0 = vector.broadcast %cst : f32 to vector<108x32xf32>
    %c0 = arith.constant 0 : index
    %c0_0 = arith.constant 0 : index
    %1 = vector.load %arg14[%c0, %c0_0] : memref<108x32xf32, #tpu.memory_space<vmem>>, vector<108x32xf32>
    tpu.vector_store %arg14[%c0, %c0_0], %0 {strides = array<i32>} : memref<108x32xf32, #tpu.memory_space<vmem>>, vector<108x32xf32>,
    %cst_1 = arith.constant 0.000000e+00 : f32
    %2 = vector.broadcast %cst_1 : f32 to vector<44x64xf32>
    %c0_2 = arith.constant 0 : index
    %c0_3 = arith.constant 0 : index
    %3 = vector.load %arg16[%c0_2, %c0_3] : memref<44x64xf32, #tpu.memory_space<vmem>>, vector<44x64xf32>
    tpu.vector_store %arg16[%c0_2, %c0_3], %2 {strides = array<i32>} : memref<44x64xf32, #tpu.memory_space<vmem>>, vector<44x64xf32>,
    %cst_4 = arith.constant 0.000000e+00 : f32
    %4 = vector.broadcast %cst_4 : f32 to vector<90x32xf32>
    %c0_5 = arith.constant 0 : index
    %c0_6 = arith.constant 0 : index
    %c0_7 = arith.constant 0 : index
    %5 = vector.load %arg1[%c0_5, %c0_6, %c0_7] : memref<1x332x1xf32, #tpu.memory_space<vmem>>, vector<1x90x1xf32>
    %6 = vector.shape_cast %5 : vector<1x90x1xf32> to vector<90x1xf32>
    %c0_8 = arith.constant 0 : index
    %c0_9 = arith.constant 0 : index
    %7 = vector.load %arg2[%c0_8, %c0_9] : memref<9x32xf32, #tpu.memory_space<vmem>>, vector<1x32xf32>
    %8 = vector.broadcast %6 : vector<90x1xf32> to vector<90x32xf32>
    %9 = vector.broadcast %7 : vector<1x32xf32> to vector<90x32xf32>
    %10 = arith.mulf %8, %9 : vector<90x32xf32>
    %11 = arith.addf %4, %10 : vector<90x32xf32>
    %c0_10 = arith.constant 0 : index
    %c1 = arith.constant 1 : index
    %c0_11 = arith.constant 0 : index
    %12 = vector.load %arg1[%c0_10, %c1, %c0_11] : memref<1x332x1xf32, #tpu.memory_space<vmem>>, vector<1x90x1xf32>
    %13 = vector.shape_cast %12 : vector<1x90x1xf32> to vector<90x1xf32>
    %c1_12 = arith.constant 1 : index
    %c0_13 = arith.constant 0 : index
    %14 = vector.load %arg2[%c1_12, %c0_13] : memref<9x32xf32, #tpu.memory_space<vmem>>, vector<1x32xf32>
    %15 = vector.broadcast %13 : vector<90x1xf32> to vector<90x32xf32>
    %16 = vector.broadcast %14 : vector<1x32xf32> to vector<90x32xf32>
    %17 = arith.mulf %15, %16 : vector<90x32xf32>
    %18 = arith.addf %11, %17 : vector<90x32xf32>
    %c0_14 = arith.constant 0 : index
    %c2 = arith.constant 2 : index
    %c0_15 = arith.constant 0 : index
    %19 = vector.load %arg1[%c0_14, %c2, %c0_15] : memref<1x332x1xf32, #tpu.memory_space<vmem>>, vector<1x90x1xf32>
    %20 = vector.shape_cast %19 : vector<1x90x1xf32> to vector<90x1xf32>
    %c2_16 = arith.constant 2 : index
    %c0_17 = arith.constant 0 : index
    %21 = vector.load %arg2[%c2_16, %c0_17] : memref<9x32xf32, #tpu.memory_space<vmem>>, vector<1x32xf32>
    %22 = vector.broadcast %20 : vector<90x1xf32> to vector<90x32xf32>
    %23 = vector.broadcast %21 : vector<1x32xf32> to vector<90x32xf32>
    %24 = arith.mulf %22, %23 : vector<90x32xf32>
    %25 = arith.addf %18, %24 : vector<90x32xf32>
    %c0_18 = arith.constant 0 : index
    %c18 = arith.constant 18 : index
    %c0_19 = arith.constant 0 : index
    %26 = vector.load %arg1[%c0_18, %c18, %c0_19] : memref<1x332x1xf32, #tpu.memory_space<vmem>>, vector<1x90x1xf32>
    %27 = vector.shape_cast %26 : vector<1x90x1xf32> to vector<90x1xf32>
    %c3 = arith.constant 3 : index
    %c0_20 = arith.constant 0 : index
    %28 = vector.load %arg2[%c3, %c0_20] : memref<9x32xf32, #tpu.memory_space<vmem>>, vector<1x32xf32>
    %29 = vector.broadcast %27 : vector<90x1xf32> to vector<90x32xf32>
    %30 = vector.broadcast %28 : vector<1x32xf32> to vector<90x32xf32>
    %31 = arith.mulf %29, %30 : vector<90x32xf32>
    %32 = arith.addf %25, %31 : vector<90x32xf32>
    %c0_21 = arith.constant 0 : index
    %c19 = arith.constant 19 : index
    %c0_22 = arith.constant 0 : index
    %33 = vector.load %arg1[%c0_21, %c19, %c0_22] : memref<1x332x1xf32, #tpu.memory_space<vmem>>, vector<1x90x1xf32>
    %34 = vector.shape_cast %33 : vector<1x90x1xf32> to vector<90x1xf32>
    %c4 = arith.constant 4 : index
    %c0_23 = arith.constant 0 : index
    %35 = vector.load %arg2[%c4, %c0_23] : memref<9x32xf32, #tpu.memory_space<vmem>>, vector<1x32xf32>
    %36 = vector.broadcast %34 : vector<90x1xf32> to vector<90x32xf32>
    %37 = vector.broadcast %35 : vector<1x32xf32> to vector<90x32xf32>
    %38 = arith.mulf %36, %37 : vector<90x32xf32>
    %39 = arith.addf %32, %38 : vector<90x32xf32>
    %c0_24 = arith.constant 0 : index
    %c20 = arith.constant 20 : index
    %c0_25 = arith.constant 0 : index
    %40 = vector.load %arg1[%c0_24, %c20, %c0_25] : memref<1x332x1xf32, #tpu.memory_space<vmem>>, vector<1x90x1xf32>
    %41 = vector.shape_cast %40 : vector<1x90x1xf32> to vector<90x1xf32>
    %c5 = arith.constant 5 : index
    %c0_26 = arith.constant 0 : index
    %42 = vector.load %arg2[%c5, %c0_26] : memref<9x32xf32, #tpu.memory_space<vmem>>, vector<1x32xf32>
    %43 = vector.broadcast %41 : vector<90x1xf32> to vector<90x32xf32>
    %44 = vector.broadcast %42 : vector<1x32xf32> to vector<90x32xf32>
    %45 = arith.mulf %43, %44 : vector<90x32xf32>
    %46 = arith.addf %39, %45 : vector<90x32xf32>
    %c0_27 = arith.constant 0 : index
    %c36 = arith.constant 36 : index
    %c0_28 = arith.constant 0 : index
    %47 = vector.load %arg1[%c0_27, %c36, %c0_28] : memref<1x332x1xf32, #tpu.memory_space<vmem>>, vector<1x90x1xf32>
    %48 = vector.shape_cast %47 : vector<1x90x1xf32> to vector<90x1xf32>
    %c6 = arith.constant 6 : index
    %c0_29 = arith.constant 0 : index
    %49 = vector.load %arg2[%c6, %c0_29] : memref<9x32xf32, #tpu.memory_space<vmem>>, vector<1x32xf32>
    %50 = vector.broadcast %48 : vector<90x1xf32> to vector<90x32xf32>
    %51 = vector.broadcast %49 : vector<1x32xf32> to vector<90x32xf32>
    %52 = arith.mulf %50, %51 : vector<90x32xf32>
    %53 = arith.addf %46, %52 : vector<90x32xf32>
    %c0_30 = arith.constant 0 : index
    %c37 = arith.constant 37 : index
    %c0_31 = arith.constant 0 : index
    %54 = vector.load %arg1[%c0_30, %c37, %c0_31] : memref<1x332x1xf32, #tpu.memory_space<vmem>>, vector<1x90x1xf32>
    %55 = vector.shape_cast %54 : vector<1x90x1xf32> to vector<90x1xf32>
    %c7 = arith.constant 7 : index
    %c0_32 = arith.constant 0 : index
    %56 = vector.load %arg2[%c7, %c0_32] : memref<9x32xf32, #tpu.memory_space<vmem>>, vector<1x32xf32>
    %57 = vector.broadcast %55 : vector<90x1xf32> to vector<90x32xf32>
    %58 = vector.broadcast %56 : vector<1x32xf32> to vector<90x32xf32>
    %59 = arith.mulf %57, %58 : vector<90x32xf32>
    %60 = arith.addf %53, %59 : vector<90x32xf32>
    %c0_33 = arith.constant 0 : index
    %c38 = arith.constant 38 : index
    %c0_34 = arith.constant 0 : index
    %61 = vector.load %arg1[%c0_33, %c38, %c0_34] : memref<1x332x1xf32, #tpu.memory_space<vmem>>, vector<1x90x1xf32>
    %62 = vector.shape_cast %61 : vector<1x90x1xf32> to vector<90x1xf32>
    %c8 = arith.constant 8 : index
    %c0_35 = arith.constant 0 : index
    %63 = vector.load %arg2[%c8, %c0_35] : memref<9x32xf32, #tpu.memory_space<vmem>>, vector<1x32xf32>
    %64 = vector.broadcast %62 : vector<90x1xf32> to vector<90x32xf32>
    %65 = vector.broadcast %63 : vector<1x32xf32> to vector<90x32xf32>
    %66 = arith.mulf %64, %65 : vector<90x32xf32>
    %67 = arith.addf %60, %66 : vector<90x32xf32>
    %c0_36 = arith.constant 0 : index
    %c0_37 = arith.constant 0 : index
    %68 = vector.load %arg3[%c0_36, %c0_37] : memref<1x32xf32, #tpu.memory_space<vmem>>, vector<1x32xf32>
    %69 = vector.broadcast %68 : vector<1x32xf32> to vector<90x32xf32>
    %70 = arith.addf %67, %69 : vector<90x32xf32>
    %cst_38 = arith.constant 0.000000e+00 : f32
    %71 = vector.broadcast %cst_38 : f32 to vector<90x32xf32>
    %72 = arith.maximumf %70, %71 : vector<90x32xf32>
    %c0_39 = arith.constant 0 : index
    %c0_40 = arith.constant 0 : index
    %73 = vector.load %arg13[%c0_39, %c0_40] : memref<288x32xf32, #tpu.memory_space<vmem>>, vector<90x32xf32>
    tpu.vector_store %arg13[%c0_39, %c0_40], %72 {strides = array<i32>} : memref<288x32xf32, #tpu.memory_space<vmem>>, vector<90x32xf32>,
    %cst_41 = arith.constant 0.000000e+00 : f32
    %74 = vector.broadcast %cst_41 : f32 to vector<90x32xf32>
    %c0_42 = arith.constant 0 : index
    %c90 = arith.constant 90 : index
    %c0_43 = arith.constant 0 : index
    %75 = vector.load %arg1[%c0_42, %c90, %c0_43] : memref<1x332x1xf32, #tpu.memory_space<vmem>>, vector<1x90x1xf32>
    %76 = vector.shape_cast %75 : vector<1x90x1xf32> to vector<90x1xf32>
    %c0_44 = arith.constant 0 : index
    %c0_45 = arith.constant 0 : index
    %77 = vector.load %arg2[%c0_44, %c0_45] : memref<9x32xf32, #tpu.memory_space<vmem>>, vector<1x32xf32>
    %78 = vector.broadcast %76 : vector<90x1xf32> to vector<90x32xf32>
    %79 = vector.broadcast %77 : vector<1x32xf32> to vector<90x32xf32>
    %80 = arith.mulf %78, %79 : vector<90x32xf32>
    %81 = arith.addf %74, %80 : vector<90x32xf32>
    %c0_46 = arith.constant 0 : index
    %c91 = arith.constant 91 : index
    %c0_47 = arith.constant 0 : index
    %82 = vector.load %arg1[%c0_46, %c91, %c0_47] : memref<1x332x1xf32, #tpu.memory_space<vmem>>, vector<1x90x1xf32>
    %83 = vector.shape_cast %82 : vector<1x90x1xf32> to vector<90x1xf32>
    %c1_48 = arith.constant 1 : index
    %c0_49 = arith.constant 0 : index
    %84 = vector.load %arg2[%c1_48, %c0_49] : memref<9x32xf32, #tpu.memory_space<vmem>>, vector<1x32xf32>
    %85 = vector.broadcast %83 : vector<90x1xf32> to vector<90x32xf32>
    %86 = vector.broadcast %84 : vector<1x32xf32> to vector<90x32xf32>
    %87 = arith.mulf %85, %86 : vector<90x32xf32>
    %88 = arith.addf %81, %87 : vector<90x32xf32>
    %c0_50 = arith.constant 0 : index
    %c92 = arith.constant 92 : index
    %c0_51 = arith.constant 0 : index
    %89 = vector.load %arg1[%c0_50, %c92, %c0_51] : memref<1x332x1xf32, #tpu.memory_space<vmem>>, vector<1x90x1xf32>
    %90 = vector.shape_cast %89 : vector<1x90x1xf32> to vector<90x1xf32>
    %c2_52 = arith.constant 2 : index
    %c0_53 = arith.constant 0 : index
    %91 = vector.load %arg2[%c2_52, %c0_53] : memref<9x32xf32, #tpu.memory_space<vmem>>, vector<1x32xf32>
    %92 = vector.broadcast %90 : vector<90x1xf32> to vector<90x32xf32>
    %93 = vector.broadcast %91 : vector<1x32xf32> to vector<90x32xf32>
    %94 = arith.mulf %92, %93 : vector<90x32xf32>
    %95 = arith.addf %88, %94 : vector<90x32xf32>
    %c0_54 = arith.constant 0 : index
    %c108 = arith.constant 108 : index
    %c0_55 = arith.constant 0 : index
    %96 = vector.load %arg1[%c0_54, %c108, %c0_55] : memref<1x332x1xf32, #tpu.memory_space<vmem>>, vector<1x90x1xf32>
    %97 = vector.shape_cast %96 : vector<1x90x1xf32> to vector<90x1xf32>
    %c3_56 = arith.constant 3 : index
    %c0_57 = arith.constant 0 : index
    %98 = vector.load %arg2[%c3_56, %c0_57] : memref<9x32xf32, #tpu.memory_space<vmem>>, vector<1x32xf32>
    %99 = vector.broadcast %97 : vector<90x1xf32> to vector<90x32xf32>
    %100 = vector.broadcast %98 : vector<1x32xf32> to vector<90x32xf32>
    %101 = arith.mulf %99, %100 : vector<90x32xf32>
    %102 = arith.addf %95, %101 : vector<90x32xf32>
    %c0_58 = arith.constant 0 : index
    %c109 = arith.constant 109 : index
    %c0_59 = arith.constant 0 : index
    %103 = vector.load %arg1[%c0_58, %c109, %c0_59] : memref<1x332x1xf32, #tpu.memory_space<vmem>>, vector<1x90x1xf32>
    %104 = vector.shape_cast %103 : vector<1x90x1xf32> to vector<90x1xf32>
    %c4_60 = arith.constant 4 : index
    %c0_61 = arith.constant 0 : index
    %105 = vector.load %arg2[%c4_60, %c0_61] : memref<9x32xf32, #tpu.memory_space<vmem>>, vector<1x32xf32>
    %106 = vector.broadcast %104 : vector<90x1xf32> to vector<90x32xf32>
    %107 = vector.broadcast %105 : vector<1x32xf32> to vector<90x32xf32>
    %108 = arith.mulf %106, %107 : vector<90x32xf32>
    %109 = arith.addf %102, %108 : vector<90x32xf32>
    %c0_62 = arith.constant 0 : index
    %c110 = arith.constant 110 : index
    %c0_63 = arith.constant 0 : index
    %110 = vector.load %arg1[%c0_62, %c110, %c0_63] : memref<1x332x1xf32, #tpu.memory_space<vmem>>, vector<1x90x1xf32>
    %111 = vector.shape_cast %110 : vector<1x90x1xf32> to vector<90x1xf32>
    %c5_64 = arith.constant 5 : index
    %c0_65 = arith.constant 0 : index
    %112 = vector.load %arg2[%c5_64, %c0_65] : memref<9x32xf32, #tpu.memory_space<vmem>>, vector<1x32xf32>
    %113 = vector.broadcast %111 : vector<90x1xf32> to vector<90x32xf32>
    %114 = vector.broadcast %112 : vector<1x32xf32> to vector<90x32xf32>
    %115 = arith.mulf %113, %114 : vector<90x32xf32>
    %116 = arith.addf %109, %115 : vector<90x32xf32>
    %c0_66 = arith.constant 0 : index
    %c126 = arith.constant 126 : index
    %c0_67 = arith.constant 0 : index
    %117 = vector.load %arg1[%c0_66, %c126, %c0_67] : memref<1x332x1xf32, #tpu.memory_space<vmem>>, vector<1x90x1xf32>
    %118 = vector.shape_cast %117 : vector<1x90x1xf32> to vector<90x1xf32>
    %c6_68 = arith.constant 6 : index
    %c0_69 = arith.constant 0 : index
    %119 = vector.load %arg2[%c6_68, %c0_69] : memref<9x32xf32, #tpu.memory_space<vmem>>, vector<1x32xf32>
    %120 = vector.broadcast %118 : vector<90x1xf32> to vector<90x32xf32>
    %121 = vector.broadcast %119 : vector<1x32xf32> to vector<90x32xf32>
    %122 = arith.mulf %120, %121 : vector<90x32xf32>
    %123 = arith.addf %116, %122 : vector<90x32xf32>
    %c0_70 = arith.constant 0 : index
    %c127 = arith.constant 127 : index
    %c0_71 = arith.constant 0 : index
    %124 = vector.load %arg1[%c0_70, %c127, %c0_71] : memref<1x332x1xf32, #tpu.memory_space<vmem>>, vector<1x90x1xf32>
    %125 = vector.shape_cast %124 : vector<1x90x1xf32> to vector<90x1xf32>
    %c7_72 = arith.constant 7 : index
    %c0_73 = arith.constant 0 : index
    %126 = vector.load %arg2[%c7_72, %c0_73] : memref<9x32xf32, #tpu.memory_space<vmem>>, vector<1x32xf32>
    %127 = vector.broadcast %125 : vector<90x1xf32> to vector<90x32xf32>
    %128 = vector.broadcast %126 : vector<1x32xf32> to vector<90x32xf32>
    %129 = arith.mulf %127, %128 : vector<90x32xf32>
    %130 = arith.addf %123, %129 : vector<90x32xf32>
    %c0_74 = arith.constant 0 : index
    %c128 = arith.constant 128 : index
    %c0_75 = arith.constant 0 : index
    %131 = vector.load %arg1[%c0_74, %c128, %c0_75] : memref<1x332x1xf32, #tpu.memory_space<vmem>>, vector<1x90x1xf32>
    %132 = vector.shape_cast %131 : vector<1x90x1xf32> to vector<90x1xf32>
    %c8_76 = arith.constant 8 : index
    %c0_77 = arith.constant 0 : index
    %133 = vector.load %arg2[%c8_76, %c0_77] : memref<9x32xf32, #tpu.memory_space<vmem>>, vector<1x32xf32>
    %134 = vector.broadcast %132 : vector<90x1xf32> to vector<90x32xf32>
    %135 = vector.broadcast %133 : vector<1x32xf32> to vector<90x32xf32>
    %136 = arith.mulf %134, %135 : vector<90x32xf32>
    %137 = arith.addf %130, %136 : vector<90x32xf32>
    %c0_78 = arith.constant 0 : index
    %c0_79 = arith.constant 0 : index
    %138 = vector.load %arg3[%c0_78, %c0_79] : memref<1x32xf32, #tpu.memory_space<vmem>>, vector<1x32xf32>
    %139 = vector.broadcast %138 : vector<1x32xf32> to vector<90x32xf32>
    %140 = arith.addf %137, %139 : vector<90x32xf32>
    %cst_80 = arith.constant 0.000000e+00 : f32
    %141 = vector.broadcast %cst_80 : f32 to vector<90x32xf32>
    %142 = arith.maximumf %140, %141 : vector<90x32xf32>
    %c90_81 = arith.constant 90 : index
    %c0_82 = arith.constant 0 : index
    %143 = vector.load %arg13[%c90_81, %c0_82] : memref<288x32xf32, #tpu.memory_space<vmem>>, vector<90x32xf32>
    tpu.vector_store %arg13[%c90_81, %c0_82], %142 {strides = array<i32>} : memref<288x32xf32, #tpu.memory_space<vmem>>, vector<90x32xf32>,
    %cst_83 = arith.constant 0.000000e+00 : f32
    %144 = vector.broadcast %cst_83 : f32 to vector<90x32xf32>
    %c0_84 = arith.constant 0 : index
    %c180 = arith.constant 180 : index
    %c0_85 = arith.constant 0 : index
    %145 = vector.load %arg1[%c0_84, %c180, %c0_85] : memref<1x332x1xf32, #tpu.memory_space<vmem>>, vector<1x90x1xf32>
    %146 = vector.shape_cast %145 : vector<1x90x1xf32> to vector<90x1xf32>
    %c0_86 = arith.constant 0 : index
    %c0_87 = arith.constant 0 : index
    %147 = vector.load %arg2[%c0_86, %c0_87] : memref<9x32xf32, #tpu.memory_space<vmem>>, vector<1x32xf32>
    %148 = vector.broadcast %146 : vector<90x1xf32> to vector<90x32xf32>
    %149 = vector.broadcast %147 : vector<1x32xf32> to vector<90x32xf32>
    %150 = arith.mulf %148, %149 : vector<90x32xf32>
    %151 = arith.addf %144, %150 : vector<90x32xf32>
    %c0_88 = arith.constant 0 : index
    %c181 = arith.constant 181 : index
    %c0_89 = arith.constant 0 : index
    %152 = vector.load %arg1[%c0_88, %c181, %c0_89] : memref<1x332x1xf32, #tpu.memory_space<vmem>>, vector<1x90x1xf32>
    %153 = vector.shape_cast %152 : vector<1x90x1xf32> to vector<90x1xf32>
    %c1_90 = arith.constant 1 : index
    %c0_91 = arith.constant 0 : index
    %154 = vector.load %arg2[%c1_90, %c0_91] : memref<9x32xf32, #tpu.memory_space<vmem>>, vector<1x32xf32>
    %155 = vector.broadcast %153 : vector<90x1xf32> to vector<90x32xf32>
    %156 = vector.broadcast %154 : vector<1x32xf32> to vector<90x32xf32>
    %157 = arith.mulf %155, %156 : vector<90x32xf32>
    %158 = arith.addf %151, %157 : vector<90x32xf32>
    %c0_92 = arith.constant 0 : index
    %c182 = arith.constant 182 : index
    %c0_93 = arith.constant 0 : index
    %159 = vector.load %arg1[%c0_92, %c182, %c0_93] : memref<1x332x1xf32, #tpu.memory_space<vmem>>, vector<1x90x1xf32>
    %160 = vector.shape_cast %159 : vector<1x90x1xf32> to vector<90x1xf32>
    %c2_94 = arith.constant 2 : index
    %c0_95 = arith.constant 0 : index
    %161 = vector.load %arg2[%c2_94, %c0_95] : memref<9x32xf32, #tpu.memory_space<vmem>>, vector<1x32xf32>
    %162 = vector.broadcast %160 : vector<90x1xf32> to vector<90x32xf32>
    %163 = vector.broadcast %161 : vector<1x32xf32> to vector<90x32xf32>
    %164 = arith.mulf %162, %163 : vector<90x32xf32>
    %165 = arith.addf %158, %164 : vector<90x32xf32>
    %c0_96 = arith.constant 0 : index
    %c198 = arith.constant 198 : index
    %c0_97 = arith.constant 0 : index
    %166 = vector.load %arg1[%c0_96, %c198, %c0_97] : memref<1x332x1xf32, #tpu.memory_space<vmem>>, vector<1x90x1xf32>
    %167 = vector.shape_cast %166 : vector<1x90x1xf32> to vector<90x1xf32>
    %c3_98 = arith.constant 3 : index
    %c0_99 = arith.constant 0 : index
    %168 = vector.load %arg2[%c3_98, %c0_99] : memref<9x32xf32, #tpu.memory_space<vmem>>, vector<1x32xf32>
    %169 = vector.broadcast %167 : vector<90x1xf32> to vector<90x32xf32>
    %170 = vector.broadcast %168 : vector<1x32xf32> to vector<90x32xf32>
    %171 = arith.mulf %169, %170 : vector<90x32xf32>
    %172 = arith.addf %165, %171 : vector<90x32xf32>
    %c0_100 = arith.constant 0 : index
    %c199 = arith.constant 199 : index
    %c0_101 = arith.constant 0 : index
    %173 = vector.load %arg1[%c0_100, %c199, %c0_101] : memref<1x332x1xf32, #tpu.memory_space<vmem>>, vector<1x90x1xf32>
    %174 = vector.shape_cast %173 : vector<1x90x1xf32> to vector<90x1xf32>
    %c4_102 = arith.constant 4 : index
    %c0_103 = arith.constant 0 : index
    %175 = vector.load %arg2[%c4_102, %c0_103] : memref<9x32xf32, #tpu.memory_space<vmem>>, vector<1x32xf32>
    %176 = vector.broadcast %174 : vector<90x1xf32> to vector<90x32xf32>
    %177 = vector.broadcast %175 : vector<1x32xf32> to vector<90x32xf32>
    %178 = arith.mulf %176, %177 : vector<90x32xf32>
    %179 = arith.addf %172, %178 : vector<90x32xf32>
    %c0_104 = arith.constant 0 : index
    %c200 = arith.constant 200 : index
    %c0_105 = arith.constant 0 : index
    %180 = vector.load %arg1[%c0_104, %c200, %c0_105] : memref<1x332x1xf32, #tpu.memory_space<vmem>>, vector<1x90x1xf32>
    %181 = vector.shape_cast %180 : vector<1x90x1xf32> to vector<90x1xf32>
    %c5_106 = arith.constant 5 : index
    %c0_107 = arith.constant 0 : index
    %182 = vector.load %arg2[%c5_106, %c0_107] : memref<9x32xf32, #tpu.memory_space<vmem>>, vector<1x32xf32>
    %183 = vector.broadcast %181 : vector<90x1xf32> to vector<90x32xf32>
    %184 = vector.broadcast %182 : vector<1x32xf32> to vector<90x32xf32>
    %185 = arith.mulf %183, %184 : vector<90x32xf32>
    %186 = arith.addf %179, %185 : vector<90x32xf32>
    %c0_108 = arith.constant 0 : index
    %c216 = arith.constant 216 : index
    %c0_109 = arith.constant 0 : index
    %187 = vector.load %arg1[%c0_108, %c216, %c0_109] : memref<1x332x1xf32, #tpu.memory_space<vmem>>, vector<1x90x1xf32>
    %188 = vector.shape_cast %187 : vector<1x90x1xf32> to vector<90x1xf32>
    %c6_110 = arith.constant 6 : index
    %c0_111 = arith.constant 0 : index
    %189 = vector.load %arg2[%c6_110, %c0_111] : memref<9x32xf32, #tpu.memory_space<vmem>>, vector<1x32xf32>
    %190 = vector.broadcast %188 : vector<90x1xf32> to vector<90x32xf32>
    %191 = vector.broadcast %189 : vector<1x32xf32> to vector<90x32xf32>
    %192 = arith.mulf %190, %191 : vector<90x32xf32>
    %193 = arith.addf %186, %192 : vector<90x32xf32>
    %c0_112 = arith.constant 0 : index
    %c217 = arith.constant 217 : index
    %c0_113 = arith.constant 0 : index
    %194 = vector.load %arg1[%c0_112, %c217, %c0_113] : memref<1x332x1xf32, #tpu.memory_space<vmem>>, vector<1x90x1xf32>
    %195 = vector.shape_cast %194 : vector<1x90x1xf32> to vector<90x1xf32>
    %c7_114 = arith.constant 7 : index
    %c0_115 = arith.constant 0 : index
    %196 = vector.load %arg2[%c7_114, %c0_115] : memref<9x32xf32, #tpu.memory_space<vmem>>, vector<1x32xf32>
    %197 = vector.broadcast %195 : vector<90x1xf32> to vector<90x32xf32>
    %198 = vector.broadcast %196 : vector<1x32xf32> to vector<90x32xf32>
    %199 = arith.mulf %197, %198 : vector<90x32xf32>
    %200 = arith.addf %193, %199 : vector<90x32xf32>
    %c0_116 = arith.constant 0 : index
    %c218 = arith.constant 218 : index
    %c0_117 = arith.constant 0 : index
    %201 = vector.load %arg1[%c0_116, %c218, %c0_117] : memref<1x332x1xf32, #tpu.memory_space<vmem>>, vector<1x90x1xf32>
    %202 = vector.shape_cast %201 : vector<1x90x1xf32> to vector<90x1xf32>
    %c8_118 = arith.constant 8 : index
    %c0_119 = arith.constant 0 : index
    %203 = vector.load %arg2[%c8_118, %c0_119] : memref<9x32xf32, #tpu.memory_space<vmem>>, vector<1x32xf32>
    %204 = vector.broadcast %202 : vector<90x1xf32> to vector<90x32xf32>
    %205 = vector.broadcast %203 : vector<1x32xf32> to vector<90x32xf32>
    %206 = arith.mulf %204, %205 : vector<90x32xf32>
    %207 = arith.addf %200, %206 : vector<90x32xf32>
    %c0_120 = arith.constant 0 : index
    %c0_121 = arith.constant 0 : index
    %208 = vector.load %arg3[%c0_120, %c0_121] : memref<1x32xf32, #tpu.memory_space<vmem>>, vector<1x32xf32>
    %209 = vector.broadcast %208 : vector<1x32xf32> to vector<90x32xf32>
    %210 = arith.addf %207, %209 : vector<90x32xf32>
    %cst_122 = arith.constant 0.000000e+00 : f32
    %211 = vector.broadcast %cst_122 : f32 to vector<90x32xf32>
    %212 = arith.maximumf %210, %211 : vector<90x32xf32>
    %c180_123 = arith.constant 180 : index
    %c0_124 = arith.constant 0 : index
    %213 = vector.load %arg13[%c180_123, %c0_124] : memref<288x32xf32, #tpu.memory_space<vmem>>, vector<90x32xf32>
    tpu.vector_store %arg13[%c180_123, %c0_124], %212 {strides = array<i32>} : memref<288x32xf32, #tpu.memory_space<vmem>>, vector<90x32xf32>,
    %cst_125 = arith.constant 0.000000e+00 : f32
    %214 = vector.broadcast %cst_125 : f32 to vector<18x32xf32>
    %c0_126 = arith.constant 0 : index
    %c270 = arith.constant 270 : index
    %c0_127 = arith.constant 0 : index
    %215 = vector.load %arg1[%c0_126, %c270, %c0_127] : memref<1x332x1xf32, #tpu.memory_space<vmem>>, vector<1x18x1xf32>
    %216 = vector.shape_cast %215 : vector<1x18x1xf32> to vector<18x1xf32>
    %c0_128 = arith.constant 0 : index
    %c0_129 = arith.constant 0 : index
    %217 = vector.load %arg2[%c0_128, %c0_129] : memref<9x32xf32, #tpu.memory_space<vmem>>, vector<1x32xf32>
    %218 = vector.broadcast %216 : vector<18x1xf32> to vector<18x32xf32>
    %219 = vector.broadcast %217 : vector<1x32xf32> to vector<18x32xf32>
    %220 = arith.mulf %218, %219 : vector<18x32xf32>
    %221 = arith.addf %214, %220 : vector<18x32xf32>
    %c0_130 = arith.constant 0 : index
    %c271 = arith.constant 271 : index
    %c0_131 = arith.constant 0 : index
    %222 = vector.load %arg1[%c0_130, %c271, %c0_131] : memref<1x332x1xf32, #tpu.memory_space<vmem>>, vector<1x18x1xf32>
    %223 = vector.shape_cast %222 : vector<1x18x1xf32> to vector<18x1xf32>
    %c1_132 = arith.constant 1 : index
    %c0_133 = arith.constant 0 : index
    %224 = vector.load %arg2[%c1_132, %c0_133] : memref<9x32xf32, #tpu.memory_space<vmem>>, vector<1x32xf32>
    %225 = vector.broadcast %223 : vector<18x1xf32> to vector<18x32xf32>
    %226 = vector.broadcast %224 : vector<1x32xf32> to vector<18x32xf32>
    %227 = arith.mulf %225, %226 : vector<18x32xf32>
    %228 = arith.addf %221, %227 : vector<18x32xf32>
    %c0_134 = arith.constant 0 : index
    %c272 = arith.constant 272 : index
    %c0_135 = arith.constant 0 : index
    %229 = vector.load %arg1[%c0_134, %c272, %c0_135] : memref<1x332x1xf32, #tpu.memory_space<vmem>>, vector<1x18x1xf32>
    %230 = vector.shape_cast %229 : vector<1x18x1xf32> to vector<18x1xf32>
    %c2_136 = arith.constant 2 : index
    %c0_137 = arith.constant 0 : index
    %231 = vector.load %arg2[%c2_136, %c0_137] : memref<9x32xf32, #tpu.memory_space<vmem>>, vector<1x32xf32>
    %232 = vector.broadcast %230 : vector<18x1xf32> to vector<18x32xf32>
    %233 = vector.broadcast %231 : vector<1x32xf32> to vector<18x32xf32>
    %234 = arith.mulf %232, %233 : vector<18x32xf32>
    %235 = arith.addf %228, %234 : vector<18x32xf32>
    %c0_138 = arith.constant 0 : index
    %c288 = arith.constant 288 : index
    %c0_139 = arith.constant 0 : index
    %236 = vector.load %arg1[%c0_138, %c288, %c0_139] : memref<1x332x1xf32, #tpu.memory_space<vmem>>, vector<1x18x1xf32>
    %237 = vector.shape_cast %236 : vector<1x18x1xf32> to vector<18x1xf32>
    %c3_140 = arith.constant 3 : index
    %c0_141 = arith.constant 0 : index
    %238 = vector.load %arg2[%c3_140, %c0_141] : memref<9x32xf32, #tpu.memory_space<vmem>>, vector<1x32xf32>
    %239 = vector.broadcast %237 : vector<18x1xf32> to vector<18x32xf32>
    %240 = vector.broadcast %238 : vector<1x32xf32> to vector<18x32xf32>
    %241 = arith.mulf %239, %240 : vector<18x32xf32>
    %242 = arith.addf %235, %241 : vector<18x32xf32>
    %c0_142 = arith.constant 0 : index
    %c289 = arith.constant 289 : index
    %c0_143 = arith.constant 0 : index
    %243 = vector.load %arg1[%c0_142, %c289, %c0_143] : memref<1x332x1xf32, #tpu.memory_space<vmem>>, vector<1x18x1xf32>
    %244 = vector.shape_cast %243 : vector<1x18x1xf32> to vector<18x1xf32>
    %c4_144 = arith.constant 4 : index
    %c0_145 = arith.constant 0 : index
    %245 = vector.load %arg2[%c4_144, %c0_145] : memref<9x32xf32, #tpu.memory_space<vmem>>, vector<1x32xf32>
    %246 = vector.broadcast %244 : vector<18x1xf32> to vector<18x32xf32>
    %247 = vector.broadcast %245 : vector<1x32xf32> to vector<18x32xf32>
    %248 = arith.mulf %246, %247 : vector<18x32xf32>
    %249 = arith.addf %242, %248 : vector<18x32xf32>
    %c0_146 = arith.constant 0 : index
    %c290 = arith.constant 290 : index
    %c0_147 = arith.constant 0 : index
    %250 = vector.load %arg1[%c0_146, %c290, %c0_147] : memref<1x332x1xf32, #tpu.memory_space<vmem>>, vector<1x18x1xf32>
    %251 = vector.shape_cast %250 : vector<1x18x1xf32> to vector<18x1xf32>
    %c5_148 = arith.constant 5 : index
    %c0_149 = arith.constant 0 : index
    %252 = vector.load %arg2[%c5_148, %c0_149] : memref<9x32xf32, #tpu.memory_space<vmem>>, vector<1x32xf32>
    %253 = vector.broadcast %251 : vector<18x1xf32> to vector<18x32xf32>
    %254 = vector.broadcast %252 : vector<1x32xf32> to vector<18x32xf32>
    %255 = arith.mulf %253, %254 : vector<18x32xf32>
    %256 = arith.addf %249, %255 : vector<18x32xf32>
    %c0_150 = arith.constant 0 : index
    %c306 = arith.constant 306 : index
    %c0_151 = arith.constant 0 : index
    %257 = vector.load %arg1[%c0_150, %c306, %c0_151] : memref<1x332x1xf32, #tpu.memory_space<vmem>>, vector<1x18x1xf32>
    %258 = vector.shape_cast %257 : vector<1x18x1xf32> to vector<18x1xf32>
    %c6_152 = arith.constant 6 : index
    %c0_153 = arith.constant 0 : index
    %259 = vector.load %arg2[%c6_152, %c0_153] : memref<9x32xf32, #tpu.memory_space<vmem>>, vector<1x32xf32>
    %260 = vector.broadcast %258 : vector<18x1xf32> to vector<18x32xf32>
    %261 = vector.broadcast %259 : vector<1x32xf32> to vector<18x32xf32>
    %262 = arith.mulf %260, %261 : vector<18x32xf32>
    %263 = arith.addf %256, %262 : vector<18x32xf32>
    %c0_154 = arith.constant 0 : index
    %c307 = arith.constant 307 : index
    %c0_155 = arith.constant 0 : index
    %264 = vector.load %arg1[%c0_154, %c307, %c0_155] : memref<1x332x1xf32, #tpu.memory_space<vmem>>, vector<1x18x1xf32>
    %265 = vector.shape_cast %264 : vector<1x18x1xf32> to vector<18x1xf32>
    %c7_156 = arith.constant 7 : index
    %c0_157 = arith.constant 0 : index
    %266 = vector.load %arg2[%c7_156, %c0_157] : memref<9x32xf32, #tpu.memory_space<vmem>>, vector<1x32xf32>
    %267 = vector.broadcast %265 : vector<18x1xf32> to vector<18x32xf32>
    %268 = vector.broadcast %266 : vector<1x32xf32> to vector<18x32xf32>
    %269 = arith.mulf %267, %268 : vector<18x32xf32>
    %270 = arith.addf %263, %269 : vector<18x32xf32>
    %c0_158 = arith.constant 0 : index
    %c308 = arith.constant 308 : index
    %c0_159 = arith.constant 0 : index
    %271 = vector.load %arg1[%c0_158, %c308, %c0_159] : memref<1x332x1xf32, #tpu.memory_space<vmem>>, vector<1x18x1xf32>
    %272 = vector.shape_cast %271 : vector<1x18x1xf32> to vector<18x1xf32>
    %c8_160 = arith.constant 8 : index
    %c0_161 = arith.constant 0 : index
    %273 = vector.load %arg2[%c8_160, %c0_161] : memref<9x32xf32, #tpu.memory_space<vmem>>, vector<1x32xf32>
    %274 = vector.broadcast %272 : vector<18x1xf32> to vector<18x32xf32>
    %275 = vector.broadcast %273 : vector<1x32xf32> to vector<18x32xf32>
    %276 = arith.mulf %274, %275 : vector<18x32xf32>
    %277 = arith.addf %270, %276 : vector<18x32xf32>
    %c0_162 = arith.constant 0 : index
    %c0_163 = arith.constant 0 : index
    %278 = vector.load %arg3[%c0_162, %c0_163] : memref<1x32xf32, #tpu.memory_space<vmem>>, vector<1x32xf32>
    %279 = vector.broadcast %278 : vector<1x32xf32> to vector<18x32xf32>
    %280 = arith.addf %277, %279 : vector<18x32xf32>
    %cst_164 = arith.constant 0.000000e+00 : f32
    %281 = vector.broadcast %cst_164 : f32 to vector<18x32xf32>
    %282 = arith.maximumf %280, %281 : vector<18x32xf32>
    %c270_165 = arith.constant 270 : index
    %c0_166 = arith.constant 0 : index
    %283 = vector.load %arg13[%c270_165, %c0_166] : memref<288x32xf32, #tpu.memory_space<vmem>>, vector<18x32xf32>
    tpu.vector_store %arg13[%c270_165, %c0_166], %282 {strides = array<i32>} : memref<288x32xf32, #tpu.memory_space<vmem>>, vector<18x32xf32>,
    %c0_167 = arith.constant 0 : index
    %c0_168 = arith.constant 0 : index
    %284 = tpu.strided_load %arg13[%c0_167, %c0_168] {strides = array<i32: 2, 1>} : memref<288x32xf32, #tpu.memory_space<vmem>>, vector<8x32xf32>
    %c1_169 = arith.constant 1 : index
    %c0_170 = arith.constant 0 : index
    %285 = tpu.strided_load %arg13[%c1_169, %c0_170] {strides = array<i32: 2, 1>} : memref<288x32xf32, #tpu.memory_space<vmem>>, vector<8x32xf32>
    %286 = arith.maximumf %284, %285 : vector<8x32xf32>
    %c18_171 = arith.constant 18 : index
    %c0_172 = arith.constant 0 : index
    %287 = tpu.strided_load %arg13[%c18_171, %c0_172] {strides = array<i32: 2, 1>} : memref<288x32xf32, #tpu.memory_space<vmem>>, vector<8x32xf32>
    %c19_173 = arith.constant 19 : index
    %c0_174 = arith.constant 0 : index
    %288 = tpu.strided_load %arg13[%c19_173, %c0_174] {strides = array<i32: 2, 1>} : memref<288x32xf32, #tpu.memory_space<vmem>>, vector<8x32xf32>
    %289 = arith.maximumf %287, %288 : vector<8x32xf32>
    %290 = arith.maximumf %286, %289 : vector<8x32xf32>
    %c11 = arith.constant 11 : index
    %c0_175 = arith.constant 0 : index
    %291 = vector.load %arg14[%c11, %c0_175] : memref<108x32xf32, #tpu.memory_space<vmem>>, vector<8x32xf32>
    tpu.vector_store %arg14[%c11, %c0_175], %290 {strides = array<i32>} : memref<108x32xf32, #tpu.memory_space<vmem>>, vector<8x32xf32>,
    %c36_176 = arith.constant 36 : index
    %c0_177 = arith.constant 0 : index
    %292 = tpu.strided_load %arg13[%c36_176, %c0_177] {strides = array<i32: 2, 1>} : memref<288x32xf32, #tpu.memory_space<vmem>>, vector<8x32xf32>
    %c37_178 = arith.constant 37 : index
    %c0_179 = arith.constant 0 : index
    %293 = tpu.strided_load %arg13[%c37_178, %c0_179] {strides = array<i32: 2, 1>} : memref<288x32xf32, #tpu.memory_space<vmem>>, vector<8x32xf32>
    %294 = arith.maximumf %292, %293 : vector<8x32xf32>
    %c54 = arith.constant 54 : index
    %c0_180 = arith.constant 0 : index
    %295 = tpu.strided_load %arg13[%c54, %c0_180] {strides = array<i32: 2, 1>} : memref<288x32xf32, #tpu.memory_space<vmem>>, vector<8x32xf32>
    %c55 = arith.constant 55 : index
    %c0_181 = arith.constant 0 : index
    %296 = tpu.strided_load %arg13[%c55, %c0_181] {strides = array<i32: 2, 1>} : memref<288x32xf32, #tpu.memory_space<vmem>>, vector<8x32xf32>
    %297 = arith.maximumf %295, %296 : vector<8x32xf32>
    %298 = arith.maximumf %294, %297 : vector<8x32xf32>
    %c21 = arith.constant 21 : index
    %c0_182 = arith.constant 0 : index
    %299 = vector.load %arg14[%c21, %c0_182] : memref<108x32xf32, #tpu.memory_space<vmem>>, vector<8x32xf32>
    tpu.vector_store %arg14[%c21, %c0_182], %298 {strides = array<i32>} : memref<108x32xf32, #tpu.memory_space<vmem>>, vector<8x32xf32>,
    %c72 = arith.constant 72 : index
    %c0_183 = arith.constant 0 : index
    %300 = tpu.strided_load %arg13[%c72, %c0_183] {strides = array<i32: 2, 1>} : memref<288x32xf32, #tpu.memory_space<vmem>>, vector<8x32xf32>
    %c73 = arith.constant 73 : index
    %c0_184 = arith.constant 0 : index
    %301 = tpu.strided_load %arg13[%c73, %c0_184] {strides = array<i32: 2, 1>} : memref<288x32xf32, #tpu.memory_space<vmem>>, vector<8x32xf32>
    %302 = arith.maximumf %300, %301 : vector<8x32xf32>
    %c90_185 = arith.constant 90 : index
    %c0_186 = arith.constant 0 : index
    %303 = tpu.strided_load %arg13[%c90_185, %c0_186] {strides = array<i32: 2, 1>} : memref<288x32xf32, #tpu.memory_space<vmem>>, vector<8x32xf32>
    %c91_187 = arith.constant 91 : index
    %c0_188 = arith.constant 0 : index
    %304 = tpu.strided_load %arg13[%c91_187, %c0_188] {strides = array<i32: 2, 1>} : memref<288x32xf32, #tpu.memory_space<vmem>>, vector<8x32xf32>
    %305 = arith.maximumf %303, %304 : vector<8x32xf32>
    %306 = arith.maximumf %302, %305 : vector<8x32xf32>
    %c31 = arith.constant 31 : index
    %c0_189 = arith.constant 0 : index
    %307 = vector.load %arg14[%c31, %c0_189] : memref<108x32xf32, #tpu.memory_space<vmem>>, vector<8x32xf32>
    tpu.vector_store %arg14[%c31, %c0_189], %306 {strides = array<i32>} : memref<108x32xf32, #tpu.memory_space<vmem>>, vector<8x32xf32>,
    %c108_190 = arith.constant 108 : index
    %c0_191 = arith.constant 0 : index
    %308 = tpu.strided_load %arg13[%c108_190, %c0_191] {strides = array<i32: 2, 1>} : memref<288x32xf32, #tpu.memory_space<vmem>>, vector<8x32xf32>
    %c109_192 = arith.constant 109 : index
    %c0_193 = arith.constant 0 : index
    %309 = tpu.strided_load %arg13[%c109_192, %c0_193] {strides = array<i32: 2, 1>} : memref<288x32xf32, #tpu.memory_space<vmem>>, vector<8x32xf32>
    %310 = arith.maximumf %308, %309 : vector<8x32xf32>
    %c126_194 = arith.constant 126 : index
    %c0_195 = arith.constant 0 : index
    %311 = tpu.strided_load %arg13[%c126_194, %c0_195] {strides = array<i32: 2, 1>} : memref<288x32xf32, #tpu.memory_space<vmem>>, vector<8x32xf32>
    %c127_196 = arith.constant 127 : index
    %c0_197 = arith.constant 0 : index
    %312 = tpu.strided_load %arg13[%c127_196, %c0_197] {strides = array<i32: 2, 1>} : memref<288x32xf32, #tpu.memory_space<vmem>>, vector<8x32xf32>
    %313 = arith.maximumf %311, %312 : vector<8x32xf32>
    %314 = arith.maximumf %310, %313 : vector<8x32xf32>
    %c41 = arith.constant 41 : index
    %c0_198 = arith.constant 0 : index
    %315 = vector.load %arg14[%c41, %c0_198] : memref<108x32xf32, #tpu.memory_space<vmem>>, vector<8x32xf32>
    tpu.vector_store %arg14[%c41, %c0_198], %314 {strides = array<i32>} : memref<108x32xf32, #tpu.memory_space<vmem>>, vector<8x32xf32>,
    %c144 = arith.constant 144 : index
    %c0_199 = arith.constant 0 : index
    %316 = tpu.strided_load %arg13[%c144, %c0_199] {strides = array<i32: 2, 1>} : memref<288x32xf32, #tpu.memory_space<vmem>>, vector<8x32xf32>
    %c145 = arith.constant 145 : index
    %c0_200 = arith.constant 0 : index
    %317 = tpu.strided_load %arg13[%c145, %c0_200] {strides = array<i32: 2, 1>} : memref<288x32xf32, #tpu.memory_space<vmem>>, vector<8x32xf32>
    %318 = arith.maximumf %316, %317 : vector<8x32xf32>
    %c162 = arith.constant 162 : index
    %c0_201 = arith.constant 0 : index
    %319 = tpu.strided_load %arg13[%c162, %c0_201] {strides = array<i32: 2, 1>} : memref<288x32xf32, #tpu.memory_space<vmem>>, vector<8x32xf32>
    %c163 = arith.constant 163 : index
    %c0_202 = arith.constant 0 : index
    %320 = tpu.strided_load %arg13[%c163, %c0_202] {strides = array<i32: 2, 1>} : memref<288x32xf32, #tpu.memory_space<vmem>>, vector<8x32xf32>
    %321 = arith.maximumf %319, %320 : vector<8x32xf32>
    %322 = arith.maximumf %318, %321 : vector<8x32xf32>
    %c51 = arith.constant 51 : index
    %c0_203 = arith.constant 0 : index
    %323 = vector.load %arg14[%c51, %c0_203] : memref<108x32xf32, #tpu.memory_space<vmem>>, vector<8x32xf32>
    tpu.vector_store %arg14[%c51, %c0_203], %322 {strides = array<i32>} : memref<108x32xf32, #tpu.memory_space<vmem>>, vector<8x32xf32>,
    %c180_204 = arith.constant 180 : index
    %c0_205 = arith.constant 0 : index
    %324 = tpu.strided_load %arg13[%c180_204, %c0_205] {strides = array<i32: 2, 1>} : memref<288x32xf32, #tpu.memory_space<vmem>>, vector<8x32xf32>
    %c181_206 = arith.constant 181 : index
    %c0_207 = arith.constant 0 : index
    %325 = tpu.strided_load %arg13[%c181_206, %c0_207] {strides = array<i32: 2, 1>} : memref<288x32xf32, #tpu.memory_space<vmem>>, vector<8x32xf32>
    %326 = arith.maximumf %324, %325 : vector<8x32xf32>
    %c198_208 = arith.constant 198 : index
    %c0_209 = arith.constant 0 : index
    %327 = tpu.strided_load %arg13[%c198_208, %c0_209] {strides = array<i32: 2, 1>} : memref<288x32xf32, #tpu.memory_space<vmem>>, vector<8x32xf32>
    %c199_210 = arith.constant 199 : index
    %c0_211 = arith.constant 0 : index
    %328 = tpu.strided_load %arg13[%c199_210, %c0_211] {strides = array<i32: 2, 1>} : memref<288x32xf32, #tpu.memory_space<vmem>>, vector<8x32xf32>
    %329 = arith.maximumf %327, %328 : vector<8x32xf32>
    %330 = arith.maximumf %326, %329 : vector<8x32xf32>
    %c61 = arith.constant 61 : index
    %c0_212 = arith.constant 0 : index
    %331 = vector.load %arg14[%c61, %c0_212] : memref<108x32xf32, #tpu.memory_space<vmem>>, vector<8x32xf32>
    tpu.vector_store %arg14[%c61, %c0_212], %330 {strides = array<i32>} : memref<108x32xf32, #tpu.memory_space<vmem>>, vector<8x32xf32>,
    %c216_213 = arith.constant 216 : index
    %c0_214 = arith.constant 0 : index
    %332 = tpu.strided_load %arg13[%c216_213, %c0_214] {strides = array<i32: 2, 1>} : memref<288x32xf32, #tpu.memory_space<vmem>>, vector<8x32xf32>
    %c217_215 = arith.constant 217 : index
    %c0_216 = arith.constant 0 : index
    %333 = tpu.strided_load %arg13[%c217_215, %c0_216] {strides = array<i32: 2, 1>} : memref<288x32xf32, #tpu.memory_space<vmem>>, vector<8x32xf32>
    %334 = arith.maximumf %332, %333 : vector<8x32xf32>
    %c234 = arith.constant 234 : index
    %c0_217 = arith.constant 0 : index
    %335 = tpu.strided_load %arg13[%c234, %c0_217] {strides = array<i32: 2, 1>} : memref<288x32xf32, #tpu.memory_space<vmem>>, vector<8x32xf32>
    %c235 = arith.constant 235 : index
    %c0_218 = arith.constant 0 : index
    %336 = tpu.strided_load %arg13[%c235, %c0_218] {strides = array<i32: 2, 1>} : memref<288x32xf32, #tpu.memory_space<vmem>>, vector<8x32xf32>
    %337 = arith.maximumf %335, %336 : vector<8x32xf32>
    %338 = arith.maximumf %334, %337 : vector<8x32xf32>
    %c71 = arith.constant 71 : index
    %c0_219 = arith.constant 0 : index
    %339 = vector.load %arg14[%c71, %c0_219] : memref<108x32xf32, #tpu.memory_space<vmem>>, vector<8x32xf32>
    tpu.vector_store %arg14[%c71, %c0_219], %338 {strides = array<i32>} : memref<108x32xf32, #tpu.memory_space<vmem>>, vector<8x32xf32>,
    %c252 = arith.constant 252 : index
    %c0_220 = arith.constant 0 : index
    %340 = tpu.strided_load %arg13[%c252, %c0_220] {strides = array<i32: 2, 1>} : memref<288x32xf32, #tpu.memory_space<vmem>>, vector<8x32xf32>
    %c253 = arith.constant 253 : index
    %c0_221 = arith.constant 0 : index
    %341 = tpu.strided_load %arg13[%c253, %c0_221] {strides = array<i32: 2, 1>} : memref<288x32xf32, #tpu.memory_space<vmem>>, vector<8x32xf32>
    %342 = arith.maximumf %340, %341 : vector<8x32xf32>
    %c270_222 = arith.constant 270 : index
    %c0_223 = arith.constant 0 : index
    %343 = tpu.strided_load %arg13[%c270_222, %c0_223] {strides = array<i32: 2, 1>} : memref<288x32xf32, #tpu.memory_space<vmem>>, vector<8x32xf32>
    %c271_224 = arith.constant 271 : index
    %c0_225 = arith.constant 0 : index
    %344 = tpu.strided_load %arg13[%c271_224, %c0_225] {strides = array<i32: 2, 1>} : memref<288x32xf32, #tpu.memory_space<vmem>>, vector<8x32xf32>
    %345 = arith.maximumf %343, %344 : vector<8x32xf32>
    %346 = arith.maximumf %342, %345 : vector<8x32xf32>
    %c81 = arith.constant 81 : index
    %c0_226 = arith.constant 0 : index
    %347 = vector.load %arg14[%c81, %c0_226] : memref<108x32xf32, #tpu.memory_space<vmem>>, vector<8x32xf32>
    tpu.vector_store %arg14[%c81, %c0_226], %346 {strides = array<i32>} : memref<108x32xf32, #tpu.memory_space<vmem>>, vector<8x32xf32>,
    %cst_227 = arith.constant 0.000000e+00 : f32
    %348 = vector.broadcast %cst_227 : f32 to vector<80x64xf32>
    %c0_228 = arith.constant 0 : index
    %c0_229 = arith.constant 0 : index
    %349 = vector.load %arg14[%c0_228, %c0_229] : memref<108x32xf32, #tpu.memory_space<vmem>>, vector<80x32xf32>
    %350 = arith.truncf %349 : vector<80x32xf32> to vector<80x32xbf16>
    %c0_230 = arith.constant 0 : index
    %c0_231 = arith.constant 0 : index
    %351 = vector.load %arg4[%c0_230, %c0_231] : memref<288x64xbf16, #tpu.memory_space<vmem>>, vector<32x64xbf16>
    %cst_232 = arith.constant dense<0.000000e+00> : vector<80x64xf32>
    %352 = tpu.matmul %350, %351, %cst_232 {dimension_numbers = #tpu.dot_dimension_numbers<[1], [0], [0], [1], [0, 0, 1, 1], [], []>} : vector<80x32xbf16>, vector<32x64xbf16>, vector<80x64xf32> -> vector<80x64xf32>
    %353 = arith.addf %348, %352 : vector<80x64xf32>
    %c1_233 = arith.constant 1 : index
    %c0_234 = arith.constant 0 : index
    %354 = vector.load %arg14[%c1_233, %c0_234] : memref<108x32xf32, #tpu.memory_space<vmem>>, vector<80x32xf32>
    %355 = arith.truncf %354 : vector<80x32xf32> to vector<80x32xbf16>
    %c32 = arith.constant 32 : index
    %c0_235 = arith.constant 0 : index
    %356 = vector.load %arg4[%c32, %c0_235] : memref<288x64xbf16, #tpu.memory_space<vmem>>, vector<32x64xbf16>
    %cst_236 = arith.constant dense<0.000000e+00> : vector<80x64xf32>
    %357 = tpu.matmul %355, %356, %cst_236 {dimension_numbers = #tpu.dot_dimension_numbers<[1], [0], [0], [1], [0, 0, 1, 1], [], []>} : vector<80x32xbf16>, vector<32x64xbf16>, vector<80x64xf32> -> vector<80x64xf32>
    %358 = arith.addf %353, %357 : vector<80x64xf32>
    %c2_237 = arith.constant 2 : index
    %c0_238 = arith.constant 0 : index
    %359 = vector.load %arg14[%c2_237, %c0_238] : memref<108x32xf32, #tpu.memory_space<vmem>>, vector<80x32xf32>
    %360 = arith.truncf %359 : vector<80x32xf32> to vector<80x32xbf16>
    %c64 = arith.constant 64 : index
    %c0_239 = arith.constant 0 : index
    %361 = vector.load %arg4[%c64, %c0_239] : memref<288x64xbf16, #tpu.memory_space<vmem>>, vector<32x64xbf16>
    %cst_240 = arith.constant dense<0.000000e+00> : vector<80x64xf32>
    %362 = tpu.matmul %360, %361, %cst_240 {dimension_numbers = #tpu.dot_dimension_numbers<[1], [0], [0], [1], [0, 0, 1, 1], [], []>} : vector<80x32xbf16>, vector<32x64xbf16>, vector<80x64xf32> -> vector<80x64xf32>
    %363 = arith.addf %358, %362 : vector<80x64xf32>
    %c10 = arith.constant 10 : index
    %c0_241 = arith.constant 0 : index
    %364 = vector.load %arg14[%c10, %c0_241] : memref<108x32xf32, #tpu.memory_space<vmem>>, vector<80x32xf32>
    %365 = arith.truncf %364 : vector<80x32xf32> to vector<80x32xbf16>
    %c96 = arith.constant 96 : index
    %c0_242 = arith.constant 0 : index
    %366 = vector.load %arg4[%c96, %c0_242] : memref<288x64xbf16, #tpu.memory_space<vmem>>, vector<32x64xbf16>
    %cst_243 = arith.constant dense<0.000000e+00> : vector<80x64xf32>
    %367 = tpu.matmul %365, %366, %cst_243 {dimension_numbers = #tpu.dot_dimension_numbers<[1], [0], [0], [1], [0, 0, 1, 1], [], []>} : vector<80x32xbf16>, vector<32x64xbf16>, vector<80x64xf32> -> vector<80x64xf32>
    %368 = arith.addf %363, %367 : vector<80x64xf32>
    %c11_244 = arith.constant 11 : index
    %c0_245 = arith.constant 0 : index
    %369 = vector.load %arg14[%c11_244, %c0_245] : memref<108x32xf32, #tpu.memory_space<vmem>>, vector<80x32xf32>
    %370 = arith.truncf %369 : vector<80x32xf32> to vector<80x32xbf16>
    %c128_246 = arith.constant 128 : index
    %c0_247 = arith.constant 0 : index
    %371 = vector.load %arg4[%c128_246, %c0_247] : memref<288x64xbf16, #tpu.memory_space<vmem>>, vector<32x64xbf16>
    %cst_248 = arith.constant dense<0.000000e+00> : vector<80x64xf32>
    %372 = tpu.matmul %370, %371, %cst_248 {dimension_numbers = #tpu.dot_dimension_numbers<[1], [0], [0], [1], [0, 0, 1, 1], [], []>} : vector<80x32xbf16>, vector<32x64xbf16>, vector<80x64xf32> -> vector<80x64xf32>
    %373 = arith.addf %368, %372 : vector<80x64xf32>
    %c12 = arith.constant 12 : index
    %c0_249 = arith.constant 0 : index
    %374 = vector.load %arg14[%c12, %c0_249] : memref<108x32xf32, #tpu.memory_space<vmem>>, vector<80x32xf32>
    %375 = arith.truncf %374 : vector<80x32xf32> to vector<80x32xbf16>
    %c160 = arith.constant 160 : index
    %c0_250 = arith.constant 0 : index
    %376 = vector.load %arg4[%c160, %c0_250] : memref<288x64xbf16, #tpu.memory_space<vmem>>, vector<32x64xbf16>
    %cst_251 = arith.constant dense<0.000000e+00> : vector<80x64xf32>
    %377 = tpu.matmul %375, %376, %cst_251 {dimension_numbers = #tpu.dot_dimension_numbers<[1], [0], [0], [1], [0, 0, 1, 1], [], []>} : vector<80x32xbf16>, vector<32x64xbf16>, vector<80x64xf32> -> vector<80x64xf32>
    %378 = arith.addf %373, %377 : vector<80x64xf32>
    %c20_252 = arith.constant 20 : index
    %c0_253 = arith.constant 0 : index
    %379 = vector.load %arg14[%c20_252, %c0_253] : memref<108x32xf32, #tpu.memory_space<vmem>>, vector<80x32xf32>
    %380 = arith.truncf %379 : vector<80x32xf32> to vector<80x32xbf16>
    %c192 = arith.constant 192 : index
    %c0_254 = arith.constant 0 : index
    %381 = vector.load %arg4[%c192, %c0_254] : memref<288x64xbf16, #tpu.memory_space<vmem>>, vector<32x64xbf16>
    %cst_255 = arith.constant dense<0.000000e+00> : vector<80x64xf32>
    %382 = tpu.matmul %380, %381, %cst_255 {dimension_numbers = #tpu.dot_dimension_numbers<[1], [0], [0], [1], [0, 0, 1, 1], [], []>} : vector<80x32xbf16>, vector<32x64xbf16>, vector<80x64xf32> -> vector<80x64xf32>
    %383 = arith.addf %378, %382 : vector<80x64xf32>
    %c21_256 = arith.constant 21 : index
    %c0_257 = arith.constant 0 : index
    %384 = vector.load %arg14[%c21_256, %c0_257] : memref<108x32xf32, #tpu.memory_space<vmem>>, vector<80x32xf32>
    %385 = arith.truncf %384 : vector<80x32xf32> to vector<80x32xbf16>
    %c224 = arith.constant 224 : index
    %c0_258 = arith.constant 0 : index
    %386 = vector.load %arg4[%c224, %c0_258] : memref<288x64xbf16, #tpu.memory_space<vmem>>, vector<32x64xbf16>
    %cst_259 = arith.constant dense<0.000000e+00> : vector<80x64xf32>
    %387 = tpu.matmul %385, %386, %cst_259 {dimension_numbers = #tpu.dot_dimension_numbers<[1], [0], [0], [1], [0, 0, 1, 1], [], []>} : vector<80x32xbf16>, vector<32x64xbf16>, vector<80x64xf32> -> vector<80x64xf32>
    %388 = arith.addf %383, %387 : vector<80x64xf32>
    %c22 = arith.constant 22 : index
    %c0_260 = arith.constant 0 : index
    %389 = vector.load %arg14[%c22, %c0_260] : memref<108x32xf32, #tpu.memory_space<vmem>>, vector<80x32xf32>
    %390 = arith.truncf %389 : vector<80x32xf32> to vector<80x32xbf16>
    %c256 = arith.constant 256 : index
    %c0_261 = arith.constant 0 : index
    %391 = vector.load %arg4[%c256, %c0_261] : memref<288x64xbf16, #tpu.memory_space<vmem>>, vector<32x64xbf16>
    %cst_262 = arith.constant dense<0.000000e+00> : vector<80x64xf32>
    %392 = tpu.matmul %390, %391, %cst_262 {dimension_numbers = #tpu.dot_dimension_numbers<[1], [0], [0], [1], [0, 0, 1, 1], [], []>} : vector<80x32xbf16>, vector<32x64xbf16>, vector<80x64xf32> -> vector<80x64xf32>
    %393 = arith.addf %388, %392 : vector<80x64xf32>
    %c0_263 = arith.constant 0 : index
    %c0_264 = arith.constant 0 : index
    %394 = vector.load %arg5[%c0_263, %c0_264] : memref<1x64xf32, #tpu.memory_space<vmem>>, vector<1x64xf32>
    %395 = vector.broadcast %394 : vector<1x64xf32> to vector<80x64xf32>
    %396 = arith.addf %393, %395 : vector<80x64xf32>
    %cst_265 = arith.constant 0.000000e+00 : f32
    %397 = vector.broadcast %cst_265 : f32 to vector<80x64xf32>
    %398 = arith.maximumf %396, %397 : vector<80x64xf32>
    %c0_266 = arith.constant 0 : index
    %c0_267 = arith.constant 0 : index
    %399 = vector.load %arg15[%c0_266, %c0_267] : memref<80x64xf32, #tpu.memory_space<vmem>>, vector<80x64xf32>
    tpu.vector_store %arg15[%c0_266, %c0_267], %398 {strides = array<i32>} : memref<80x64xf32, #tpu.memory_space<vmem>>, vector<80x64xf32>,
    %c0_268 = arith.constant 0 : index
    %c0_269 = arith.constant 0 : index
    %400 = tpu.strided_load %arg15[%c0_268, %c0_269] {strides = array<i32: 2, 1>} : memref<80x64xf32, #tpu.memory_space<vmem>>, vector<4x64xf32>
    %c1_270 = arith.constant 1 : index
    %c0_271 = arith.constant 0 : index
    %401 = tpu.strided_load %arg15[%c1_270, %c0_271] {strides = array<i32: 2, 1>} : memref<80x64xf32, #tpu.memory_space<vmem>>, vector<4x64xf32>
    %402 = arith.maximumf %400, %401 : vector<4x64xf32>
    %c10_272 = arith.constant 10 : index
    %c0_273 = arith.constant 0 : index
    %403 = tpu.strided_load %arg15[%c10_272, %c0_273] {strides = array<i32: 2, 1>} : memref<80x64xf32, #tpu.memory_space<vmem>>, vector<4x64xf32>
    %c11_274 = arith.constant 11 : index
    %c0_275 = arith.constant 0 : index
    %404 = tpu.strided_load %arg15[%c11_274, %c0_275] {strides = array<i32: 2, 1>} : memref<80x64xf32, #tpu.memory_space<vmem>>, vector<4x64xf32>
    %405 = arith.maximumf %403, %404 : vector<4x64xf32>
    %406 = arith.maximumf %402, %405 : vector<4x64xf32>
    %c7_276 = arith.constant 7 : index
    %c0_277 = arith.constant 0 : index
    %407 = vector.load %arg16[%c7_276, %c0_277] : memref<44x64xf32, #tpu.memory_space<vmem>>, vector<4x64xf32>
    tpu.vector_store %arg16[%c7_276, %c0_277], %406 {strides = array<i32>} : memref<44x64xf32, #tpu.memory_space<vmem>>, vector<4x64xf32>,
    %c20_278 = arith.constant 20 : index
    %c0_279 = arith.constant 0 : index
    %408 = tpu.strided_load %arg15[%c20_278, %c0_279] {strides = array<i32: 2, 1>} : memref<80x64xf32, #tpu.memory_space<vmem>>, vector<4x64xf32>
    %c21_280 = arith.constant 21 : index
    %c0_281 = arith.constant 0 : index
    %409 = tpu.strided_load %arg15[%c21_280, %c0_281] {strides = array<i32: 2, 1>} : memref<80x64xf32, #tpu.memory_space<vmem>>, vector<4x64xf32>
    %410 = arith.maximumf %408, %409 : vector<4x64xf32>
    %c30 = arith.constant 30 : index
    %c0_282 = arith.constant 0 : index
    %411 = tpu.strided_load %arg15[%c30, %c0_282] {strides = array<i32: 2, 1>} : memref<80x64xf32, #tpu.memory_space<vmem>>, vector<4x64xf32>
    %c31_283 = arith.constant 31 : index
    %c0_284 = arith.constant 0 : index
    %412 = tpu.strided_load %arg15[%c31_283, %c0_284] {strides = array<i32: 2, 1>} : memref<80x64xf32, #tpu.memory_space<vmem>>, vector<4x64xf32>
    %413 = arith.maximumf %411, %412 : vector<4x64xf32>
    %414 = arith.maximumf %410, %413 : vector<4x64xf32>
    %c13 = arith.constant 13 : index
    %c0_285 = arith.constant 0 : index
    %415 = vector.load %arg16[%c13, %c0_285] : memref<44x64xf32, #tpu.memory_space<vmem>>, vector<4x64xf32>
    tpu.vector_store %arg16[%c13, %c0_285], %414 {strides = array<i32>} : memref<44x64xf32, #tpu.memory_space<vmem>>, vector<4x64xf32>,
    %c40 = arith.constant 40 : index
    %c0_286 = arith.constant 0 : index
    %416 = tpu.strided_load %arg15[%c40, %c0_286] {strides = array<i32: 2, 1>} : memref<80x64xf32, #tpu.memory_space<vmem>>, vector<4x64xf32>
    %c41_287 = arith.constant 41 : index
    %c0_288 = arith.constant 0 : index
    %417 = tpu.strided_load %arg15[%c41_287, %c0_288] {strides = array<i32: 2, 1>} : memref<80x64xf32, #tpu.memory_space<vmem>>, vector<4x64xf32>
    %418 = arith.maximumf %416, %417 : vector<4x64xf32>
    %c50 = arith.constant 50 : index
    %c0_289 = arith.constant 0 : index
    %419 = tpu.strided_load %arg15[%c50, %c0_289] {strides = array<i32: 2, 1>} : memref<80x64xf32, #tpu.memory_space<vmem>>, vector<4x64xf32>
    %c51_290 = arith.constant 51 : index
    %c0_291 = arith.constant 0 : index
    %420 = tpu.strided_load %arg15[%c51_290, %c0_291] {strides = array<i32: 2, 1>} : memref<80x64xf32, #tpu.memory_space<vmem>>, vector<4x64xf32>
    %421 = arith.maximumf %419, %420 : vector<4x64xf32>
    %422 = arith.maximumf %418, %421 : vector<4x64xf32>
    %c19_292 = arith.constant 19 : index
    %c0_293 = arith.constant 0 : index
    %423 = vector.load %arg16[%c19_292, %c0_293] : memref<44x64xf32, #tpu.memory_space<vmem>>, vector<4x64xf32>
    tpu.vector_store %arg16[%c19_292, %c0_293], %422 {strides = array<i32>} : memref<44x64xf32, #tpu.memory_space<vmem>>, vector<4x64xf32>,
    %c60 = arith.constant 60 : index
    %c0_294 = arith.constant 0 : index
    %424 = tpu.strided_load %arg15[%c60, %c0_294] {strides = array<i32: 2, 1>} : memref<80x64xf32, #tpu.memory_space<vmem>>, vector<4x64xf32>
    %c61_295 = arith.constant 61 : index
    %c0_296 = arith.constant 0 : index
    %425 = tpu.strided_load %arg15[%c61_295, %c0_296] {strides = array<i32: 2, 1>} : memref<80x64xf32, #tpu.memory_space<vmem>>, vector<4x64xf32>
    %426 = arith.maximumf %424, %425 : vector<4x64xf32>
    %c70 = arith.constant 70 : index
    %c0_297 = arith.constant 0 : index
    %427 = tpu.strided_load %arg15[%c70, %c0_297] {strides = array<i32: 2, 1>} : memref<80x64xf32, #tpu.memory_space<vmem>>, vector<4x64xf32>
    %c71_298 = arith.constant 71 : index
    %c0_299 = arith.constant 0 : index
    %428 = tpu.strided_load %arg15[%c71_298, %c0_299] {strides = array<i32: 2, 1>} : memref<80x64xf32, #tpu.memory_space<vmem>>, vector<4x64xf32>
    %429 = arith.maximumf %427, %428 : vector<4x64xf32>
    %430 = arith.maximumf %426, %429 : vector<4x64xf32>
    %c25 = arith.constant 25 : index
    %c0_300 = arith.constant 0 : index
    %431 = vector.load %arg16[%c25, %c0_300] : memref<44x64xf32, #tpu.memory_space<vmem>>, vector<4x64xf32>
    tpu.vector_store %arg16[%c25, %c0_300], %430 {strides = array<i32>} : memref<44x64xf32, #tpu.memory_space<vmem>>, vector<4x64xf32>,
    %cst_301 = arith.constant 0.000000e+00 : f32
    %432 = vector.broadcast %cst_301 : f32 to vector<24x128xf32>
    %c0_302 = arith.constant 0 : index
    %c0_303 = arith.constant 0 : index
    %433 = vector.load %arg16[%c0_302, %c0_303] : memref<44x64xf32, #tpu.memory_space<vmem>>, vector<24x64xf32>
    %434 = arith.truncf %433 : vector<24x64xf32> to vector<24x64xbf16>
    %c0_304 = arith.constant 0 : index
    %c0_305 = arith.constant 0 : index
    %435 = vector.load %arg6[%c0_304, %c0_305] : memref<576x128xbf16, #tpu.memory_space<vmem>>, vector<64x128xbf16>
    %cst_306 = arith.constant dense<0.000000e+00> : vector<24x128xf32>
    %436 = tpu.matmul %434, %435, %cst_306 {dimension_numbers = #tpu.dot_dimension_numbers<[1], [0], [0], [1], [0, 0, 1, 1], [], []>} : vector<24x64xbf16>, vector<64x128xbf16>, vector<24x128xf32> -> vector<24x128xf32>
    %437 = arith.addf %432, %436 : vector<24x128xf32>
    %c1_307 = arith.constant 1 : index
    %c0_308 = arith.constant 0 : index
    %438 = vector.load %arg16[%c1_307, %c0_308] : memref<44x64xf32, #tpu.memory_space<vmem>>, vector<24x64xf32>
    %439 = arith.truncf %438 : vector<24x64xf32> to vector<24x64xbf16>
    %c64_309 = arith.constant 64 : index
    %c0_310 = arith.constant 0 : index
    %440 = vector.load %arg6[%c64_309, %c0_310] : memref<576x128xbf16, #tpu.memory_space<vmem>>, vector<64x128xbf16>
    %cst_311 = arith.constant dense<0.000000e+00> : vector<24x128xf32>
    %441 = tpu.matmul %439, %440, %cst_311 {dimension_numbers = #tpu.dot_dimension_numbers<[1], [0], [0], [1], [0, 0, 1, 1], [], []>} : vector<24x64xbf16>, vector<64x128xbf16>, vector<24x128xf32> -> vector<24x128xf32>
    %442 = arith.addf %437, %441 : vector<24x128xf32>
    %c2_312 = arith.constant 2 : index
    %c0_313 = arith.constant 0 : index
    %443 = vector.load %arg16[%c2_312, %c0_313] : memref<44x64xf32, #tpu.memory_space<vmem>>, vector<24x64xf32>
    %444 = arith.truncf %443 : vector<24x64xf32> to vector<24x64xbf16>
    %c128_314 = arith.constant 128 : index
    %c0_315 = arith.constant 0 : index
    %445 = vector.load %arg6[%c128_314, %c0_315] : memref<576x128xbf16, #tpu.memory_space<vmem>>, vector<64x128xbf16>
    %cst_316 = arith.constant dense<0.000000e+00> : vector<24x128xf32>
    %446 = tpu.matmul %444, %445, %cst_316 {dimension_numbers = #tpu.dot_dimension_numbers<[1], [0], [0], [1], [0, 0, 1, 1], [], []>} : vector<24x64xbf16>, vector<64x128xbf16>, vector<24x128xf32> -> vector<24x128xf32>
    %447 = arith.addf %442, %446 : vector<24x128xf32>
    %c6_317 = arith.constant 6 : index
    %c0_318 = arith.constant 0 : index
    %448 = vector.load %arg16[%c6_317, %c0_318] : memref<44x64xf32, #tpu.memory_space<vmem>>, vector<24x64xf32>
    %449 = arith.truncf %448 : vector<24x64xf32> to vector<24x64xbf16>
    %c192_319 = arith.constant 192 : index
    %c0_320 = arith.constant 0 : index
    %450 = vector.load %arg6[%c192_319, %c0_320] : memref<576x128xbf16, #tpu.memory_space<vmem>>, vector<64x128xbf16>
    %cst_321 = arith.constant dense<0.000000e+00> : vector<24x128xf32>
    %451 = tpu.matmul %449, %450, %cst_321 {dimension_numbers = #tpu.dot_dimension_numbers<[1], [0], [0], [1], [0, 0, 1, 1], [], []>} : vector<24x64xbf16>, vector<64x128xbf16>, vector<24x128xf32> -> vector<24x128xf32>
    %452 = arith.addf %447, %451 : vector<24x128xf32>
    %c7_322 = arith.constant 7 : index
    %c0_323 = arith.constant 0 : index
    %453 = vector.load %arg16[%c7_322, %c0_323] : memref<44x64xf32, #tpu.memory_space<vmem>>, vector<24x64xf32>
    %454 = arith.truncf %453 : vector<24x64xf32> to vector<24x64xbf16>
    %c256_324 = arith.constant 256 : index
    %c0_325 = arith.constant 0 : index
    %455 = vector.load %arg6[%c256_324, %c0_325] : memref<576x128xbf16, #tpu.memory_space<vmem>>, vector<64x128xbf16>
    %cst_326 = arith.constant dense<0.000000e+00> : vector<24x128xf32>
    %456 = tpu.matmul %454, %455, %cst_326 {dimension_numbers = #tpu.dot_dimension_numbers<[1], [0], [0], [1], [0, 0, 1, 1], [], []>} : vector<24x64xbf16>, vector<64x128xbf16>, vector<24x128xf32> -> vector<24x128xf32>
    %457 = arith.addf %452, %456 : vector<24x128xf32>
    %c8_327 = arith.constant 8 : index
    %c0_328 = arith.constant 0 : index
    %458 = vector.load %arg16[%c8_327, %c0_328] : memref<44x64xf32, #tpu.memory_space<vmem>>, vector<24x64xf32>
    %459 = arith.truncf %458 : vector<24x64xf32> to vector<24x64xbf16>
    %c320 = arith.constant 320 : index
    %c0_329 = arith.constant 0 : index
    %460 = vector.load %arg6[%c320, %c0_329] : memref<576x128xbf16, #tpu.memory_space<vmem>>, vector<64x128xbf16>
    %cst_330 = arith.constant dense<0.000000e+00> : vector<24x128xf32>
    %461 = tpu.matmul %459, %460, %cst_330 {dimension_numbers = #tpu.dot_dimension_numbers<[1], [0], [0], [1], [0, 0, 1, 1], [], []>} : vector<24x64xbf16>, vector<64x128xbf16>, vector<24x128xf32> -> vector<24x128xf32>
    %462 = arith.addf %457, %461 : vector<24x128xf32>
    %c12_331 = arith.constant 12 : index
    %c0_332 = arith.constant 0 : index
    %463 = vector.load %arg16[%c12_331, %c0_332] : memref<44x64xf32, #tpu.memory_space<vmem>>, vector<24x64xf32>
    %464 = arith.truncf %463 : vector<24x64xf32> to vector<24x64xbf16>
    %c384 = arith.constant 384 : index
    %c0_333 = arith.constant 0 : index
    %465 = vector.load %arg6[%c384, %c0_333] : memref<576x128xbf16, #tpu.memory_space<vmem>>, vector<64x128xbf16>
    %cst_334 = arith.constant dense<0.000000e+00> : vector<24x128xf32>
    %466 = tpu.matmul %464, %465, %cst_334 {dimension_numbers = #tpu.dot_dimension_numbers<[1], [0], [0], [1], [0, 0, 1, 1], [], []>} : vector<24x64xbf16>, vector<64x128xbf16>, vector<24x128xf32> -> vector<24x128xf32>
    %467 = arith.addf %462, %466 : vector<24x128xf32>
    %c13_335 = arith.constant 13 : index
    %c0_336 = arith.constant 0 : index
    %468 = vector.load %arg16[%c13_335, %c0_336] : memref<44x64xf32, #tpu.memory_space<vmem>>, vector<24x64xf32>
    %469 = arith.truncf %468 : vector<24x64xf32> to vector<24x64xbf16>
    %c448 = arith.constant 448 : index
    %c0_337 = arith.constant 0 : index
    %470 = vector.load %arg6[%c448, %c0_337] : memref<576x128xbf16, #tpu.memory_space<vmem>>, vector<64x128xbf16>
    %cst_338 = arith.constant dense<0.000000e+00> : vector<24x128xf32>
    %471 = tpu.matmul %469, %470, %cst_338 {dimension_numbers = #tpu.dot_dimension_numbers<[1], [0], [0], [1], [0, 0, 1, 1], [], []>} : vector<24x64xbf16>, vector<64x128xbf16>, vector<24x128xf32> -> vector<24x128xf32>
    %472 = arith.addf %467, %471 : vector<24x128xf32>
    %c14 = arith.constant 14 : index
    %c0_339 = arith.constant 0 : index
    %473 = vector.load %arg16[%c14, %c0_339] : memref<44x64xf32, #tpu.memory_space<vmem>>, vector<24x64xf32>
    %474 = arith.truncf %473 : vector<24x64xf32> to vector<24x64xbf16>
    %c512 = arith.constant 512 : index
    %c0_340 = arith.constant 0 : index
    %475 = vector.load %arg6[%c512, %c0_340] : memref<576x128xbf16, #tpu.memory_space<vmem>>, vector<64x128xbf16>
    %cst_341 = arith.constant dense<0.000000e+00> : vector<24x128xf32>
    %476 = tpu.matmul %474, %475, %cst_341 {dimension_numbers = #tpu.dot_dimension_numbers<[1], [0], [0], [1], [0, 0, 1, 1], [], []>} : vector<24x64xbf16>, vector<64x128xbf16>, vector<24x128xf32> -> vector<24x128xf32>
    %477 = arith.addf %472, %476 : vector<24x128xf32>
    %c0_342 = arith.constant 0 : index
    %c0_343 = arith.constant 0 : index
    %478 = vector.load %arg7[%c0_342, %c0_343] : memref<1x128xf32, #tpu.memory_space<vmem>>, vector<1x128xf32>
    %479 = vector.broadcast %478 : vector<1x128xf32> to vector<24x128xf32>
    %480 = arith.addf %477, %479 : vector<24x128xf32>
    %cst_344 = arith.constant 0.000000e+00 : f32
    %481 = vector.broadcast %cst_344 : f32 to vector<24x128xf32>
    %482 = arith.maximumf %480, %481 : vector<24x128xf32>
    %cst_345 = arith.constant 0.000000e+00 : f32
    %483 = vector.broadcast %cst_345 : f32 to vector<1x128xf32>
    %484 = vector.extract_strided_slice %482 {offsets = [0, 0], sizes = [4, 128], strides = [1, 1]} : vector<24x128xf32> to vector<4x128xf32>
    %cst_346 = arith.constant dense<0.000000e+00> : vector<128xf32>
    %485 = vector.multi_reduction <add>, %484, %cst_346 [0] : vector<4x128xf32> to vector<128xf32>
    %486 = vector.shape_cast %485 : vector<128xf32> to vector<1x128xf32>
    %487 = arith.addf %483, %486 : vector<1x128xf32>
    %488 = vector.extract_strided_slice %482 {offsets = [6, 0], sizes = [4, 128], strides = [1, 1]} : vector<24x128xf32> to vector<4x128xf32>
    %cst_347 = arith.constant dense<0.000000e+00> : vector<128xf32>
    %489 = vector.multi_reduction <add>, %488, %cst_347 [0] : vector<4x128xf32> to vector<128xf32>
    %490 = vector.shape_cast %489 : vector<128xf32> to vector<1x128xf32>
    %491 = arith.addf %487, %490 : vector<1x128xf32>
    %492 = vector.extract_strided_slice %482 {offsets = [12, 0], sizes = [4, 128], strides = [1, 1]} : vector<24x128xf32> to vector<4x128xf32>
    %cst_348 = arith.constant dense<0.000000e+00> : vector<128xf32>
    %493 = vector.multi_reduction <add>, %492, %cst_348 [0] : vector<4x128xf32> to vector<128xf32>
    %494 = vector.shape_cast %493 : vector<128xf32> to vector<1x128xf32>
    %495 = arith.addf %491, %494 : vector<1x128xf32>
    %496 = vector.extract_strided_slice %482 {offsets = [18, 0], sizes = [4, 128], strides = [1, 1]} : vector<24x128xf32> to vector<4x128xf32>
    %cst_349 = arith.constant dense<0.000000e+00> : vector<128xf32>
    %497 = vector.multi_reduction <add>, %496, %cst_349 [0] : vector<4x128xf32> to vector<128xf32>
    %498 = vector.shape_cast %497 : vector<128xf32> to vector<1x128xf32>
    %499 = arith.addf %495, %498 : vector<1x128xf32>
    %cst_350 = arith.constant 6.250000e-02 : f32
    %500 = vector.broadcast %cst_350 : f32 to vector<1x128xf32>
    %501 = arith.mulf %499, %500 : vector<1x128xf32>
    %502 = arith.truncf %501 : vector<1x128xf32> to vector<1x128xbf16>
    %c0_351 = arith.constant 0 : index
    %c0_352 = arith.constant 0 : index
    %503 = vector.load %arg8[%c0_351, %c0_352] : memref<128x64xbf16, #tpu.memory_space<vmem>>, vector<128x64xbf16>
    %cst_353 = arith.constant dense<0.000000e+00> : vector<1x64xf32>
    %504 = tpu.matmul %502, %503, %cst_353 {dimension_numbers = #tpu.dot_dimension_numbers<[1], [0], [0], [1], [0, 0, 1, 1], [], []>} : vector<1x128xbf16>, vector<128x64xbf16>, vector<1x64xf32> -> vector<1x64xf32>
    %c0_354 = arith.constant 0 : index
    %c0_355 = arith.constant 0 : index
    %505 = vector.load %arg9[%c0_354, %c0_355] : memref<1x64xf32, #tpu.memory_space<vmem>>, vector<1x64xf32>
    %506 = arith.addf %504, %505 : vector<1x64xf32>
    %cst_356 = arith.constant 0.000000e+00 : f32
    %507 = vector.broadcast %cst_356 : f32 to vector<1x64xf32>
    %508 = arith.maximumf %506, %507 : vector<1x64xf32>
    %509 = arith.truncf %508 : vector<1x64xf32> to vector<1x64xbf16>
    %c0_357 = arith.constant 0 : index
    %c0_358 = arith.constant 0 : index
    %510 = vector.load %arg10[%c0_357, %c0_358] : memref<64x10xbf16, #tpu.memory_space<vmem>>, vector<64x10xbf16>
    %cst_359 = arith.constant dense<0.000000e+00> : vector<1x10xf32>
    %511 = tpu.matmul %509, %510, %cst_359 {dimension_numbers = #tpu.dot_dimension_numbers<[1], [0], [0], [1], [0, 0, 1, 1], [], []>} : vector<1x64xbf16>, vector<64x10xbf16>, vector<1x10xf32> -> vector<1x10xf32>
    %c0_360 = arith.constant 0 : index
    %c0_361 = arith.constant 0 : index
    %512 = vector.load %arg11[%c0_360, %c0_361] : memref<1x10xf32, #tpu.memory_space<vmem>>, vector<1x10xf32>
    %513 = arith.addf %511, %512 : vector<1x10xf32>
    %c0_362 = arith.constant 0 : index
    %c0_363 = arith.constant 0 : index
    %c0_364 = arith.constant 0 : index
    %514 = vector.load %arg12[%c0_362, %c0_363, %c0_364] : memref<1x1x10xf32, #tpu.memory_space<vmem>>, vector<1x1x10xf32>
    %515 = vector.shape_cast %514 : vector<1x1x10xf32> to vector<1x10xf32>
    %516 = vector.shape_cast %513 : vector<1x10xf32> to vector<1x1x10xf32>
    tpu.vector_store %arg12[%c0_362, %c0_363, %c0_364], %516 {strides = array<i32>} : memref<1x1x10xf32, #tpu.memory_space<vmem>>, vector<1x1x10xf32>,
    return
  }
  func.func @transform_0(%arg0: i32) -> (i32, i32, i32) {
    %c0_i32 = arith.constant 0 : i32
    %c0_i32_0 = arith.constant 0 : i32
    %c0_i32_1 = arith.constant 0 : i32
    return %arg0, %c0_i32, %c0_i32_0 : i32, i32, i32
  }
  func.func @transform_1(%arg0: i32) -> (i32, i32) {
    %c0_i32 = arith.constant 0 : i32
    %c0_i32_0 = arith.constant 0 : i32
    %c0_i32_1 = arith.constant 0 : i32
    return %c0_i32, %c0_i32_0 : i32, i32
  }
  func.func @transform_2(%arg0: i32) -> (i32, i32) {
    %c0_i32 = arith.constant 0 : i32
    %c0_i32_0 = arith.constant 0 : i32
    %c0_i32_1 = arith.constant 0 : i32
    return %c0_i32, %c0_i32_0 : i32, i32
  }
  func.func @transform_3(%arg0: i32) -> (i32, i32) {
    %c0_i32 = arith.constant 0 : i32
    %c0_i32_0 = arith.constant 0 : i32
    %c0_i32_1 = arith.constant 0 : i32
    return %c0_i32, %c0_i32_0 : i32, i32
  }
  func.func @transform_4(%arg0: i32) -> (i32, i32) {
    %c0_i32 = arith.constant 0 : i32
    %c0_i32_0 = arith.constant 0 : i32
    %c0_i32_1 = arith.constant 0 : i32
    return %c0_i32, %c0_i32_0 : i32, i32
  }
  func.func @transform_5(%arg0: i32) -> (i32, i32) {
    %c0_i32 = arith.constant 0 : i32
    %c0_i32_0 = arith.constant 0 : i32
    %c0_i32_1 = arith.constant 0 : i32
    return %c0_i32, %c0_i32_0 : i32, i32
  }
  func.func @transform_6(%arg0: i32) -> (i32, i32) {
    %c0_i32 = arith.constant 0 : i32
    %c0_i32_0 = arith.constant 0 : i32
    %c0_i32_1 = arith.constant 0 : i32
    return %c0_i32, %c0_i32_0 : i32, i32
  }
  func.func @transform_7(%arg0: i32) -> (i32, i32) {
    %c0_i32 = arith.constant 0 : i32
    %c0_i32_0 = arith.constant 0 : i32
    %c0_i32_1 = arith.constant 0 : i32
    return %c0_i32, %c0_i32_0 : i32, i32
  }
  func.func @transform_8(%arg0: i32) -> (i32, i32) {
    %c0_i32 = arith.constant 0 : i32
    %c0_i32_0 = arith.constant 0 : i32
    %c0_i32_1 = arith.constant 0 : i32
    return %c0_i32, %c0_i32_0 : i32, i32
  }
  func.func @transform_9(%arg0: i32) -> (i32, i32) {
    %c0_i32 = arith.constant 0 : i32
    %c0_i32_0 = arith.constant 0 : i32
    %c0_i32_1 = arith.constant 0 : i32
    return %c0_i32, %c0_i32_0 : i32, i32
  }
  func.func @transform_10(%arg0: i32) -> (i32, i32) {
    %c0_i32 = arith.constant 0 : i32
    %c0_i32_0 = arith.constant 0 : i32
    %c0_i32_1 = arith.constant 0 : i32
    return %c0_i32, %c0_i32_0 : i32, i32
  }
  func.func @transform_11(%arg0: i32) -> (i32, i32, i32) {
    %c0_i32 = arith.constant 0 : i32
    %c0_i32_0 = arith.constant 0 : i32
    %c0_i32_1 = arith.constant 0 : i32
    return %arg0, %c0_i32, %c0_i32_0 : i32, i32, i32
  }
}

</mosaic_0001>

<bundles_post_ra>
// kernel: cnn_forward.1
= control target key start
LH: loop header
LB: loop body
LE: loop exit
PB: predicated region body
PF: predicated region fallthrough
CT: control target
= control target key end

     0   :  { %16 = vsyncpa [#allocation7], 0  ;;  %s9436_s0 = inlined_call_operand.vmem [shape: f32[2,332,1], index: 0, kind: input, shape index: {}]   ;;  %s9437_s1 = inlined_call_operand.vmem [shape: f32[9,32], index: 1, kind: input, shape index: {}]   ;;  %s9438_s2 = inlined_call_operand.vmem [shape: f32[1,32], index: 2, kind: input, shape index: {}]   ;;  %s9439_s3 = inlined_call_operand.vmem [shape: bf16[288,64], index: 3, kind: input, shape index: {}]   ;;  %s9440_s4 = inlined_call_operand.vmem [shape: f32[1,64], index: 4, kind: input, shape index: {}]   ;;  %s9441_s5 = inlined_call_operand.vmem [shape: bf16[576,128], index: 5, kind: input, shape index: {}]   ;;  %s9442_s6 = inlined_call_operand.vmem [shape: f32[1,128], index: 6, kind: input, shape index: {}]   ;;  %s9443_s7 = inlined_call_operand.vmem [shape: bf16[128,64], index: 7, kind: input, shape index: {}]   ;;  %s9444_s8 = inlined_call_operand.vmem [shape: f32[1,64], index: 8, kind: input, shape index: {}]   ;;  %s9445_s9 = inlined_call_operand.vmem [shape: bf16[64,10], index: 9, kind: input, shape index: {}]   ;;  %s9446_s10 = inlined_call_operand.vmem [shape: f32[1,10], index: 10, kind: input, shape index: {}]   ;;  %s9447_s11 = inlined_call_operand.hbm [shape: f32[2,1,10], index: 11, kind: output, shape index: {}]  }
   0x1   :  { %18 = vsyncpa [#allocation7 + $0x1], 0  ;;  %s6952_s17 = smov 0   ;;  %s6954_s18 = smov 0  }
   0x2   :  { %s6956_s19 = smov 0   ;;  %s6958_s20 = smov 0  }
   0x3 LB: > { %s6973_s21 = sadd.s32 4294967295, %s6886_s20   ;;  %s6016_s22 = sadd.s32 4294967294, %s6886_s20   ;;  %s6886_s20 = sphi %s6958_s20, %s9705_s20   ;;  %s6882_s19 = sphi %s6956_s19, %s9704_s19   ;;  %s6878_s18 = sphi %s6954_s18, %s9703_s18   ;;  %s6874_s17 = sphi %s6952_s17, %s9702_s17  }
   0x4   : > { %s6977_s23 = sadd.s32 1, %s6886_s20   ;;  %s267_s24 = sadd.s32 1, %s6882_s19 }
   0x5   : > { %s264_s25 = ssub.s32 %s6886_s20, %s6977_s23  ;;  %p277_p0 = scmp.ne.s32.totalorder %s6882_s19, %s6878_s18 }
   0x6   : > { %p265_p1 = scmp.eq.s32.totalorder %s264_s25, 0  ;;  %p278_p2 = scmp.eq.s32.totalorder %s6973_s21, 1 }
   0x7   : > { %p283_p3 = scmp.ne.s32.totalorder %s6878_s18, %s6874_s17  ;;  %p284_p4 = scmp.eq.s32.totalorder %s6016_s22, 1 }
   0x8   : > { %s6988_s26 = scalar_select %p265_p1, %s6882_s19, %s267_s24  }
   0x9   : > { %p6990_p5 = por %p278_p2, %p277_p0  ;;  %p6994_p6 = por %p284_p4, %p283_p3 }
   0xa   : > { %p6019_p7 = scmp.ge.s32.totalorder %s6886_s20, 1  ;;  %p340_p8 = scmp.lt.s32.totalorder %s6886_s20, 3 }
   0xc   : > { %p341_p9 = pnand %p6019_p7, %p340_p8 }
   0xe   : > { %344 = sbr.rel (%p341_p9) target bundleno = 1950 (0x79e), region = 64 }
  0x15   : > { %p379_p10 = scmp.lt.s32.totalorder %s6973_s21, 1  ;;  %v6888_v0 = vmov 0   ;;  %vm385_vm0 = vcmask 261120   ;;  %vm6890_vm1 = vmmov 0   ;;  %vm401_vm2 = vcmask 523264   ;;  %s6193_s13 = sshll.u32 %s6973_s21, 4 }
  0x16   : > { %6727 = vset.pattern.permute.xlu1 %v6888_v0  ;;  %6726 = vset.pattern.permute.xlu0 %v6888_v0  ;;  %vm407_vm3 = vcmask 519168   ;;  %vm5716_vm4 = vcmask 1043456   ;;  %vm5727_vm5 = vcmask 1041408   ;;  %vm5946_vm6 = vcmask 73728  }
  0x17   : > { %s380_s29 = scalar_select %p379_p10, %s6973_s21, 1 }
  0x19   : > { %s6683_s30 = smul.u32 336, %s380_s29  ;;  %s377_s29 = sand.u32 1, %s6878_s18  }
  0x1a   : > { %s378_s15 = scalar_lea.vmem [#allocation6], %s377_s29  ;;  %s5949_s21 = scalar_lea.sflag [#allocation7], %s377_s29 }
  0x1b   : > { %s7005_s14 = scalar_lea.vmem %s9436_s0, %s6683_s30  ;;  %s5961_s16 = sshll.u32 %s378_s15, 4  ;;  %s9396_s16 = int_to_ptr.vmem [resolvable:$true] %s5961_s16 }
  0x1c   : > { %v411_v1 = vld [vmem:[%s7005_s14 + $0x10] sm:$0xff]  ;;  %v409_v2 = vld [vmem:[%s7005_s14] sm:$0xff]  ;;  %v412_v3 = vld [vmem:[%s7005_s14 + $0x18] sm:$0xff]  ;;  %s6824_s25 = scalar_lea.vmem %s9396_s16, 16  ;;  %s6891_s30 = smov [#allocation6]  }
  0x1d   : > { %434 = vperm.xlu1 %6727, %v411_v1   ;;  %424 = vperm.xlu0 %6726, %v409_v2   ;;  %v410_v4 = vld [vmem:[%s7005_s14 + $0x8] sm:$0xff]  ;;  %v413_v6 = vld [vmem:[%s7005_s14 + $0x20] sm:$0xff]  ;;  %v416_v7 = vld [vmem:[%s7005_s14 + $0x38] sm:$0xff]  ;;  %p6825_p11 = scmp.ne.s32.totalorder %s9396_s16, %s6824_s25  ;;  %s6828_s12 = sshll.u32 %s6891_s30, 4  ;;  %s6829_s12 = int_to_ptr.vmem [resolvable:$false] %s6828_s12 }
  0x1e   : > { %v414_v5 = vld [vmem:[%s7005_s14 + $0x28] sm:$0xff]  ;;  %v415_v8 = vld [vmem:[%s7005_s14 + $0x30] sm:$0xff]  ;;  %v417_v10 = vld [vmem:[%s7005_s14 + $0x40] sm:$0xff]  ;;  %s6830_s22 = scalar_lea.vmem %s6829_s12, 32  ;;  %p6831_p0 = scmp.lt.s32.totalorder %s9396_s16, %s6829_s12 }
  0x1f   : > { %v418_v9 = vld [vmem:[%s7005_s14 + $0x48] sm:$0xff]  ;;  %v420_v11 = vld [vmem:[%s7005_s14 + $0x58] sm:$0x3]  ;;  %v419_v12 = vld [vmem:[%s7005_s14 + $0x50] sm:$0xff]  ;;  %p6826_p12 = pnand %p6825_p11, %p6990_p5  ;;  %p6832_p1 = scmp.lt.s32.totalorder %s6830_s22, %s6824_s25 }
  0x20   : > { %v511_v13 = vld [vmem:[%s7005_s14 + $0x9] sm:$0xff]  ;;  %v510_v14 = vld [vmem:[%s7005_s14 + $0x1] sm:$0xff]  ;;  %v513_v15 = vld [vmem:[%s7005_s14 + $0x19] sm:$0xff] }
  0x21   : > { %439 = vperm.xlu1 %6727, %v412_v3   ;;  %429 = vperm.xlu0 %6726, %v410_v4   ;;  %v512_v16 = vld [vmem:[%s7005_s14 + $0x11] sm:$0xff]  ;;  %v515_v17 = vld [vmem:[%s7005_s14 + $0x29] sm:$0xff]  ;;  %v514_v18 = vld [vmem:[%s7005_s14 + $0x21] sm:$0xff]  ;;  %p6827_p13 = pneg %p6826_p12  ;;  %p6833_p2 = por %p6832_p1, %p6831_p0 }
  0x22   : > { %v517_v19 = vld [vmem:[%s7005_s14 + $0x39] sm:$0xff]  ;;  %v516_v20 = vld [vmem:[%s7005_s14 + $0x31] sm:$0xff]  ;;  %v519_v21 = vld [vmem:[%s7005_s14 + $0x49] sm:$0xff] }
  0x23   : > { %v518_v22 = vld [vmem:[%s7005_s14 + $0x41] sm:$0xff]  ;;  %v521_v23 = vld [vmem:[%s7005_s14 + $0x59] sm:$0x3]  ;;  %v520_v24 = vld [vmem:[%s7005_s14 + $0x51] sm:$0xff]  ;;  %p6834_p3 = pnand %p6833_p2, %p6827_p13 }
  0x24   : > { %v612_v25 = vld [vmem:[%s7005_s14 + $0xa] sm:$0xff]  ;;  %v611_v26 = vld [vmem:[%s7005_s14 + $0x2] sm:$0xff]  ;;  %v614_v27 = vld [vmem:[%s7005_s14 + $0x1a] sm:$0xff] }
  0x25   : > { %449 = vperm.xlu1 %6727, %v414_v5   ;;  %444 = vperm.xlu0 %6726, %v413_v6   ;;  %v613_v28 = vld [vmem:[%s7005_s14 + $0x12] sm:$0xff]  ;;  %v615_v29 = vld [vmem:[%s7005_s14 + $0x22] sm:$0xff]  ;;  %v715_v31 = vld [vmem:[%s7005_s14 + $0x2a] sm:$0xff] }
  0x26   : > { %v716_v30 = vld [vmem:[%s7005_s14 + $0x32] sm:$0xff]  ;;  %v814_v32 = vld [vmem:[%s7005_s14 + $0x1b] sm:$0xff]  ;;  %v815_v35 = vld [vmem:[%s7005_s14 + $0x23] sm:$0xff] }
  0x27   : > { %v813_v33 = vld [vmem:[%s7005_s14 + $0x13] sm:$0xff]  ;;  %v816_v34 = vld [vmem:[%s7005_s14 + $0x2b] sm:$0xff]  ;;  %v915_v39 = vld [vmem:[%s7005_s14 + $0x1c] sm:$0xff] }
  0x28   : > { %v914_v36 = vld [vmem:[%s7005_s14 + $0x14] sm:$0xff]  ;;  %v916_v38 = vld [vmem:[%s7005_s14 + $0x24] sm:$0xff]  ;;  %v917_v41 = vld [vmem:[%s7005_s14 + $0x2c] sm:$0xff] }
  0x29   : > { %459 = vperm.xlu1 %6727, %v416_v7   ;;  %454 = vperm.xlu0 %6726, %v415_v8   ;;  %v817_v37 = vld [vmem:[%s7005_s14 + $0x33] sm:$0xff]  ;;  %v1363_v42 = vld [vmem:[%s7005_s14 + $0x62] sm:$0xff]  ;;  %v620_v49 = vld [vmem:[%s7005_s14 + $0x4a] sm:$0xff] }
  0x2a   : > { %v918_v40 = vld [vmem:[%s7005_s14 + $0x34] sm:$0xff]  ;;  %v7051_v44 = vld [vmem:[%s7005_s14 + $0x63] sm:$0xff]  ;;  %v7103_v4 = vld [vmem:[%s7005_s14 + $0x6c] sm:$0xff] }
  0x2b   : > { %v1362_v43 = vld [vmem:[%s7005_s14 + $0x5a] sm:$0xff]  ;;  %v619_v46 = vld [vmem:[%s7005_s14 + $0x42] sm:$0xff]  ;;  %v621_v48 = vld [vmem:[%s7005_s14 + $0x52] sm:$0xff] }
  0x2c   : > { %v7054_v45 = vld [vmem:[%s7005_s14 + $0x5b] sm:$0xff]  ;;  %v7070_v52 = vld [vmem:[%s7005_s14 + $0x44] sm:$0xff]  ;;  %v1117_v60 = vld [vmem:[%s7005_s14 + $0x2d] sm:$0xff] }
  0x2d   : > { %469 = vperm.xlu1 %6727, %v418_v9   ;;  %464 = vperm.xlu0 %6726, %v417_v10   ;;  %v618_v47 = vld [vmem:[%s7005_s14 + $0x3a] sm:$0xff]  ;;  %v7075_v53 = vld [vmem:[%s7005_s14 + $0x64] sm:$0xff] }
  0x2e   : > { %v7063_v50 = vld [vmem:[%s7005_s14 + $0x3c] sm:$0xff]  ;;  %v1116_v56 = vld [vmem:[%s7005_s14 + $0x25] sm:$0xff]  ;;  %v7100_v3 = vld [vmem:[%s7005_s14 + $0x74] sm:$0xff] }
  0x2f   : > { %v7067_v51 = vld [vmem:[%s7005_s14 + $0x5c] sm:$0xff]  ;;  %v1120_v63 = vld [vmem:[%s7005_s14 + $0x45] sm:$0xff] }
  0x30   : > { %v1118_v59 = vld [vmem:[%s7005_s14 + $0x35] sm:$0xff]  ;;  %v1119_v0 = vld [vmem:[%s7005_s14 + $0x3d] sm:$0xff] }
  0x31   : > { %479 = vperm.xlu1 %6727, %v420_v11   ;;  %474 = vperm.xlu0 %6726, %v419_v12   ;;  %v819_v7 = vld [vmem:[%s7005_s14 + $0x43] sm:$0xff]  ;;  %v818_v8 = vld [vmem:[%s7005_s14 + $0x3b] sm:$0xff]  ;;  %v821_v11 = vld [vmem:[%s7005_s14 + $0x53] sm:$0xff] }
  0x32   : > { %v820_v12 = vld [vmem:[%s7005_s14 + $0x4b] sm:$0xff] }
  0x35   : > { %530 = vperm.xlu1 %6727, %v511_v13   ;;  %525 = vperm.xlu0 %6726, %v510_v14  }
  0x39   : > { %540 = vperm.xlu1 %6727, %v513_v15   ;;  %535 = vperm.xlu0 %6726, %v512_v16  }
  0x3d   : > { %550 = vperm.xlu1 %6727, %v515_v17   ;;  %545 = vperm.xlu0 %6726, %v514_v18   ;;  %v1218_v17 = vld [vmem:[%s7005_s14 + $0x2e] sm:$0xff]  ;;  %v1217_v18 = vld [vmem:[%s7005_s14 + $0x26] sm:$0xff] }
  0x41   : > { %560 = vperm.xlu1 %6727, %v517_v19   ;;  %555 = vperm.xlu0 %6726, %v516_v20  }
  0x45   : > { %570 = vperm.xlu1 %6727, %v519_v21   ;;  %565 = vperm.xlu0 %6726, %v518_v22   ;;  %v1220_v21 = vld [vmem:[%s7005_s14 + $0x3e] sm:$0xff]  ;;  %v1219_v22 = vld [vmem:[%s7005_s14 + $0x36] sm:$0xff] }
  0x49   : > { %580 = vperm.xlu1 %6727, %v521_v23   ;;  %575 = vperm.xlu0 %6726, %v520_v24  }
  0x4d   : > { %631 = vperm.xlu1 %6727, %v612_v25   ;;  %626 = vperm.xlu0 %6726, %v611_v26   ;;  %v7140_v25 = vld [vmem:[%s7005_s14 + $0x6d] sm:$0xff] }
  0x4e   : > { %v1221_v26 = vld [vmem:[%s7005_s14 + $0x46] sm:$0xff] }
  0x51   : > { %641 = vperm.xlu1 %6727, %v614_v27   ;;  %636 = vperm.xlu0 %6726, %v613_v28  }
  0x55   : > { %727 = vperm.xlu1 %6727, %v613_v28   ;;  %646 = vperm.xlu0 %6726, %v615_v29  }
  0x59   : > { %737 = vperm.xlu1 %6727, %v615_v29   ;;  %732 = vperm.xlu0 %6726, %v614_v27   ;;  %v7149_v29 = vld [vmem:[%s7005_s14 + $0x75] sm:$0xff] }
  0x5d   : > { %747 = vperm.xlu1 %6727, %v716_v30   ;;  %742 = vperm.xlu0 %6726, %v715_v31  }
  0x61   : > { %833 = vperm.xlu1 %6727, %v814_v32   ;;  %828 = vperm.xlu0 %6726, %v813_v33   ;;  %v7156_v32 = vld [vmem:[%s7005_s14 + $0x4c] sm:$0xff] }
  0x65   : > { %843 = vperm.xlu1 %6727, %v816_v34   ;;  %838 = vperm.xlu0 %6726, %v815_v35   ;;  %v7165_v35 = vld [vmem:[%s7005_s14 + $0x54] sm:$0xff] }
  0x69   : > { %929 = vperm.xlu1 %6727, %v914_v36   ;;  %848 = vperm.xlu0 %6726, %v817_v37  }
  0x6d   : > { %939 = vperm.xlu1 %6727, %v916_v38   ;;  %934 = vperm.xlu0 %6726, %v915_v39  }
  0x71   : > { %949 = vperm.xlu1 %6727, %v918_v40   ;;  %944 = vperm.xlu0 %6726, %v917_v41  }
  0x75   : > { %1382 = vperm.xlu1 %6727, %v1363_v42   ;;  %1377 = vperm.xlu0 %6726, %v1362_v43  }
  0x79   : > { %1483 = vperm.xlu1 %6727, %v7051_v44   ;;  %1478 = vperm.xlu0 %6726, %v7054_v45  }
  0x7d   : > { %656 = vperm.xlu1 %6727, %v716_v30   ;;  %651 = vperm.xlu0 %6726, %v715_v31  }
  0x81   : > { %666 = vperm.xlu1 %6727, %v619_v46   ;;  %661 = vperm.xlu0 %6726, %v618_v47  }
  0x85   : > { %676 = vperm.xlu1 %6727, %v621_v48   ;;  %671 = vperm.xlu0 %6726, %v620_v49  }
  0x89   : > { %1035 = vperm.xlu1 %6727, %v917_v41   ;;  %1030 = vperm.xlu0 %6726, %v916_v38   ;;  %v1364_v38 = vld [vmem:[%s7005_s14 + $0x6a] sm:$0xff]  ;;  %v1366_v41 = vld [vmem:[%s7005_s14 + $0x7a] sm:$0xff] }
  0x8d   : > { %1045 = vperm.xlu1 %6727, %v7063_v50   ;;  %1040 = vperm.xlu0 %6726, %v918_v40  }
  0x91   : > { %1579 = vperm.xlu1 %6727, %v7067_v51   ;;  %1050 = vperm.xlu0 %6726, %v7070_v52  }
  0x95   : > { %752 = vperm.xlu1 %6727, %v618_v47   ;;  %1584 = vperm.xlu0 %6726, %v7075_v53   ;;  %v1367_v47 = vld [vmem:[%s7005_s14 + $0x82] sm:$0xff] }
  0x99   : > { %762 = vperm.xlu1 %6727, %v620_v49   ;;  %757 = vperm.xlu0 %6726, %v619_v46   ;;  %v9448_v46 = vmov 0.0   ;;  %v6729_v49 = vld [vmem:[%s9439_s3] sm:$0xff]  }
  0x9a   : > { %386 = vst.msk [vmem:[#allocation3] sm:$0xff] %vm385_vm0, %v9448_v46  ;;  %387 = vst.msk [vmem:[#allocation3 + $0x8] sm:$0xff] %vm385_vm0, %v9448_v46  ;;  %6327 = vmatprep.subr.bf16.mxu0 %v9448_v46  ;;  %6351 = vmatprep.subr.bf16.mxu1 %v9448_v46 }
  0x9b   : > { %388 = vst.msk [vmem:[#allocation3 + $0x10] sm:$0xff] %vm385_vm0, %v9448_v46  ;;  %389 = vst.msk [vmem:[#allocation3 + $0x18] sm:$0xff] %vm385_vm0, %v9448_v46  ;;  %6352 = vmatpush3.bf16.msra.mxu1 %v6729_v49  ;;  %6331 = vmatprep.mubr.msk.bf16.mxu0 %vm6890_vm1, %v9448_v46 }
  0x9c   : > { %v7078_v54 = vpop.permute.xlu1 %434  ;;  %v7080_v55 = vpop.permute.xlu0 %424  ;;  %390 = vst.msk [vmem:[#allocation3 + $0x20] sm:$0xff] %vm385_vm0, %v9448_v46  ;;  %391 = vst.msk [vmem:[#allocation3 + $0x28] sm:$0xff] %vm385_vm0, %v9448_v46  ;;  %6353 = vmatprep.subr.bf16.mxu1 %v9448_v46  ;;  %6355 = vmatprep.mubr.msk.bf16.mxu1 %vm6890_vm1, %v9448_v46 }
  0x9d   : > { %772 = vperm.xlu1 %6727, %v1362_v43   ;;  %767 = vperm.xlu0 %6726, %v621_v48   ;;  %392 = vst.msk [vmem:[#allocation3 + $0x30] sm:$0xff] %vm385_vm0, %v9448_v46  ;;  %393 = vst.msk [vmem:[#allocation3 + $0x38] sm:$0xff] %vm385_vm0, %v9448_v46  ;;  %v6728_v48 = vld [vmem:[%s9439_s3 + $0x10] sm:$0xff]  }
  0x9e   : > { %394 = vst.msk [vmem:[#allocation3 + $0x40] sm:$0xff] %vm385_vm0, %v9448_v46  ;;  %395 = vst.msk [vmem:[#allocation3 + $0x48] sm:$0xff] %vm385_vm0, %v9448_v46  ;;  %6328 = vmatpush3.bf16.msra.mxu0 %v6728_v48 }
  0x9f   : > { %396 = vst.msk [vmem:[#allocation3 + $0x50] sm:$0xff] %vm385_vm0, %v9448_v46  ;;  %397 = vst.msk [vmem:[#allocation3 + $0x58] sm:$0xff] %vm385_vm0, %v9448_v46  ;;  %6329 = vmatprep.subr.bf16.mxu0 %v9448_v46 }
  0xa0   : > { %v7083_v57 = vpop.permute.xlu1 %439  ;;  %v7085_v58 = vpop.permute.xlu0 %429  ;;  %398 = vst.msk [vmem:[#allocation3 + $0x60] sm:$0xff] %vm385_vm0, %v9448_v46 }
  0xa1   : > { %1131 = vperm.xlu1 %6727, %v1116_v56   ;;  %777 = vperm.xlu0 %6726, %v1363_v42   ;;  %v1365_v42 = vld [vmem:[%s7005_s14 + $0x72] sm:$0xff] }
  0xa2   : > { %v1466_v56 = vld [vmem:[%s7005_s14 + $0x73] sm:$0xff] }
  0xa4   : > { %v7089_v61 = vpop.permute.xlu1 %449  ;;  %v7091_v62 = vpop.permute.xlu0 %444 }
  0xa5   : > { %1141 = vperm.xlu1 %6727, %v1118_v59   ;;  %1136 = vperm.xlu0 %6726, %v1117_v60   ;;  %v1465_v59 = vld [vmem:[%s7005_s14 + $0x6b] sm:$0xff]  ;;  %v6730_v60 = vld [vmem:[%s9439_s3 + $0x18] sm:$0xff]  }
  0xa6   : > { %6330 = vmatpush3.bf16.msra.mxu0 %v6730_v60 }
  0xa7   : > { %6375 = vmatprep.subr.bf16.mxu0 %v9448_v46 }
  0xa8   : > { %v7095_v1 = vpop.permute.xlu1 %459  ;;  %v7097_v2 = vpop.permute.xlu0 %454 }
  0xa9   : > { %9463 = vst [vmem:[#allocation9_spill] sm:$0xff] %v7097_v2  ;;  %1151 = vperm.xlu1 %6727, %v1120_v63   ;;  %1146 = vperm.xlu0 %6726, %v1119_v0   ;;  %v6731_v63 = vld [vmem:[%s9439_s3 + $0x8] sm:$0xff]  }
  0xaa   : > { %6354 = vmatpush3.bf16.msra.mxu1 %v6731_v63  ;;  %v7303_v63 = vld [vmem:[%s7005_s14 + $0x7e] sm:$0xff] }
  0xab   : > { %6399 = vmatprep.subr.bf16.mxu1 %v9448_v46 }
  0xac   : > { %v7105_v5 = vpop.permute.xlu1 %469  ;;  %v7107_v6 = vpop.permute.xlu0 %464 }
  0xad   : > { %9464 = vst [vmem:[#allocation10_spill] sm:$0xff] %v7105_v5  ;;  %9465 = vst [vmem:[#allocation11_spill] sm:$0xff] %v7107_v6  ;;  %1685 = vperm.xlu1 %6727, %v7100_v3   ;;  %1680 = vperm.xlu0 %6726, %v7103_v4  }
  0xb0   : > { %v480_v9 = vpop.permute.xlu1 %479  ;;  %v7113_v10 = vpop.permute.xlu0 %474 }
  0xb1   : > { %9466 = vst [vmem:[#allocation12_spill] sm:$0xff] %v7113_v10  ;;  %858 = vperm.xlu1 %6727, %v819_v7   ;;  %853 = vperm.xlu0 %6726, %v818_v8   ;;  %v1468_v8 = vld [vmem:[%s7005_s14 + $0x83] sm:$0xff]  ;;  %v1467_v9 = vld [vmem:[%s7005_s14 + $0x7b] sm:$0xff] }
  0xb4   : > { %v7117_v13 = vpop.permute.xlu1 %530  ;;  %v7119_v14 = vpop.permute.xlu0 %525 }
  0xb5   : > { %868 = vperm.xlu1 %6727, %v821_v11   ;;  %863 = vperm.xlu0 %6726, %v820_v12  }
  0xb8   : > { %v7121_v15 = vpop.permute.xlu1 %540  ;;  %v7123_v16 = vpop.permute.xlu0 %535 }
  0xb9   : > { %878 = vperm.xlu1 %6727, %v7051_v44   ;;  %873 = vperm.xlu0 %6726, %v7054_v45   ;;  %v1368_v45 = vld [vmem:[%s7005_s14 + $0x8a] sm:$0xff] }
  0xbc   : > { %v7129_v19 = vpop.permute.xlu1 %550  ;;  %v7131_v20 = vpop.permute.xlu0 %545 }
  0xbd   : > { %1237 = vperm.xlu1 %6727, %v1218_v17   ;;  %1232 = vperm.xlu0 %6726, %v1217_v18   ;;  %v7252_v17 = vld [vmem:[%s7005_s14 + $0x6e] sm:$0xff] }
  0xbe   : > { %v1469_v18 = vld [vmem:[%s7005_s14 + $0x8b] sm:$0xff] }
  0xc0   : > { %v7135_v23 = vpop.permute.xlu1 %560  ;;  %v7137_v24 = vpop.permute.xlu0 %555 }
  0xc1   : > { %1247 = vperm.xlu1 %6727, %v1220_v21   ;;  %1242 = vperm.xlu0 %6726, %v1219_v22  }
  0xc4   : > { %v7143_v27 = vpop.permute.xlu1 %570  ;;  %v7145_v28 = vpop.permute.xlu0 %565 }
  0xc5   : > { %9467 = vst [vmem:[#allocation13_spill] sm:$0xff] %v7143_v27  ;;  %9468 = vst [vmem:[#allocation14_spill] sm:$0xff] %v7145_v28  ;;  %1781 = vperm.xlu1 %6727, %v7140_v25   ;;  %1252 = vperm.xlu0 %6726, %v1221_v26   ;;  %v7261_v26 = vld [vmem:[%s7005_s14 + $0x76] sm:$0xff] }
  0xc8   : > { %v581_v30 = vpop.permute.xlu1 %580  ;;  %v7151_v31 = vpop.permute.xlu0 %575 }
  0xc9   : > { %9469 = vst [vmem:[#allocation15_spill] sm:$0xff] %v7151_v31  ;;  %954 = vperm.xlu1 %6727, %v7063_v50   ;;  %1786 = vperm.xlu0 %6726, %v7149_v29  }
  0xcc   : > { %v7158_v33 = vpop.permute.xlu1 %631  ;;  %v7160_v34 = vpop.permute.xlu0 %626 }
  0xcd   : > { %964 = vperm.xlu1 %6727, %v7156_v32   ;;  %959 = vperm.xlu0 %6726, %v7070_v52  }
  0xd0   : > { %v7167_v36 = vpop.permute.xlu1 %641  ;;  %v7169_v37 = vpop.permute.xlu0 %636 }
  0xd1   : > { %974 = vperm.xlu1 %6727, %v7067_v51   ;;  %969 = vperm.xlu0 %6726, %v7165_v35  }
  0xd4   : > { %v7174_v39 = vpop.permute.xlu1 %727  ;;  %v7176_v40 = vpop.permute.xlu0 %646 }
  0xd5   : > { %1387 = vperm.xlu1 %6727, %v1364_v38   ;;  %979 = vperm.xlu0 %6726, %v7075_v53  }
  0xd8   : > { %v7181_v43 = vpop.permute.xlu1 %737  ;;  %v7183_v44 = vpop.permute.xlu0 %732 }
  0xd9   : > { %1397 = vperm.xlu1 %6727, %v1366_v41   ;;  %1392 = vperm.xlu0 %6726, %v1365_v42  }
  0xdc   : > { %v7221_v50 = vpop.permute.xlu1 %747  ;;  %v7223_v52 = vpop.permute.xlu0 %742 }
  0xdd   : > { %1407 = vperm.xlu1 %6727, %v1368_v45   ;;  %1402 = vperm.xlu0 %6726, %v1367_v47  }
  0xe0   : > { %v7235_v0 = vpop.permute.xlu1 %833  ;;  %v7237_v7 = vpop.permute.xlu0 %828 }
  0xe1   : > { %1493 = vperm.xlu1 %6727, %v1466_v56   ;;  %1488 = vperm.xlu0 %6726, %v1465_v59   ;;  %v1569_v56 = vld [vmem:[%s7005_s14 + $0x84] sm:$0xff] }
  0xe4   : > { %v7247_v11 = vpop.permute.xlu1 %843  ;;  %v7249_v12 = vpop.permute.xlu0 %838 }
  0xe5   : > { %1503 = vperm.xlu1 %6727, %v1468_v8   ;;  %1498 = vperm.xlu0 %6726, %v1467_v9  }
  0xe8   : > { %v7255_v21 = vpop.permute.xlu1 %929  ;;  %v7257_v22 = vpop.permute.xlu0 %848 }
  0xe9   : > { %1882 = vperm.xlu1 %6727, %v7252_v17   ;;  %1508 = vperm.xlu0 %6726, %v1469_v18   ;;  %v1121_v18 = vld [vmem:[%s7005_s14 + $0x4d] sm:$0xff] }
  0xec   : > { %v7263_v30 = vpop.permute.xlu1 %939  ;;  %v7265_v38 = vpop.permute.xlu0 %934 }
  0xed   : > { %1055 = vperm.xlu1 %6727, %v7156_v32   ;;  %1887 = vperm.xlu0 %6726, %v7261_v26  }
  0xf0   : > { %v7269_v41 = vpop.permute.xlu1 %949  ;;  %v7271_v42 = vpop.permute.xlu0 %944 }
  0xf1   : > { %1065 = vperm.xlu1 %6727, %v7067_v51   ;;  %1060 = vperm.xlu0 %6726, %v7165_v35   ;;  %v1568_v51 = vld [vmem:[%s7005_s14 + $0x7c] sm:$0xff] }
  0xf4   : > { %v7275_v45 = vpop.permute.xlu1 %1382  ;;  %v7277_v47 = vpop.permute.xlu0 %1377 }
  0xf5   : > { %9470 = vst [vmem:[#allocation16_spill] sm:$0xff] %v7275_v45  ;;  %9471 = vst [vmem:[#allocation17_spill] sm:$0xff] %v7277_v47  ;;  %1075 = vperm.xlu1 %6727, %v7103_v4   ;;  %1070 = vperm.xlu0 %6726, %v7075_v53   ;;  %v1570_v53 = vld [vmem:[%s7005_s14 + $0x8c] sm:$0xff] }
  0xf8   : > { %v7281_v32 = vpop.permute.xlu1 %1483  ;;  %v7283_v48 = vpop.permute.xlu0 %1478 }
  0xf9   : > { %9472 = vst [vmem:[#allocation18_spill] sm:$0xff] %v7281_v32  ;;  %9473 = vst [vmem:[#allocation19_spill] sm:$0xff] %v7283_v48  ;;  %1589 = vperm.xlu1 %6727, %v7103_v4   ;;  %1080 = vperm.xlu0 %6726, %v7100_v3   ;;  %v7300_v4 = vld [vmem:[%s7005_s14 + $0x86] sm:$0xff]  ;;  %v1123_v32 = vld [vmem:[%s7005_s14 + $0x5d] sm:$0xff] }
  0xfa   : > { %v1124_v48 = vld [vmem:[%s7005_s14 + $0x65] sm:$0xff] }
  0xfc   : > { %v7288_v35 = vpop.permute.xlu1 %656  ;;  %v7290_v49 = vpop.permute.xlu0 %651 }
  0xfd   : > { %9474 = vst [vmem:[#allocation20_spill] sm:$0xff] %v7288_v35  ;;  %9475 = vst [vmem:[#allocation21_spill] sm:$0xff] %v7290_v49  ;;  %1599 = vperm.xlu1 %6727, %v1568_v51   ;;  %1594 = vperm.xlu0 %6726, %v7100_v3   ;;  %v1122_v3 = vld [vmem:[%s7005_s14 + $0x55] sm:$0xff] }
 0x100   : > { %v7295_v59 = vpop.permute.xlu1 %666  ;;  %v7297_v60 = vpop.permute.xlu0 %661 }
 0x101   : > { %9476 = vst [vmem:[#allocation22_spill] sm:$0xff] %v7295_v59  ;;  %9477 = vst [vmem:[#allocation23_spill] sm:$0xff] %v7297_v60  ;;  %1609 = vperm.xlu1 %6727, %v1570_v53   ;;  %1604 = vperm.xlu0 %6726, %v1569_v56   ;;  %v7334_v59 = vld [vmem:[%s7005_s14 + $0x94] sm:$0xff] }
 0x104   : > { %v7305_v8 = vpop.permute.xlu1 %676  ;;  %v7307_v9 = vpop.permute.xlu0 %671 }
 0x105   : > { %9478 = vst [vmem:[#allocation24_spill] sm:$0xff] %v7305_v8  ;;  %9479 = vst [vmem:[#allocation25_spill] sm:$0xff] %v7307_v9  ;;  %1988 = vperm.xlu1 %6727, %v7300_v4   ;;  %1983 = vperm.xlu0 %6726, %v7303_v63  }
 0x108   : > { %v7313_v46 = vpop.permute.xlu1 %1035  ;;  %v7315_v47 = vpop.permute.xlu0 %1030 }
 0x109   : > { %1161 = vperm.xlu1 %6727, %v1122_v3   ;;  %1156 = vperm.xlu0 %6726, %v1121_v18  }
 0x10c   : > { %v7319_v45 = vpop.permute.xlu1 %1045  ;;  %v7321_v8 = vpop.permute.xlu0 %1040 }
 0x10d   : > { %1171 = vperm.xlu1 %6727, %v1124_v48   ;;  %1166 = vperm.xlu0 %6726, %v1123_v32  }
 0x110   : > { %v7323_v9 = vpop.permute.xlu1 %1579  ;;  %v7325_v60 = vpop.permute.xlu0 %1050 }
 0x111   : > { %9480 = vst [vmem:[#allocation26_spill] sm:$0xff] %v7323_v9  ;;  %1181 = vperm.xlu1 %6727, %v7149_v29   ;;  %1176 = vperm.xlu0 %6726, %v7140_v25   ;;  %v2069_v25 = vld [vmem:[%s7005_s14 + $0x7f] sm:$0xff] }
 0x112   : > { %v7343_v29 = vld [vmem:[%s7005_s14 + $0x9c] sm:$0xff] }
 0x114   : > { %v7329_v3 = vpop.permute.xlu1 %752  ;;  %v7331_v18 = vpop.permute.xlu0 %1584 }
 0x115   : > { %9481 = vst [vmem:[#allocation27_spill] sm:$0xff] %v7329_v3  ;;  %9482 = vst [vmem:[#allocation28_spill] sm:$0xff] %v7331_v18  ;;  %1695 = vperm.xlu1 %6727, %v1569_v56   ;;  %1690 = vperm.xlu0 %6726, %v1568_v51   ;;  %v1222_v51 = vld [vmem:[%s7005_s14 + $0x4e] sm:$0xff]  ;;  %v1223_v3 = vld [vmem:[%s7005_s14 + $0x56] sm:$0xff] }
 0x116   : > { %v2070_v56 = vld [vmem:[%s7005_s14 + $0x87] sm:$0xff] }
 0x118   : > { %v7336_v48 = vpop.permute.xlu1 %762  ;;  %v7338_v32 = vpop.permute.xlu0 %757 }
 0x119   : > { %9483 = vst [vmem:[#allocation29_spill] sm:$0xff] %v7336_v48  ;;  %9484 = vst [vmem:[#allocation30_spill] sm:$0xff] %v7338_v32  ;;  %1705 = vperm.xlu1 %6727, %v7334_v59   ;;  %1700 = vperm.xlu0 %6726, %v1570_v53   ;;  %v1224_v53 = vld [vmem:[%s7005_s14 + $0x5e] sm:$0xff] }
 0x11c   : > { %v7345_v9 = vpop.permute.xlu1 %772  ;;  %v7347_v18 = vpop.permute.xlu0 %767 }
 0x11d   : > { %9485 = vst [vmem:[#allocation31_spill] sm:$0xff] %v7345_v9  ;;  %9486 = vst [vmem:[#allocation32_spill] sm:$0xff] %v7347_v18  ;;  %2084 = vperm.xlu1 %6727, %v2069_v25   ;;  %1710 = vperm.xlu0 %6726, %v7343_v29   ;;  %v1225_v25 = vld [vmem:[%s7005_s14 + $0x66] sm:$0xff]  ;;  %v7366_v18 = vld [vmem:[%s9437_s1 + $0x1] ss:$0 sm:$0xff] }
 0x11e   : > { %v589_v5 = vmul.f32 %v7366_v18, %v7123_v16 }
 0x120   : > { %v7352_v48 = vpop.permute.xlu1 %1131  ;;  %v7354_v32 = vpop.permute.xlu0 %777 }
 0x121   : > { %9487 = vst [vmem:[#allocation33_spill] sm:$0xff] %v7354_v32  ;;  %1257 = vperm.xlu1 %6727, %v1222_v51   ;;  %2089 = vperm.xlu0 %6726, %v2070_v56   ;;  %v1768_v51 = vld [vmem:[%s7005_s14 + $0x7d] sm:$0xff] }
 0x122   : > { %v7377_v56 = vld [vmem:[%s9437_s1] ss:$0 sm:$0xff] }
 0x123   : > { %v488_v32 = vmul.f32 %v7377_v56, %v7078_v54  ;;  %v591_v54 = vmul.f32 %v7366_v18, %v7131_v20  ;;  %v490_v16 = vmul.f32 %v7377_v56, %v7091_v62 }
 0x124   : > { %v7358_v35 = vpop.permute.xlu1 %1141  ;;  %v7360_v9 = vpop.permute.xlu0 %1136 }
 0x125   : > { %1267 = vperm.xlu1 %6727, %v1224_v53   ;;  %1262 = vperm.xlu0 %6726, %v1223_v3   ;;  %v588_v3 = vmul.f32 %v7366_v18, %v7117_v13  ;;  %v7384_v53 = vld [vmem:[%s9437_s1 + $0x2] ss:$0 sm:$0xff]  ;;  %v487_v13 = vmul.f32 %v7377_v56, %v7085_v58  ;;  %v489_v58 = vmul.f32 %v7377_v56, %v7083_v57  ;;  %v7427_v57 = vld [vmem:[%s9437_s1 + $0x4] ss:$0 sm:$0xff] }
 0x126   : > { %v688_v20 = vmul.f32 %v7384_v53, %v7160_v34  ;;  %v603_v28 = vadd.f32 %v591_v54, %v490_v16  ;;  %v1771_v54 = vld [vmem:[%s7005_s14 + $0x95] sm:$0xff]  ;;  %v891_v16 = vmul.f32 %v7427_v57, %v7235_v0 }
 0x127   : > { %v600_v2 = vadd.f32 %v588_v3, %v487_v13 }
 0x128   : > { %v7368_v49 = vpop.permute.xlu1 %1151  ;;  %v7370_v10 = vpop.permute.xlu0 %1146 }
 0x129   : > { %1277 = vperm.xlu1 %6727, %v7252_v17   ;;  %1272 = vperm.xlu0 %6726, %v1225_v25   ;;  %v587_v17 = vmul.f32 %v7366_v18, %v7119_v14  ;;  %v590_v25 = vmul.f32 %v7366_v18, %v7121_v15  ;;  %v7405_v14 = vld [vmem:[%s9437_s1 + $0x3] ss:$0 sm:$0xff]  ;;  %v486_v15 = vmul.f32 %v7377_v56, %v7080_v55 }
 0x12a   : > { %v690_v55 = vmul.f32 %v7384_v53, %v7169_v37  ;;  %v789_v3 = vmul.f32 %v7405_v14, %v7174_v39  ;;  %v601_v37 = vadd.f32 %v589_v5, %v488_v32  ;;  %v790_v27 = vmul.f32 %v7405_v14, %v7183_v44  ;;  %v1772_v32 = vld [vmem:[%s7005_s14 + $0x9d] sm:$0xff] }
 0x12b   : > { %v599_v62 = vadd.f32 %v587_v17, %v486_v15  ;;  %v602_v34 = vadd.f32 %v590_v25, %v489_v58  ;;  %v7442_v17 = vld [vmem:[%s9437_s1 + $0x5] ss:$0 sm:$0xff]  ;;  %v792_v25 = vmul.f32 %v7405_v14, %v7223_v52  ;;  %v890_v5 = vmul.f32 %v7427_v57, %v7237_v7 }
 0x12c   : > { %v7392_v31 = vpop.permute.xlu1 %1685  ;;  %v7394_v6 = vpop.permute.xlu0 %1680  ;;  %v702_v58 = vadd.f32 %v690_v55, %v601_v37  ;;  %v893_v52 = vmul.f32 %v7427_v57, %v7247_v11 }
 0x12d   : > { %9488 = vst [vmem:[#allocation34_spill] sm:$0xff] %v7392_v31  ;;  %9489 = vst [vmem:[#allocation35_spill] sm:$0xff] %v7394_v6  ;;  %1791 = vperm.xlu1 %6727, %v1768_v51   ;;  %1282 = vperm.xlu0 %6726, %v7261_v26   ;;  %v1770_v6 = vld [vmem:[%s7005_s14 + $0x8d] sm:$0xff]  ;;  %v1769_v31 = vld [vmem:[%s7005_s14 + $0x85] sm:$0xff]  ;;  %v689_v51 = vmul.f32 %v7384_v53, %v7158_v33  ;;  %v691_v26 = vmul.f32 %v7384_v53, %v7167_v36 }
 0x12e   : > { %v692_v33 = vmul.f32 %v7384_v53, %v7176_v40  ;;  %v700_v39 = vadd.f32 %v688_v20, %v599_v62  ;;  %v791_v40 = vmul.f32 %v7405_v14, %v7181_v43 }
 0x12f   : > { %v701_v44 = vadd.f32 %v689_v51, %v600_v2  ;;  %v703_v15 = vadd.f32 %v691_v26, %v602_v34  ;;  %v991_v2 = vmul.f32 %v7442_v17, %v7255_v21  ;;  %v892_v51 = vmul.f32 %v7427_v57, %v7249_v12  ;;  %v2170_v34 = vld [vmem:[%s7005_s14 + $0x80] sm:$0xff] }
 0x130   : > { %v7433_v13 = vpop.permute.xlu1 %858  ;;  %v7435_v36 = vpop.permute.xlu0 %853  ;;  %v704_v43 = vadd.f32 %v692_v33, %v603_v28  ;;  %v992_v26 = vmul.f32 %v7442_v17, %v7265_v38  ;;  %v7474_v28 = vld [vmem:[%s9437_s1 + $0x7] ss:$0 sm:$0xff]  ;;  %v803_v11 = vadd.f32 %v791_v40, %v702_v58  ;;  %v793_v12 = vmul.f32 %v7405_v14, %v7221_v50  ;;  %v1369_v58 = vld [vmem:[%s7005_s14 + $0x92] sm:$0xff] }
 0x131   : > { %1801 = vperm.xlu1 %6727, %v1770_v6   ;;  %1796 = vperm.xlu0 %6726, %v1769_v31   ;;  %v7457_v6 = vld [vmem:[%s9437_s1 + $0x6] ss:$0 sm:$0xff]  ;;  %v801_v31 = vadd.f32 %v789_v3, %v700_v39  ;;  %v802_v0 = vadd.f32 %v790_v27, %v701_v44  ;;  %v804_v21 = vadd.f32 %v792_v25, %v703_v15  ;;  %v2171_v27 = vld [vmem:[%s7005_s14 + $0x88] sm:$0xff]  ;;  %v1370_v15 = vld [vmem:[%s7005_s14 + $0x9a] sm:$0xff] }
 0x132   : > { %v1092_v62 = vmul.f32 %v7457_v6, %v7315_v47  ;;  %v993_v38 = vmul.f32 %v7442_v17, %v7263_v30  ;;  %v1093_v33 = vmul.f32 %v7457_v6, %v7313_v46  ;;  %v994_v40 = vmul.f32 %v7442_v17, %v7271_v42  ;;  %v7505_v44 = vld [vmem:[%s9437_s1 + $0x8] ss:$0 sm:$0xff] }
 0x133   : > { %v902_v55 = vadd.f32 %v890_v5, %v801_v31  ;;  %v903_v3 = vadd.f32 %v891_v16, %v802_v0  ;;  %v905_v37 = vadd.f32 %v893_v52, %v804_v21  ;;  %v1193_v47 = vmul.f32 %v7474_v28, %v7352_v48 }
 0x134   : > { %v7463_v7 = vpop.permute.xlu1 %868  ;;  %v7465_v20 = vpop.permute.xlu0 %863  ;;  %v904_v5 = vadd.f32 %v892_v51, %v803_v11  ;;  %v1194_v30 = vmul.f32 %v7474_v28, %v7360_v9  ;;  %v894_v46 = vmul.f32 %v7427_v57, %v7257_v22  ;;  %v1095_v42 = vmul.f32 %v7457_v6, %v7319_v45 }
 0x135   : > { %1811 = vperm.xlu1 %6727, %v1772_v32   ;;  %1806 = vperm.xlu0 %6726, %v1771_v54   ;;  %v1003_v39 = vadd.f32 %v991_v2, %v902_v55  ;;  %v1004_v32 = vadd.f32 %v992_v26, %v903_v3  ;;  %v1094_v48 = vmul.f32 %v7457_v6, %v7321_v8 }
 0x136   : > { %v805_v9 = vadd.f32 %v793_v12, %v704_v43  ;;  %v1005_v16 = vadd.f32 %v993_v38, %v904_v5  ;;  %v995_v31 = vmul.f32 %v7442_v17, %v7269_v41  ;;  %v1006_v52 = vadd.f32 %v994_v40, %v905_v37  ;;  %v1371_v12 = vld [vmem:[%s7005_s14 + $0xa2] sm:$0xff] }
 0x137   : > { %v1104_v54 = vadd.f32 %v1092_v62, %v1003_v39  ;;  %v1105_v22 = vadd.f32 %v1093_v33, %v1004_v32  ;;  %v1195_v45 = vmul.f32 %v7474_v28, %v7358_v35  ;;  %v1196_v8 = vmul.f32 %v7474_v28, %v7370_v10  ;;  %v7522_v10 = vld [vmem:[%s9438_s2] ss:$0 sm:$0xff]  ;;  %v1372_v35 = vld [vmem:[%s7005_s14 + $0xaa] sm:$0xff] }
 0x138   : > { %v7490_v25 = vpop.permute.xlu1 %878  ;;  %v7492_v50 = vpop.permute.xlu0 %873  ;;  %v906_v41 = vadd.f32 %v894_v46, %v805_v9  ;;  %v1107_v21 = vadd.f32 %v1095_v42, %v1006_v52  ;;  %v1106_v55 = vadd.f32 %v1094_v48, %v1005_v16  ;;  %v1096_v62 = vmul.f32 %v7457_v6, %v7325_v60  ;;  %v1471_v46 = vld [vmem:[%s7005_s14 + $0x9b] sm:$0xff] }
 0x139   : > { %2190 = vperm.xlu1 %6727, %v2171_v27   ;;  %2185 = vperm.xlu0 %6726, %v2170_v34   ;;  %v1205_v2 = vadd.f32 %v1193_v47, %v1104_v54  ;;  %v1206_v26 = vadd.f32 %v1194_v30, %v1105_v22  ;;  %v1197_v33 = vmul.f32 %v7474_v28, %v7368_v49 }
 0x13a   : > { %v1007_v3 = vadd.f32 %v995_v31, %v906_v41  ;;  %v1207_v38 = vadd.f32 %v1195_v45, %v1106_v55  ;;  %v1208_v37 = vadd.f32 %v1196_v8, %v1107_v21 }
 0x13c   : > { %v1238_v0 = vpop.permute.xlu1 %1237  ;;  %v1233_v51 = vpop.permute.xlu0 %1232  ;;  %v1108_v30 = vadd.f32 %v1096_v62, %v1007_v3  ;;  %v7558_v62 = vld [vmem:[%s7005_s14 + $0x96] sm:$0xff] }
 0x13d   : > { %v1295_v43 = vmul.f32 %v7505_v44, %v1238_v0  ;;  %v1294_v11 = vmul.f32 %v7505_v44, %v1233_v51  ;;  %1417 = vperm.xlu1 %6727, %v1370_v15   ;;  %1412 = vperm.xlu0 %6726, %v1369_v58   ;;  %v1470_v15 = vld [vmem:[%s7005_s14 + $0x93] sm:$0xff]  ;;  %v1472_v51 = vld [vmem:[%s7005_s14 + $0xa3] sm:$0xff] }
 0x13e   : > { %v1209_v16 = vadd.f32 %v1197_v33, %v1108_v30 }
 0x13f   : > { %v1307_v27 = vadd.f32 %v1295_v43, %v1206_v26  ;;  %v1306_v34 = vadd.f32 %v1294_v11, %v1205_v2  ;;  %v1473_v2 = vld [vmem:[%s7005_s14 + $0xab] sm:$0xff] }
 0x140   : > { %v1248_v39 = vpop.permute.xlu1 %1247  ;;  %v1243_v40 = vpop.permute.xlu0 %1242 }
 0x141   : > { %v1326_v60 = vadd.f32 %v7522_v10, %v1307_v27  ;;  %v1325_v47 = vadd.f32 %v7522_v10, %v1306_v34  ;;  %v1297_v5 = vmul.f32 %v7505_v44, %v1248_v39  ;;  %v1296_v32 = vmul.f32 %v7505_v44, %v1243_v40  ;;  %1427 = vperm.xlu1 %6727, %v1372_v35   ;;  %v7561_v35 = vld [vmem:[%s7005_s14 + $0x8e] sm:$0xff] }
 0x142   : > { %1422 = vperm.xlu0 %6726, %v1371_v12  }
 0x143   : > { %v1338_v54 = vmax.f32 %v1326_v60, 0.0  ;;  %v1337_v42 = vmax.f32 %v1325_v47, 0.0  ;;  %v1309_v49 = vadd.f32 %v1297_v5, %v1208_v37  ;;  %v1308_v48 = vadd.f32 %v1296_v32, %v1207_v38  ;;  %v7570_v38 = vld [vmem:[%s7005_s14 + $0xb4] sm:$0xff]  ;;  %v2316_v47 = vld [vmem:[%s7005_s14 + $0xc4] sm:$0xff]  ;;  %v7580_v32 = vld [vmem:[%s7005_s14 + $0xbc] sm:$0xff] }
 0x144   : > { %v7534_v58 = vpop.permute.xlu1 %1781  ;;  %v1253_v9 = vpop.permute.xlu0 %1252 }
 0x145   : > { %9490 = vst [vmem:[#allocation36_spill] sm:$0xff] %v7534_v58  ;;  %1350 = vst.msk [vmem:[#allocation2 + $0x8] sm:$0xff] %vm385_vm0, %v1338_v54  ;;  %v1328_v31 = vadd.f32 %v7522_v10, %v1309_v49  ;;  %v1327_v22 = vadd.f32 %v7522_v10, %v1308_v48  ;;  %v1298_v52 = vmul.f32 %v7505_v44, %v1253_v9  ;;  %1518 = vperm.xlu1 %6727, %v1471_v46   ;;  %v2318_v54 = vld [vmem:[%s7005_s14 + $0xd4] sm:$0xff]  ;;  %v3657_v9 = vld [vmem:[#allocation3 + $0x1] sm:$0xff] }
 0x146   : > { %1349 = vst.msk [vmem:[#allocation2] sm:$0xff] %vm385_vm0, %v1337_v42  ;;  %1513 = vperm.xlu0 %6726, %v1470_v15   ;;  %v2317_v42 = vld [vmem:[%s7005_s14 + $0xcc] sm:$0xff]  ;;  %v7595_v15 = vld [vmem:[%s7005_s14 + $0xbd] sm:$0xff] }
 0x147   : > { %v1340_v45 = vmax.f32 %v1328_v31, 0.0  ;;  %v1339_v8 = vmax.f32 %v1327_v22, 0.0  ;;  %v1310_v0 = vadd.f32 %v1298_v52, %v1209_v16  ;;  %9497 = vst [vmem:[#allocation43_spill] sm:$0xff] %v7595_v15  ;;  %v3638_v16 = vld [vmem:[#allocation3] sm:$0xff]  ;;  %v7598_v31 = vld [vmem:[%s7005_s14 + $0xb5] sm:$0xff]  ;;  %v9527_v58 = vld [vmem:[#allocation20_spill] sm:$0xff] }
 0x148   : > { %v7543_v26 = vpop.permute.xlu1 %954  ;;  %v7545_v43 = vpop.permute.xlu0 %1786 }
 0x149   : > { %9491 = vst [vmem:[#allocation37_spill] sm:$0xff] %v7545_v43  ;;  %1352 = vst.msk [vmem:[#allocation2 + $0x18] sm:$0xff] %vm385_vm0, %v1340_v45  ;;  %v1329_v11 = vadd.f32 %v7522_v10, %v1310_v0  ;;  %1528 = vperm.xlu1 %6727, %v1473_v2  }
 0x14a   : > { %1351 = vst.msk [vmem:[#allocation2 + $0x10] sm:$0xff] %vm385_vm0, %v1339_v8  ;;  %1523 = vperm.xlu0 %6726, %v1472_v51   ;;  %v2418_v51 = vld [vmem:[%s7005_s14 + $0xcd] sm:$0xff] }
 0x14b   : > { %v1341_v41 = vmax.f32 %v1329_v11, 0.0  ;;  %v2417_v11 = vld [vmem:[%s7005_s14 + $0xc5] sm:$0xff] }
 0x14c   : > { %v7550_v21 = vpop.permute.xlu1 %964  ;;  %v7552_v55 = vpop.permute.xlu0 %959 }
 0x14d   : > { %1353 = vst.msk [vmem:[#allocation2 + $0x20] sm:$0xff] %vm385_vm0, %v1341_v41  ;;  %1897 = vperm.xlu1 %6727, %v7300_v4   ;;  %v3543_v12 = vld [vmem:[#allocation2] ss:$2 sm:$0xff]  ;;  %v3545_v3 = vld [vmem:[#allocation2 + $0x1] ss:$2 sm:$0xff] }
 0x14e   : > { %1892 = vperm.xlu0 %6726, %v7303_v63   ;;  %v1873_v4 = vld [vmem:[%s7005_s14 + $0x9e] sm:$0xff]  ;;  %v3546_v40 = vmax.f32 %v3543_v12, %v3545_v3  ;;  %v9502_v3 = vmov 0.0  }
 0x150   : > { %v7563_v27 = vpop.permute.xlu1 %974  ;;  %v7565_v34 = vpop.permute.xlu0 %969 }
 0x151   : > { %1907 = vperm.xlu1 %6727, %v7558_v62  }
 0x152   : > { %1902 = vperm.xlu0 %6726, %v7561_v35  }
 0x154   : > { %v3548_v63 = vld [vmem:[#allocation2 + $0x12] ss:$2 sm:$0xff]  ;;  %v3550_v33 = vld [vmem:[#allocation2 + $0x13] ss:$2 sm:$0xff]  ;;  %v7573_v37 = vpop.permute.xlu1 %1387  ;;  %v7575_v39 = vpop.permute.xlu0 %979 }
 0x155   : > { %9492 = vst [vmem:[#allocation38_spill] sm:$0xff] %v7573_v37  ;;  %v3551_v60 = vmax.f32 %v3548_v63, %v3550_v33  ;;  %2329 = vperm.xlu1 %6727, %v7570_v38   ;;  %v2419_v63 = vld [vmem:[%s7005_s14 + $0xd5] sm:$0xff] }
 0x156   : > { %1912 = vperm.xlu0 %6726, %v1873_v4  }
 0x157   : > { %v3552_v5 = vmax.f32 %v3546_v40, %v3551_v60  ;;  %v1573_v60 = vld [vmem:[%s7005_s14 + $0xa4] sm:$0xff] }
 0x158   : > { %v7582_v30 = vpop.permute.xlu1 %1397  ;;  %v7584_v46 = vpop.permute.xlu0 %1392 }
 0x159   : > { %9493 = vst [vmem:[#allocation39_spill] sm:$0xff] %v7582_v30  ;;  %9494 = vst [vmem:[#allocation40_spill] sm:$0xff] %v7584_v46  ;;  %2339 = vperm.xlu1 %6727, %v2316_v47   ;;  %v2073_v46 = vld [vmem:[%s7005_s14 + $0x9f] sm:$0xff] }
 0x15a   : > { %3553 = vst.msk [vmem:[#allocation3 + $0xb] sm:$0xff] %vm385_vm0, %v3552_v5  ;;  %2334 = vperm.xlu0 %6726, %v7580_v32  }
 0x15c   : > { %v7590_v49 = vpop.permute.xlu1 %1407  ;;  %v7592_v48 = vpop.permute.xlu0 %1402 }
 0x15d   : > { %9495 = vst [vmem:[#allocation41_spill] sm:$0xff] %v7590_v49  ;;  %9496 = vst [vmem:[#allocation42_spill] sm:$0xff] %v7592_v48  ;;  %2349 = vperm.xlu1 %6727, %v2318_v54   ;;  %v1574_v54 = vld [vmem:[%s7005_s14 + $0xac] sm:$0xff] }
 0x15e   : > { %2344 = vperm.xlu0 %6726, %v2317_v42  }
 0x160   : > { %v7600_v22 = vpop.permute.xlu1 %1493  ;;  %v7602_v52 = vpop.permute.xlu0 %1488 }
 0x161   : > { %9498 = vst [vmem:[#allocation44_spill] sm:$0xff] %v7600_v22  ;;  %9499 = vst [vmem:[#allocation45_spill] sm:$0xff] %v7602_v52  ;;  %v3658_v2 = vld [vmem:[#allocation3 + $0x9] sm:$0xff]  ;;  %2435 = vperm.xlu1 %6727, %v7595_v15   ;;  %v9520_v52 = vld [vmem:[#allocation14_spill] sm:$0xff] }
 0x162   : > { %v3639_v45 = vld [vmem:[#allocation3 + $0x8] sm:$0xff]  ;;  %v3667_v8 = vpack.c.bf16 %v3658_v2, %v3657_v9  ;;  %2430 = vperm.xlu0 %6726, %v7598_v31   ;;  %v9528_v15 = vld [vmem:[#allocation22_spill] sm:$0xff] }
 0x163   : > { %v3648_v0 = vpack.c.bf16 %v3639_v45, %v3638_v16  ;;  %v7645_v2 = vld [vmem:[%s7005_s14 + $0xa6] sm:$0xff] }
 0x164   : > { %6332 = vmatmul.mubr.msk.bf16.vlgmr.msra.gmra.mrb[0].mxu0 %vm385_vm0, %v3667_v8  ;;  %v7610_v41 = vpop.permute.xlu1 %1503  ;;  %v7612_v12 = vpop.permute.xlu0 %1498  ;;  %9507 = vst [vmem:[#allocation52_spill] sm:$0xff] %v7645_v2 }
 0x165   : > { %6356 = vmatmul.mubr.msk.bf16.vlgmr.msra.gmra.mrb[0].mxu1 %vm385_vm0, %v3648_v0  ;;  %9500 = vst [vmem:[#allocation46_spill] sm:$0xff] %v7610_v41  ;;  %9501 = vst [vmem:[#allocation47_spill] sm:$0xff] %v7612_v12  ;;  %6335 = vmatprep.mubr.msk.bf16.mxu0 %vm6890_vm1, %v9502_v3  ;;  %v7657_v0 = vld [vmem:[%s7005_s14 + $0xb6] sm:$0xff]  ;;  %v594_v12 = vmul.f32 %v7366_v18, %v7135_v23  ;;  %v595_v23 = vmul.f32 %v7366_v18, %v9520_v52 }
 0x166   : > { %6359 = vmatprep.mubr.msk.bf16.mxu1 %vm6890_vm1, %v9502_v3  ;;  %2445 = vperm.xlu1 %6727, %v2418_v51   ;;  %9511 = vst [vmem:[#allocation56_spill] sm:$0xff] %v7657_v0  ;;  %v7666_v51 = vld [vmem:[%s7005_s14 + $0xce] sm:$0xff] }
 0x167   : > { %2440 = vperm.xlu0 %6726, %v2417_v11   ;;  %v7669_v11 = vld [vmem:[%s7005_s14 + $0xc6] sm:$0xff]  ;;  %v9521_v3 = vld [vmem:[#allocation9_spill] sm:$0xff] }
 0x168   : > { %v7619_v33 = vpop.permute.xlu1 %1882  ;;  %v7621_v40 = vpop.permute.xlu0 %1508 }
 0x169   : > { %9503 = vst [vmem:[#allocation48_spill] sm:$0xff] %v7619_v33  ;;  %9504 = vst [vmem:[#allocation49_spill] sm:$0xff] %v7621_v40 }
 0x16a   : > { %1614 = vperm.xlu1 %6727, %v7334_v59  }
 0x16b   : > { %2450 = vperm.xlu0 %6726, %v2419_v63  }
 0x16c   : > { %v7625_v47 = vpop.permute.xlu1 %1055  ;;  %v7627_v5 = vpop.permute.xlu0 %1887 }
 0x16d   : > { %9505 = vst [vmem:[#allocation50_spill] sm:$0xff] %v7627_v5 }
 0x16e   : > { %1624 = vperm.xlu1 %6727, %v1573_v60  }
 0x16f   : > { %1619 = vperm.xlu0 %6726, %v7343_v29   ;;  %v7642_v29 = vld [vmem:[%s7005_s14 + $0xae] sm:$0xff] }
 0x170   : > { %v7631_v42 = vpop.permute.xlu1 %1065  ;;  %v7633_v9 = vpop.permute.xlu0 %1060  ;;  %9506 = vst [vmem:[#allocation51_spill] sm:$0xff] %v7642_v29 }
 0x172   : > { %1993 = vperm.xlu1 %6727, %v7561_v35   ;;  %v7654_v35 = vld [vmem:[%s7005_s14 + $0xbe] sm:$0xff] }
 0x173   : > { %1629 = vperm.xlu0 %6726, %v1574_v54   ;;  %9510 = vst [vmem:[#allocation55_spill] sm:$0xff] %v7654_v35 }
 0x174   : > { %v7636_v59 = vpop.permute.xlu1 %1075  ;;  %v7638_v16 = vpop.permute.xlu0 %1070 }
 0x176   : > { %2003 = vperm.xlu1 %6727, %v1873_v4  }
 0x177   : > { %1998 = vperm.xlu0 %6726, %v7558_v62  }
 0x178   : > { %v7647_v45 = vpop.permute.xlu1 %1589  ;;  %v7649_v8 = vpop.permute.xlu0 %1080 }
 0x179   : > { %9508 = vst [vmem:[#allocation53_spill] sm:$0xff] %v7647_v45  ;;  %9509 = vst [vmem:[#allocation54_spill] sm:$0xff] %v7649_v8  ;;  %v2072_v45 = vld [vmem:[%s7005_s14 + $0x97] sm:$0xff] }
 0x17a   : > { %2013 = vperm.xlu1 %6727, %v7642_v29  }
 0x17b   : > { %2008 = vperm.xlu0 %6726, %v7645_v2  }
 0x17c   : > { %v7659_v4 = vpop.permute.xlu1 %1599  ;;  %v7661_v62 = vpop.permute.xlu0 %1594 }
 0x17d   : > { %9512 = vst [vmem:[#allocation57_spill] sm:$0xff] %v7659_v4  ;;  %9513 = vst [vmem:[#allocation58_spill] sm:$0xff] %v7661_v62  ;;  %v7678_v4 = vld [vmem:[%s7005_s14 + $0xd6] sm:$0xff] }
 0x17e   : > { %2536 = vperm.xlu1 %6727, %v7654_v35   ;;  %v9522_v35 = vld [vmem:[#allocation10_spill] sm:$0xff] }
 0x17f   : > { %2531 = vperm.xlu0 %6726, %v7657_v0   ;;  %v495_v29 = vmul.f32 %v7377_v56, %v9522_v35  ;;  %v9523_v0 = vld [vmem:[#allocation11_spill] sm:$0xff]  ;;  %v694_v35 = vmul.f32 %v7384_v53, %v9527_v58 }
 0x180   : > { %v7671_v63 = vpop.permute.xlu1 %1609  ;;  %v7673_v48 = vpop.permute.xlu0 %1604  ;;  %v494_v2 = vmul.f32 %v7377_v56, %v9523_v0  ;;  %v696_v0 = vmul.f32 %v7384_v53, %v9528_v15 }
 0x181   : > { %9514 = vst [vmem:[#allocation59_spill] sm:$0xff] %v7671_v63  ;;  %9515 = vst [vmem:[#allocation60_spill] sm:$0xff] %v7673_v48  ;;  %v2071_v48 = vld [vmem:[%s7005_s14 + $0x8f] sm:$0xff] }
 0x182   : > { %2546 = vperm.xlu1 %6727, %v7666_v51  }
 0x183   : > { %2541 = vperm.xlu0 %6726, %v7669_v11  }
 0x184   : > { %v7680_v62 = vpop.permute.xlu1 %1988  ;;  %v7682_v40 = vpop.permute.xlu0 %1983 }
 0x185   : > { %9516 = vst [vmem:[#allocation61_spill] sm:$0xff] %v7680_v62  ;;  %9517 = vst [vmem:[#allocation62_spill] sm:$0xff] %v7682_v40  ;;  %v9525_v62 = vld [vmem:[#allocation12_spill] sm:$0xff] }
 0x186   : > { %1715 = vperm.xlu1 %6727, %v1573_v60   ;;  %v592_v60 = vmul.f32 %v7366_v18, %v7129_v19  ;;  %v9519_v19 = vld [vmem:[#allocation13_spill] sm:$0xff] }
 0x187   : > { %2551 = vperm.xlu0 %6726, %v7678_v4   ;;  %v596_v37 = vmul.f32 %v7366_v18, %v9519_v19  ;;  %v496_v19 = vmul.f32 %v7377_v56, %v9525_v62 }
 0x188   : > { %v7685_v49 = vpop.permute.xlu1 %1161  ;;  %v7687_v63 = vpop.permute.xlu0 %1156 }
 0x189   : > { %v608_v62 = vadd.f32 %v596_v37, %v495_v29 }
 0x18a   : > { %1725 = vperm.xlu1 %6727, %v7570_v38   ;;  %v593_v38 = vmul.f32 %v7366_v18, %v7137_v24  ;;  %v492_v24 = vmul.f32 %v7377_v56, %v9521_v3  ;;  %v2074_v3 = vld [vmem:[%s7005_s14 + $0xa7] sm:$0xff] }
 0x18b   : > { %1720 = vperm.xlu0 %6726, %v1574_v54  }
 0x18c   : > { %v7691_v30 = vpop.permute.xlu1 %1171  ;;  %v7693_v41 = vpop.permute.xlu0 %1166  ;;  %v605_v43 = vadd.f32 %v593_v38, %v492_v24  ;;  %v9534_v24 = vld [vmem:[#allocation16_spill] sm:$0xff] }
 0x18d   : > { %v7746_v15 = vmul.f32 %v7377_v56, %v9534_v24 }
 0x18e   : > { %2094 = vperm.xlu1 %6727, %v2071_v48   ;;  %v493_v48 = vmul.f32 %v7377_v56, %v7095_v1  ;;  %v2075_v1 = vld [vmem:[%s7005_s14 + $0xaf] sm:$0xff] }
 0x18f   : > { %1730 = vperm.xlu0 %6726, %v7580_v32   ;;  %v491_v32 = vmul.f32 %v7377_v56, %v7089_v61  ;;  %v9524_v61 = vld [vmem:[#allocation15_spill] sm:$0xff] }
 0x190   : > { %v7704_v54 = vpop.permute.xlu1 %1181  ;;  %v7706_v22 = vpop.permute.xlu0 %1176  ;;  %v597_v40 = vmul.f32 %v7366_v18, %v9524_v61  ;;  %v606_v52 = vadd.f32 %v594_v12, %v493_v48  ;;  %v607_v12 = vadd.f32 %v595_v23, %v494_v2  ;;  %v9533_v48 = vld [vmem:[#allocation27_spill] sm:$0xff]  ;;  %v9538_v2 = vld [vmem:[#allocation29_spill] sm:$0xff] }
 0x191   : > { %9518 = vst [vmem:[#allocation63_spill] sm:$0xff] %v7704_v54  ;;  %v604_v5 = vadd.f32 %v592_v60, %v491_v32  ;;  %v9529_v54 = vld [vmem:[#allocation23_spill] sm:$0xff]  ;;  %v9532_v60 = vld [vmem:[#allocation24_spill] sm:$0xff]  ;;  %v794_v38 = vmul.f32 %v7405_v14, %v9533_v48  ;;  %v796_v23 = vmul.f32 %v7405_v14, %v9538_v2 }
 0x192   : > { %2104 = vperm.xlu1 %6727, %v2073_v46   ;;  %v9526_v46 = vld [vmem:[#allocation21_spill] sm:$0xff]  ;;  %v698_v32 = vmul.f32 %v7384_v53, %v9532_v60  ;;  %v609_v58 = vadd.f32 %v597_v40, %v496_v19  ;;  %v9539_v60 = vld [vmem:[#allocation30_spill] sm:$0xff]  ;;  %v895_v40 = vmul.f32 %v7427_v57, %v7435_v36  ;;  %v706_v19 = vadd.f32 %v694_v35, %v605_v43 }
 0x193   : > { %2099 = vperm.xlu0 %6726, %v2072_v45   ;;  %v693_v33 = vmul.f32 %v7384_v53, %v9526_v46  ;;  %v695_v45 = vmul.f32 %v7384_v53, %v9529_v54  ;;  %v9535_v46 = vld [vmem:[#allocation18_spill] sm:$0xff]  ;;  %v708_v48 = vadd.f32 %v696_v0, %v607_v12  ;;  %v9542_v43 = vld [vmem:[#allocation33_spill] sm:$0xff]  ;;  %v896_v35 = vmul.f32 %v7427_v57, %v7433_v13 }
 0x194   : > { %v7736_v61 = vpop.permute.xlu1 %1695  ;;  %v7738_v8 = vpop.permute.xlu0 %1690  ;;  %v7750_v54 = vmul.f32 %v7366_v18, %v9535_v46  ;;  %v9540_v46 = vld [vmem:[#allocation31_spill] sm:$0xff]  ;;  %v897_v0 = vmul.f32 %v7427_v57, %v7465_v20  ;;  %v899_v13 = vmul.f32 %v7427_v57, %v7492_v50  ;;  %v997_v20 = vmul.f32 %v7442_v17, %v7552_v55 }
 0x195   : > { %9530 = vst [vmem:[#allocation13_spill] sm:$0xff] %v7736_v61  ;;  %9531 = vst [vmem:[#allocation14_spill] sm:$0xff] %v7738_v8  ;;  %v9537_v61 = vld [vmem:[#allocation25_spill] sm:$0xff]  ;;  %v705_v29 = vadd.f32 %v693_v33, %v604_v5  ;;  %v707_v24 = vadd.f32 %v695_v45, %v606_v52  ;;  %v798_v8 = vmul.f32 %v7405_v14, %v9540_v46  ;;  %v7779_v45 = vld [vmem:[%s7005_s14 + $0xde] sm:$0xff] }
 0x196   : > { %2114 = vperm.xlu1 %6727, %v2075_v1   ;;  %9536 = vst [vmem:[#allocation9_spill] sm:$0xff] %v7750_v54  ;;  %v697_v37 = vmul.f32 %v7384_v53, %v9537_v61  ;;  %v795_v1 = vmul.f32 %v7405_v14, %v9539_v60  ;;  %v710_v33 = vadd.f32 %v698_v32, %v609_v58  ;;  %v9541_v61 = vld [vmem:[#allocation32_spill] sm:$0xff] }
 0x197   : > { %2109 = vperm.xlu0 %6726, %v2074_v3   ;;  %v806_v5 = vadd.f32 %v794_v38, %v705_v29  ;;  %v797_v2 = vmul.f32 %v7405_v14, %v9541_v61  ;;  %v996_v60 = vmul.f32 %v7442_v17, %v7543_v26  ;;  %v799_v52 = vmul.f32 %v7405_v14, %v9542_v43  ;;  %v7809_v46 = vld [vmem:[%s7005_s14 + $0xe6] sm:$0xff] }
 0x198   : > { %v7762_v54 = vpop.permute.xlu1 %1705  ;;  %v7764_v3 = vpop.permute.xlu0 %1700  ;;  %v709_v36 = vadd.f32 %v697_v37, %v608_v62  ;;  %v808_v12 = vadd.f32 %v796_v23, %v707_v24  ;;  %v807_v32 = vadd.f32 %v795_v1, %v706_v19  ;;  %v1097_v26 = vmul.f32 %v7457_v6, %v7625_v47  ;;  %v1773_v19 = vld [vmem:[%s7005_s14 + $0xa5] sm:$0xff] }
 0x199   : > { %v907_v38 = vadd.f32 %v895_v40, %v806_v5  ;;  %v898_v58 = vmul.f32 %v7427_v57, %v7463_v7  ;;  %v809_v23 = vadd.f32 %v797_v2, %v708_v48  ;;  %v998_v47 = vmul.f32 %v7442_v17, %v7550_v21 }
 0x19a   : > { %2637 = vperm.xlu1 %6727, %v7666_v51   ;;  %v810_v62 = vadd.f32 %v798_v8, %v709_v36  ;;  %v1198_v8 = vmul.f32 %v7474_v28, %v7687_v63  ;;  %v811_v7 = vadd.f32 %v799_v52, %v710_v33  ;;  %v908_v50 = vadd.f32 %v896_v35, %v807_v32 }
 0x19b   : > { %2632 = vperm.xlu0 %6726, %v7669_v11   ;;  %v1008_v1 = vadd.f32 %v996_v60, %v907_v38  ;;  %v909_v40 = vadd.f32 %v897_v0, %v808_v12  ;;  %v1098_v55 = vmul.f32 %v7457_v6, %v7633_v9  ;;  %v1000_v48 = vmul.f32 %v7442_v17, %v7563_v27 }
 0x19c   : > { %v7789_v37 = vpop.permute.xlu1 %2084  ;;  %v7791_v29 = vpop.permute.xlu0 %1710  ;;  %v999_v21 = vmul.f32 %v7442_v17, %v7565_v34  ;;  %v1099_v63 = vmul.f32 %v7457_v6, %v7631_v42  ;;  %v910_v33 = vadd.f32 %v898_v58, %v809_v23  ;;  %v911_v5 = vadd.f32 %v899_v13, %v810_v62 }
 0x19d   : > { %v1109_v24 = vadd.f32 %v1097_v26, %v1008_v1  ;;  %v1009_v61 = vadd.f32 %v997_v20, %v908_v50  ;;  %v1199_v9 = vmul.f32 %v7474_v28, %v7685_v49  ;;  %v1010_v27 = vadd.f32 %v998_v47, %v909_v40  ;;  %v2172_v50 = vld [vmem:[%s7005_s14 + $0x90] sm:$0xff] }
 0x19e   : > { %2647 = vperm.xlu1 %6727, %v7779_v45   ;;  %v1200_v34 = vmul.f32 %v7474_v28, %v7693_v41  ;;  %v900_v42 = vmul.f32 %v7427_v57, %v7490_v25  ;;  %v1101_v52 = vmul.f32 %v7457_v6, %v7636_v59  ;;  %v1100_v49 = vmul.f32 %v7457_v6, %v7638_v16  ;;  %v1774_v41 = vld [vmem:[%s7005_s14 + $0xad] sm:$0xff] }
 0x19f   : > { %2642 = vperm.xlu0 %6726, %v7678_v4   ;;  %v1210_v60 = vadd.f32 %v1198_v8, %v1109_v24  ;;  %v1110_v43 = vadd.f32 %v1098_v55, %v1009_v61  ;;  %v1012_v35 = vadd.f32 %v1000_v48, %v911_v5  ;;  %v1011_v0 = vadd.f32 %v999_v21, %v910_v33  ;;  %v9543_v8 = vld [vmem:[#allocation54_spill] sm:$0xff] }
 0x1a0   : > { %v1258_v4 = vpop.permute.xlu1 %1257  ;;  %v7813_v2 = vpop.permute.xlu0 %2089  ;;  %v1111_v12 = vadd.f32 %v1099_v63, %v1010_v27  ;;  %v1001_v38 = vmul.f32 %v7442_v17, %v7575_v39  ;;  %v1201_v25 = vmul.f32 %v7474_v28, %v7691_v30  ;;  %v1202_v59 = vmul.f32 %v7474_v28, %v7706_v22  ;;  %v9544_v22 = vld [vmem:[#allocation19_spill] sm:$0xff]  ;;  %v9546_v27 = vld [vmem:[#allocation17_spill] sm:$0xff] }
 0x1a1   : > { %v1299_v36 = vmul.f32 %v7505_v44, %v1258_v4  ;;  %v1211_v26 = vadd.f32 %v1199_v9, %v1110_v43  ;;  %v912_v39 = vadd.f32 %v900_v42, %v811_v7  ;;  %v1113_v1 = vadd.f32 %v1101_v52, %v1012_v35  ;;  %v9545_v63 = vld [vmem:[#allocation63_spill] sm:$0xff]  ;;  %v9548_v42 = vld [vmem:[#allocation28_spill] sm:$0xff] }
 0x1a2   : > { %1816 = vperm.xlu1 %6727, %v1773_v19   ;;  %v1212_v58 = vadd.f32 %v1200_v34, %v1111_v12  ;;  %v1112_v47 = vadd.f32 %v1100_v49, %v1011_v0  ;;  %v1102_v30 = vmul.f32 %v7457_v6, %v9543_v8  ;;  %v1540_v40 = vmul.f32 %v7366_v18, %v9544_v22  ;;  %v9547_v34 = vld [vmem:[#allocation26_spill] sm:$0xff]  ;;  %v9549_v49 = vld [vmem:[#allocation43_spill] sm:$0xff]  ;;  %v9553_v8 = vld [vmem:[#allocation36_spill] sm:$0xff] }
 0x1a3   : > { %2652 = vperm.xlu0 %6726, %v7809_v46   ;;  %v1311_v32 = vadd.f32 %v1299_v36, %v1210_v60  ;;  %v1013_v21 = vadd.f32 %v1001_v38, %v912_v39  ;;  %v1214_v7 = vadd.f32 %v1202_v59, %v1113_v1  ;;  %v1439_v60 = vmul.f32 %v7377_v56, %v9546_v27  ;;  %v2174_v35 = vld [vmem:[%s7005_s14 + $0xa0] sm:$0xff]  ;;  %v2173_v38 = vld [vmem:[%s7005_s14 + $0x98] sm:$0xff]  ;;  %v2176_v22 = vld [vmem:[%s7005_s14 + $0xb0] sm:$0xff] }
 0x1a4   : > { %v1268_v62 = vpop.permute.xlu1 %1267  ;;  %v1263_v16 = vpop.permute.xlu0 %1262  ;;  %v1213_v24 = vadd.f32 %v1201_v25, %v1112_v47  ;;  %v1641_v36 = vmul.f32 %v7384_v53, %v9547_v34  ;;  %v1642_v43 = vmul.f32 %v7384_v53, %v9548_v42  ;;  %v9551_v56 = vld [vmem:[#allocation34_spill] sm:$0xff]  ;;  %v7895_v42 = vld [vmem:[%s7005_s14 + $0xc7] sm:$0xff] }
 0x1a5   : > { %v1330_v13 = vadd.f32 %v7522_v10, %v1311_v32  ;;  %v1301_v20 = vmul.f32 %v7505_v44, %v1268_v62  ;;  %v1300_v23 = vmul.f32 %v7505_v44, %v1263_v16  ;;  %v1114_v52 = vadd.f32 %v1102_v30, %v1013_v21  ;;  %v9552_v16 = vld [vmem:[#allocation35_spill] sm:$0xff]  ;;  %v9554_v30 = vld [vmem:[#allocation37_spill] sm:$0xff] }
 0x1a6   : > { %1826 = vperm.xlu1 %6727, %v7598_v31   ;;  %v1203_v31 = vmul.f32 %v7474_v28, %v9545_v63  ;;  %v1552_v59 = vadd.f32 %v1540_v40, %v1439_v60  ;;  %v1743_v62 = vmul.f32 %v7405_v14, %v9551_v56  ;;  %v1742_v53 = vmul.f32 %v7405_v14, %v9552_v16  ;;  %v9555_v63 = vld [vmem:[#allocation48_spill] sm:$0xff]  ;;  %v9558_v60 = vld [vmem:[#allocation62_spill] sm:$0xff] }
 0x1a7   : > { %1821 = vperm.xlu0 %6726, %v1774_v41   ;;  %v1342_v55 = vmax.f32 %v1330_v13, 0.0  ;;  %v1313_v19 = vadd.f32 %v1301_v20, %v1212_v58  ;;  %v1312_v48 = vadd.f32 %v1300_v23, %v1211_v26  ;;  %v9550_v26 = vld [vmem:[#allocation9_spill] sm:$0xff]  ;;  %v1843_v14 = vmul.f32 %v7427_v57, %v9553_v8 }
 0x1a8   : > { %v1278_v33 = vpop.permute.xlu1 %1277  ;;  %v1273_v5 = vpop.permute.xlu0 %1272  ;;  %v1553_v25 = vadd.f32 %v9550_v26, %v7746_v15  ;;  %v1215_v20 = vadd.f32 %v1203_v31, %v1114_v52  ;;  %v1653_v1 = vadd.f32 %v1641_v36, %v1552_v59  ;;  %v1944_v31 = vmul.f32 %v7442_v17, %v9555_v63  ;;  %v2721_v26 = vld [vmem:[%s7005_s14 + $0xdf] sm:$0xff] }
 0x1a9   : > { %1354 = vst.msk [vmem:[#allocation2 + $0x28] sm:$0xff] %vm385_vm0, %v1342_v55  ;;  %v1332_v61 = vadd.f32 %v7522_v10, %v1313_v19  ;;  %v1331_v9 = vadd.f32 %v7522_v10, %v1312_v48  ;;  %v1303_v18 = vmul.f32 %v7505_v44, %v1278_v33  ;;  %v1302_v4 = vmul.f32 %v7505_v44, %v1273_v5  ;;  %v2175_v48 = vld [vmem:[%s7005_s14 + $0xa8] sm:$0xff] }
 0x1aa   : > { %2195 = vperm.xlu1 %6727, %v2172_v50   ;;  %v1654_v47 = vadd.f32 %v1642_v43, %v1553_v25  ;;  %v1844_v50 = vmul.f32 %v7427_v57, %v9554_v30  ;;  %v2045_v34 = vmul.f32 %v7457_v6, %v9558_v60  ;;  %v2720_v25 = vld [vmem:[%s7005_s14 + $0xd7] sm:$0xff] }
 0x1ab   : > { %1831 = vperm.xlu0 %6726, %v9549_v49   ;;  %v1344_v0 = vmax.f32 %v1332_v61, 0.0  ;;  %v1343_v12 = vmax.f32 %v1331_v9, 0.0  ;;  %v1315_v32 = vadd.f32 %v1303_v18, %v1214_v7  ;;  %v1314_v41 = vadd.f32 %v1302_v4, %v1213_v24  ;;  %v9556_v7 = vld [vmem:[#allocation50_spill] sm:$0xff]  ;;  %v9557_v4 = vld [vmem:[#allocation61_spill] sm:$0xff] }
 0x1ac   : > { %v7863_v58 = vpop.permute.xlu1 %1791  ;;  %v1283_v13 = vpop.permute.xlu0 %1282  ;;  %v1755_v21 = vadd.f32 %v1743_v62, %v1654_v47  ;;  %v1754_v24 = vadd.f32 %v1742_v53, %v1653_v1  ;;  %v1945_v33 = vmul.f32 %v7442_v17, %v9556_v7  ;;  %v2046_v27 = vmul.f32 %v7457_v6, %v9557_v4  ;;  %v7892_v17 = vld [vmem:[%s7005_s14 + $0xcf] sm:$0xff]  ;;  %v2722_v1 = vld [vmem:[%s7005_s14 + $0xe7] sm:$0xff] }
 0x1ad   : > { %1356 = vst.msk [vmem:[#allocation2 + $0x38] sm:$0xff] %vm385_vm0, %v1344_v0  ;;  %1355 = vst.msk [vmem:[#allocation2 + $0x30] sm:$0xff] %vm385_vm0, %v1343_v12  ;;  %v1334_v23 = vadd.f32 %v7522_v10, %v1315_v32  ;;  %v1333_v15 = vadd.f32 %v7522_v10, %v1314_v41  ;;  %v1304_v39 = vmul.f32 %v7505_v44, %v1283_v13  ;;  %v9563_v7 = vld [vmem:[#allocation55_spill] sm:$0xff] }
 0x1ae   : > { %2205 = vperm.xlu1 %6727, %v2174_v35   ;;  %v1855_v9 = vadd.f32 %v1843_v14, %v1754_v24  ;;  %v1856_v18 = vadd.f32 %v1844_v50, %v1755_v21  ;;  %v2146_v49 = vmul.f32 %v7474_v28, %v7789_v37  ;;  %v2147_v35 = vmul.f32 %v7474_v28, %v7813_v2  ;;  %v9559_v50 = vld [vmem:[#allocation52_spill] sm:$0xff] }
 0x1af   : > { %2200 = vperm.xlu0 %6726, %v2173_v38   ;;  %v1346_v40 = vmax.f32 %v1334_v23, 0.0  ;;  %v1345_v55 = vmax.f32 %v1333_v15, 0.0  ;;  %v1316_v19 = vadd.f32 %v1304_v39, %v1215_v20 }
 0x1b0   : > { %v7880_v5 = vpop.permute.xlu1 %1801  ;;  %v7882_v61 = vpop.permute.xlu0 %1796  ;;  %v1956_v43 = vadd.f32 %v1944_v31, %v1855_v9  ;;  %v1957_v52 = vadd.f32 %v1945_v33, %v1856_v18  ;;  %v2321_v33 = vld [vmem:[%s7005_s14 + $0xec] sm:$0xff] }
 0x1b1   : > { %1358 = vst.msk [vmem:[#allocation2 + $0x48] sm:$0xff] %vm385_vm0, %v1346_v40  ;;  %1357 = vst.msk [vmem:[#allocation2 + $0x40] sm:$0xff] %vm385_vm0, %v1345_v55  ;;  %v1335_v57 = vadd.f32 %v7522_v10, %v1316_v19  ;;  %v9561_v19 = vld [vmem:[#allocation56_spill] sm:$0xff] }
 0x1b2   : > { %2215 = vperm.xlu1 %6727, %v2176_v22   ;;  %v2058_v6 = vadd.f32 %v2046_v27, %v1957_v52  ;;  %v2057_v32 = vadd.f32 %v2045_v34, %v1956_v43  ;;  %v2322_v52 = vld [vmem:[%s7005_s14 + $0xf4] sm:$0xff] }
 0x1b3   : > { %2210 = vperm.xlu0 %6726, %v2175_v48   ;;  %v1347_v36 = vmax.f32 %v1335_v57, 0.0  ;;  %v9562_v48 = vld [vmem:[#allocation51_spill] sm:$0xff] }
 0x1b4   : > { %v7901_v0 = vpop.permute.xlu1 %1811  ;;  %v7903_v12 = vpop.permute.xlu0 %1806  ;;  %v3555_v41 = vld [vmem:[#allocation2 + $0x24] ss:$2 sm:$0xff]  ;;  %v3557_v38 = vld [vmem:[#allocation2 + $0x25] ss:$2 sm:$0xff]  ;;  %v2158_v37 = vadd.f32 %v2146_v49, %v2057_v32  ;;  %v2159_v59 = vadd.f32 %v2147_v35, %v2058_v6 }
 0x1b5   : > { %1359 = vst.msk [vmem:[#allocation2 + $0x50] sm:$0xff] %vm385_vm0, %v1347_v36  ;;  %v3558_v16 = vmax.f32 %v3555_v41, %v3557_v38  ;;  %v2320_v57 = vld [vmem:[%s7005_s14 + $0xe4] sm:$0xff]  ;;  %v2422_v6 = vld [vmem:[%s7005_s14 + $0xed] sm:$0xff] }
 0x1b6   : > { %2738 = vperm.xlu1 %6727, %v7892_v17   ;;  %v2420_v36 = vld [vmem:[%s7005_s14 + $0xdd] sm:$0xff]  ;;  %v2421_v32 = vld [vmem:[%s7005_s14 + $0xe5] sm:$0xff] }
 0x1b7   : > { %2733 = vperm.xlu0 %6726, %v7895_v42  }
 0x1b8   : > { %v3560_v28 = vld [vmem:[#allocation2 + $0x36] ss:$2 sm:$0xff]  ;;  %v3562_v2 = vld [vmem:[#allocation2 + $0x37] ss:$2 sm:$0xff]  ;;  %v2191_v56 = vpop.permute.xlu1 %2190  ;;  %v2186_v62 = vpop.permute.xlu0 %2185 }
 0x1b9   : > { %v3563_v53 = vmax.f32 %v3560_v28, %v3562_v2  ;;  %v2248_v13 = vmul.f32 %v7505_v44, %v2191_v56  ;;  %v2247_v20 = vmul.f32 %v7505_v44, %v2186_v62 }
 0x1ba   : > { %2748 = vperm.xlu1 %6727, %v2721_v26   ;;  %v7955_v26 = vld [vmem:[%s7005_s14 + $0xc8] sm:$0xff] }
 0x1bb   : > { %2743 = vperm.xlu0 %6726, %v2720_v25   ;;  %v3564_v23 = vmax.f32 %v3558_v16, %v3563_v53  ;;  %v2260_v15 = vadd.f32 %v2248_v13, %v2159_v59  ;;  %v2259_v39 = vadd.f32 %v2247_v20, %v2158_v37  ;;  %v2423_v25 = vld [vmem:[%s7005_s14 + $0xf5] sm:$0xff] }
 0x1bc   : > { %v7913_v47 = vpop.permute.xlu1 %1417  ;;  %v7915_v8 = vpop.permute.xlu0 %1412  ;;  %v3567_v63 = vld [vmem:[#allocation2 + $0x48] ss:$2 sm:$0xff]  ;;  %v3569_v31 = vld [vmem:[#allocation2 + $0x49] ss:$2 sm:$0xff]  ;;  %v2821_v13 = vld [vmem:[%s7005_s14 + $0xd8] sm:$0xff] }
 0x1bd   : > { %3565 = vst.msk [vmem:[#allocation3 + $0x15] sm:$0xff] %vm385_vm0, %v3564_v23  ;;  %v2279_v14 = vadd.f32 %v7522_v10, %v2260_v15  ;;  %v2278_v30 = vadd.f32 %v7522_v10, %v2259_v39  ;;  %v2319_v10 = vld [vmem:[%s7005_s14 + $0xdc] sm:$0xff]  ;;  %v3570_v27 = vmax.f32 %v3567_v63, %v3569_v31  ;;  %v7967_v20 = vld [vmem:[%s7005_s14 + $0xd0] sm:$0xff]  ;;  %v9566_v15 = vmov 0.0  }
 0x1be   : > { %1917 = vperm.xlu1 %6727, %v9559_v50  }
 0x1bf   : > { %2753 = vperm.xlu0 %6726, %v2722_v1   ;;  %v2291_v44 = vmax.f32 %v2279_v14, 0.0  ;;  %v2290_v22 = vmax.f32 %v2278_v30, 0.0  ;;  %v2823_v1 = vld [vmem:[%s7005_s14 + $0xe8] sm:$0xff]  ;;  %v2822_v14 = vld [vmem:[%s7005_s14 + $0xe0] sm:$0xff] }
 0x1c0   : > { %v7921_v40 = vpop.permute.xlu1 %1427 }
 0x1c1   : > { %2303 = vst.msk [vmem:[#allocation2 + $0x62] sm:$0xff] %vm385_vm0, %v2291_v44  ;;  %2302 = vst.msk [vmem:[#allocation2 + $0x5a] sm:$0xff] %vm385_vm0, %v2290_v22  ;;  %v7925_v55 = vpop.permute.xlu0 %1422 }
 0x1c2   : > { %9560 = vst [vmem:[#allocation10_spill] sm:$0xff] %v7925_v55  ;;  %1927 = vperm.xlu1 %6727, %v9561_v19  }
 0x1c3   : > { %1922 = vperm.xlu0 %6726, %v9562_v48  }
 0x1c4   : > { %v7930_v21 = vpop.permute.xlu1 %1518  ;;  %v3659_v37 = vld [vmem:[#allocation3 + $0x11] sm:$0xff] }
 0x1c5   : > { %v7932_v24 = vpop.permute.xlu0 %1513  ;;  %v3640_v2 = vld [vmem:[#allocation3 + $0x10] sm:$0xff] }
 0x1c6   : > { %2354 = vperm.xlu1 %6727, %v2319_v10  }
 0x1c7   : > { %1932 = vperm.xlu0 %6726, %v9563_v7  }
 0x1c8   : > { %v3572_v9 = vld [vmem:[#allocation2 + $0x5a] ss:$2 sm:$0xff]  ;;  %v3574_v18 = vld [vmem:[#allocation2 + $0x5b] ss:$2 sm:$0xff]  ;;  %v7937_v4 = vpop.permute.xlu1 %1528 }
 0x1c9   : > { %v3575_v60 = vmax.f32 %v3572_v9, %v3574_v18  ;;  %v7939_v34 = vpop.permute.xlu0 %1523  ;;  %v2076_v18 = vld [vmem:[%s7005_s14 + $0xb7] sm:$0xff] }
 0x1ca   : > { %2364 = vperm.xlu1 %6727, %v2321_v33  }
 0x1cb   : > { %2359 = vperm.xlu0 %6726, %v2320_v57   ;;  %v3576_v43 = vmax.f32 %v3570_v27, %v3575_v60  ;;  %v8022_v27 = vld [vmem:[%s7005_s14 + $0xf8] sm:$0xff] }
 0x1cc   : > { %v7943_v49 = vpop.permute.xlu1 %1897 }
 0x1cd   : > { %3577 = vst.msk [vmem:[#allocation3 + $0x1f] sm:$0xff] %vm385_vm0, %v3576_v43  ;;  %v7946_v35 = vpop.permute.xlu0 %1892  ;;  %v2077_v43 = vld [vmem:[%s7005_s14 + $0xbf] sm:$0xff] }
 0x1ce   : > { %2455 = vperm.xlu1 %6727, %v2420_v36  }
 0x1cf   : > { %2369 = vperm.xlu0 %6726, %v2322_v52  }
 0x1d0   : > { %v7950_v41 = vpop.permute.xlu1 %1907 }
 0x1d1   : > { %v7952_v38 = vpop.permute.xlu0 %1902 }
 0x1d2   : > { %2465 = vperm.xlu1 %6727, %v2422_v6  }
 0x1d3   : > { %2460 = vperm.xlu0 %6726, %v2421_v32  }
 0x1d4   : > { %v7958_v59 = vpop.permute.xlu1 %2329  ;;  %v3660_v28 = vld [vmem:[#allocation3 + $0x19] sm:$0xff] }
 0x1d5   : > { %9564 = vst [vmem:[#allocation11_spill] sm:$0xff] %v7958_v59  ;;  %v3641_v56 = vld [vmem:[#allocation3 + $0x18] sm:$0xff]  ;;  %v7960_v62 = vpop.permute.xlu0 %1912  ;;  %v3668_v16 = vpack.c.bf16 %v3660_v28, %v3659_v37 }
 0x1d6   : > { %2834 = vperm.xlu1 %6727, %v7955_v26   ;;  %v3649_v53 = vpack.c.bf16 %v3641_v56, %v3640_v2  ;;  %v8041_v37 = vld [vmem:[%s7005_s14 + $0xfe] sm:$0xff]  ;;  %v8050_v56 = vld [vmem:[%s7005_s14 + $0x106] sm:$0xff] }
 0x1d7   : > { %2470 = vperm.xlu0 %6726, %v2423_v25   ;;  %6336 = vmatmul.mubr.msk.bf16.gmra.mrb[4].mxu0 %vm385_vm0, %v3668_v16  ;;  %v9605_v59 = vld [vmem:[#allocation58_spill] sm:$0xff] }
 0x1d8   : > { %6360 = vmatmul.mubr.msk.bf16.gmra.mrb[4].mxu1 %vm385_vm0, %v3649_v53  ;;  %v7969_v23 = vpop.permute.xlu1 %2339  ;;  %6339 = vmatprep.mubr.msk.bf16.mxu0 %vm6890_vm1, %v9566_v15 }
 0x1d9   : > { %9565 = vst [vmem:[#allocation15_spill] sm:$0xff] %v7969_v23  ;;  %6363 = vmatprep.mubr.msk.bf16.mxu1 %vm6890_vm1, %v9566_v15  ;;  %v7975_v39 = vpop.permute.xlu0 %2334 }
 0x1da   : > { %9567 = vst [vmem:[#allocation12_spill] sm:$0xff] %v7975_v39  ;;  %2844 = vperm.xlu1 %6727, %v2821_v13  }
 0x1db   : > { %2839 = vperm.xlu0 %6726, %v7967_v20  }
 0x1dc   : > { %v7980_v30 = vpop.permute.xlu1 %2349 }
 0x1dd   : > { %9568 = vst [vmem:[#allocation21_spill] sm:$0xff] %v7980_v30  ;;  %v7982_v50 = vpop.permute.xlu0 %2344 }
 0x1de   : > { %9569 = vst [vmem:[#allocation20_spill] sm:$0xff] %v7982_v50  ;;  %2854 = vperm.xlu1 %6727, %v2823_v1   ;;  %v8117_v50 = vld [vmem:[%s9437_s1 + $0x3] ss:$0 sm:$0xff] }
 0x1df   : > { %2849 = vperm.xlu0 %6726, %v2822_v14   ;;  %v1746_v55 = vmul.f32 %v8117_v50, %v7764_v3  ;;  %v1747_v3 = vmul.f32 %v8117_v50, %v7762_v54 }
 0x1e0   : > { %v7984_v44 = vpop.permute.xlu1 %2435 }
 0x1e1   : > { %9570 = vst [vmem:[#allocation22_spill] sm:$0xff] %v7984_v44  ;;  %v7986_v22 = vpop.permute.xlu0 %2430 }
 0x1e2   : > { %9571 = vst [vmem:[#allocation23_spill] sm:$0xff] %v7986_v22  ;;  %2023 = vperm.xlu1 %6727, %v9563_v7   ;;  %v2524_v7 = vld [vmem:[%s7005_s14 + $0xf6] sm:$0xff] }
 0x1e3   : > { %2018 = vperm.xlu0 %6726, %v9561_v19   ;;  %v2523_v19 = vld [vmem:[%s7005_s14 + $0xee] sm:$0xff]  ;;  %v9604_v22 = vld [vmem:[#allocation42_spill] sm:$0xff] }
 0x1e5   : > { %v7990_v48 = vpop.permute.xlu1 %2445 }
 0x1e6   : > { %9572 = vst [vmem:[#allocation24_spill] sm:$0xff] %v7990_v48  ;;  %v7992_v10 = vpop.permute.xlu0 %2440  ;;  %2033 = vperm.xlu1 %6727, %v7666_v51   ;;  %v2726_v48 = vld [vmem:[%s7005_s14 + $0x107] sm:$0xff] }
 0x1e7   : > { %9573 = vst [vmem:[#allocation27_spill] sm:$0xff] %v7992_v10  ;;  %2028 = vperm.xlu0 %6726, %v7669_v11   ;;  %v9603_v10 = vld [vmem:[#allocation57_spill] sm:$0xff] }
 0x1e9   : > { %v7996_v63 = vpop.permute.xlu1 %1614 }
 0x1ea   : > { %9574 = vst [vmem:[#allocation16_spill] sm:$0xff] %v7996_v63  ;;  %v7998_v31 = vpop.permute.xlu0 %2450  ;;  %2561 = vperm.xlu1 %6727, %v7809_v46   ;;  %v8013_v46 = vld [vmem:[%s7005_s14 + $0xf0] sm:$0xff] }
 0x1eb   : > { %9575 = vst [vmem:[#allocation18_spill] sm:$0xff] %v7998_v31  ;;  %2556 = vperm.xlu0 %6726, %v7779_v45  }
 0x1ed   : > { %v8004_v33 = vpop.permute.xlu1 %1624 }
 0x1ee   : > { %9576 = vst [vmem:[#allocation25_spill] sm:$0xff] %v8004_v33  ;;  %v8006_v57 = vpop.permute.xlu0 %1619  ;;  %2571 = vperm.xlu1 %6727, %v2524_v7  }
 0x1ef   : > { %9577 = vst [vmem:[#allocation29_spill] sm:$0xff] %v8006_v57  ;;  %2566 = vperm.xlu0 %6726, %v2523_v19  }
 0x1f1   : > { %v8008_v51 = vpop.permute.xlu1 %1993 }
 0x1f2   : > { %v8010_v11 = vpop.permute.xlu0 %1629  ;;  %2940 = vperm.xlu1 %6727, %v2822_v14  }
 0x1f3   : > { %9578 = vst [vmem:[#allocation30_spill] sm:$0xff] %v8010_v11  ;;  %2935 = vperm.xlu0 %6726, %v2821_v13   ;;  %v3022_v13 = vld [vmem:[%s7005_s14 + $0xe1] sm:$0xff]  ;;  %v9596_v11 = vld [vmem:[#allocation40_spill] sm:$0xff] }
 0x1f5   : > { %v8015_v45 = vpop.permute.xlu1 %2003 }
 0x1f6   : > { %v8017_v9 = vpop.permute.xlu0 %1998  ;;  %2950 = vperm.xlu1 %6727, %v8013_v46  }
 0x1f7   : > { %2945 = vperm.xlu0 %6726, %v2823_v1  }
 0x1f9   : > { %v8024_v60 = vpop.permute.xlu1 %2013 }
 0x1fa   : > { %v8026_v36 = vpop.permute.xlu0 %2008  ;;  %2119 = vperm.xlu1 %6727, %v2076_v18  }
 0x1fb   : > { %2955 = vperm.xlu0 %6726, %v8022_v27  }
 0x1fd   : > { %v8030_v52 = vpop.permute.xlu1 %2536 }
 0x1fe   : > { %9579 = vst [vmem:[#allocation31_spill] sm:$0xff] %v8030_v52  ;;  %v8032_v6 = vpop.permute.xlu0 %2531  ;;  %2129 = vperm.xlu1 %6727, %v7895_v42   ;;  %v3021_v42 = vld [vmem:[%s7005_s14 + $0xd9] sm:$0xff] }
 0x1ff   : > { %9580 = vst [vmem:[#allocation32_spill] sm:$0xff] %v8032_v6  ;;  %2124 = vperm.xlu0 %6726, %v2077_v43  }
 0x201   : > { %v8035_v32 = vpop.permute.xlu1 %2546 }
 0x202   : > { %9581 = vst [vmem:[#allocation33_spill] sm:$0xff] %v8035_v32  ;;  %v8037_v25 = vpop.permute.xlu0 %2541  ;;  %2657 = vperm.xlu1 %6727, %v2523_v19   ;;  %v3024_v19 = vld [vmem:[%s7005_s14 + $0xf1] sm:$0xff] }
 0x203   : > { %9582 = vst [vmem:[#allocation54_spill] sm:$0xff] %v8037_v25  ;;  %2134 = vperm.xlu0 %6726, %v7892_v17   ;;  %v3023_v17 = vld [vmem:[%s7005_s14 + $0xe9] sm:$0xff] }
 0x205   : > { %v8043_v28 = vpop.permute.xlu1 %1715 }
 0x206   : > { %9583 = vst [vmem:[#allocation19_spill] sm:$0xff] %v8043_v28  ;;  %v8045_v2 = vpop.permute.xlu0 %2551  ;;  %2667 = vperm.xlu1 %6727, %v8041_v37   ;;  %v9592_v28 = vld [vmem:[#allocation44_spill] sm:$0xff] }
 0x207   : > { %9584 = vst [vmem:[#allocation63_spill] sm:$0xff] %v8045_v2  ;;  %2662 = vperm.xlu0 %6726, %v2524_v7   ;;  %v3025_v7 = vld [vmem:[%s7005_s14 + $0xf9] sm:$0xff] }
 0x208   : > { %v2177_v2 = vld [vmem:[%s7005_s14 + $0xb8] sm:$0xff] }
 0x209   : > { %v8052_v16 = vpop.permute.xlu1 %1725 }
 0x20a   : > { %9585 = vst [vmem:[#allocation17_spill] sm:$0xff] %v8052_v16  ;;  %v8054_v53 = vpop.permute.xlu0 %1720  ;;  %3036 = vperm.xlu1 %6727, %v3021_v42   ;;  %v2178_v42 = vld [vmem:[%s7005_s14 + $0xc0] sm:$0xff]  ;;  %v9589_v16 = vld [vmem:[#allocation45_spill] sm:$0xff] }
 0x20b   : > { %9586 = vst [vmem:[#allocation26_spill] sm:$0xff] %v8054_v53  ;;  %2672 = vperm.xlu0 %6726, %v8050_v56   ;;  %v9594_v53 = vld [vmem:[#allocation47_spill] sm:$0xff] }
 0x20d   : > { %v8059_v1 = vpop.permute.xlu1 %2094 }
 0x20e   : > { %v8061_v14 = vpop.permute.xlu0 %1730  ;;  %3046 = vperm.xlu1 %6727, %v3023_v17  }
 0x20f   : > { %9587 = vst [vmem:[#allocation28_spill] sm:$0xff] %v8061_v14  ;;  %3041 = vperm.xlu0 %6726, %v3022_v13   ;;  %v8080_v13 = vld [vmem:[%s9437_s1 + $0x1] ss:$0 sm:$0xff]  ;;  %v2724_v14 = vld [vmem:[%s7005_s14 + $0xf7] sm:$0xff] }
 0x210   : > { %v1543_v6 = vmul.f32 %v8080_v13, %v9592_v28  ;;  %v1544_v52 = vmul.f32 %v8080_v13, %v9594_v53  ;;  %v9597_v28 = vld [vmem:[#allocation46_spill] sm:$0xff]  ;;  %v9600_v53 = vld [vmem:[#allocation39_spill] sm:$0xff] }
 0x211   : > { %v8065_v18 = vpop.permute.xlu1 %2104  ;;  %v1545_v31 = vmul.f32 %v8080_v13, %v9597_v28 }
 0x212   : > { %v8067_v43 = vpop.permute.xlu0 %2099  ;;  %3056 = vperm.xlu1 %6727, %v3025_v7   ;;  %v1542_v7 = vmul.f32 %v8080_v13, %v9589_v16  ;;  %v8101_v16 = vld [vmem:[%s9437_s1 + $0x2] ss:$0 sm:$0xff] }
 0x213   : > { %3051 = vperm.xlu0 %6726, %v3024_v19   ;;  %v1645_v39 = vmul.f32 %v8101_v16, %v9603_v10  ;;  %v1644_v10 = vmul.f32 %v8101_v16, %v9605_v59 }
 0x215   : > { %v8071_v25 = vpop.permute.xlu1 %2114 }
 0x216   : > { %v8073_v32 = vpop.permute.xlu0 %2109  ;;  %2225 = vperm.xlu1 %6727, %v2178_v42   ;;  %v9591_v42 = vld [vmem:[#allocation38_spill] sm:$0xff] }
 0x217   : > { %2220 = vperm.xlu0 %6726, %v2177_v2   ;;  %v8092_v2 = vld [vmem:[%s9437_s1] ss:$0 sm:$0xff] }
 0x219   : > { %v8075_v17 = vpop.permute.xlu1 %2637 }
 0x21a   : > { %9588 = vst [vmem:[#allocation43_spill] sm:$0xff] %v8075_v17  ;;  %v8084_v19 = vpop.permute.xlu0 %2632  ;;  %2235 = vperm.xlu1 %6727, %v7967_v20   ;;  %v1441_v17 = vmul.f32 %v8092_v2, %v9591_v42  ;;  %v9593_v20 = vld [vmem:[#allocation53_spill] sm:$0xff]  ;;  %v1442_v42 = vmul.f32 %v8092_v2, %v9596_v11 }
 0x21b   : > { %9590 = vst [vmem:[#allocation9_spill] sm:$0xff] %v8084_v19  ;;  %2230 = vperm.xlu0 %6726, %v7955_v26   ;;  %v1643_v26 = vmul.f32 %v8101_v16, %v9593_v20  ;;  %v2723_v19 = vld [vmem:[%s7005_s14 + $0xef] sm:$0xff]  ;;  %v9598_v20 = vld [vmem:[#allocation14_spill] sm:$0xff] }
 0x21c   : > { %v1554_v33 = vadd.f32 %v1542_v7, %v1441_v17  ;;  %v1744_v57 = vmul.f32 %v8117_v50, %v9598_v20  ;;  %v9601_v11 = vld [vmem:[#allocation41_spill] sm:$0xff]  ;;  %v1444_v20 = vmul.f32 %v8092_v2, %v9604_v22  ;;  %v1555_v23 = vadd.f32 %v1543_v6, %v1442_v42  ;;  %v9607_v22 = vld [vmem:[#allocation60_spill] sm:$0xff] }
 0x21d   : > { %v8108_v30 = vpop.permute.xlu1 %2647  ;;  %v1445_v17 = vmul.f32 %v8092_v2, %v9601_v11  ;;  %v9602_v7 = vld [vmem:[#allocation49_spill] sm:$0xff]  ;;  %v2725_v11 = vld [vmem:[%s7005_s14 + $0xff] sm:$0xff] }
 0x21e   : > { %9595 = vst [vmem:[#allocation34_spill] sm:$0xff] %v8108_v30  ;;  %v8121_v63 = vpop.permute.xlu0 %2642  ;;  %2763 = vperm.xlu1 %6727, %v2724_v14   ;;  %v1443_v30 = vmul.f32 %v8092_v2, %v9600_v53  ;;  %v1546_v28 = vmul.f32 %v8080_v13, %v9602_v7  ;;  %v8137_v14 = vld [vmem:[%s9437_s1 + $0x4] ss:$0 sm:$0xff] }
 0x21f   : > { %9599 = vst [vmem:[#allocation35_spill] sm:$0xff] %v8121_v63  ;;  %2758 = vperm.xlu0 %6726, %v2723_v19   ;;  %v1655_v63 = vadd.f32 %v1643_v26, %v1554_v33  ;;  %v1845_v53 = vmul.f32 %v8137_v14, %v7863_v58  ;;  %v9606_v19 = vld [vmem:[#allocation59_spill] sm:$0xff]  ;;  %v1646_v33 = vmul.f32 %v8101_v16, %v9607_v22  ;;  %v9609_v22 = vld [vmem:[#allocation13_spill] sm:$0xff] }
 0x220   : > { %v1556_v7 = vadd.f32 %v1544_v52, %v1443_v30  ;;  %v1647_v44 = vmul.f32 %v8101_v16, %v9606_v19  ;;  %v1557_v26 = vadd.f32 %v1545_v31, %v1444_v20  ;;  %v8155_v58 = vld [vmem:[%s9437_s1 + $0x5] ss:$0 sm:$0xff]  ;;  %v1558_v52 = vadd.f32 %v1546_v28, %v1445_v17  ;;  %v3122_v17 = vld [vmem:[%s7005_s14 + $0xda] sm:$0xff] }
 0x221   : > { %v8148_v6 = vpop.permute.xlu1 %1816  ;;  %v1756_v42 = vadd.f32 %v1744_v57, %v1655_v63  ;;  %v1946_v59 = vmul.f32 %v8155_v58, %v7946_v35  ;;  %v1745_v63 = vmul.f32 %v8117_v50, %v9609_v22  ;;  %v3123_v31 = vld [vmem:[%s7005_s14 + $0xe2] sm:$0xff]  ;;  %v1748_v57 = vmul.f32 %v8117_v50, %v7791_v29 }
 0x222   : > { %v8159_v30 = vpop.permute.xlu0 %2652  ;;  %2773 = vperm.xlu1 %6727, %v2726_v48   ;;  %v1657_v19 = vadd.f32 %v1645_v39, %v1556_v7  ;;  %v1847_v35 = vmul.f32 %v8137_v14, %v7880_v5  ;;  %v8173_v48 = vld [vmem:[%s9437_s1 + $0x6] ss:$0 sm:$0xff]  ;;  %v1656_v28 = vadd.f32 %v1644_v10, %v1555_v23  ;;  %v1659_v54 = vadd.f32 %v1647_v44, %v1558_v52 }
 0x223   : > { %9608 = vst [vmem:[#allocation36_spill] sm:$0xff] %v8159_v30  ;;  %2768 = vperm.xlu0 %6726, %v2725_v11   ;;  %v1857_v20 = vadd.f32 %v1845_v53, %v1756_v42  ;;  %v2047_v39 = vmul.f32 %v8173_v48, %v8008_v51  ;;  %v1658_v11 = vadd.f32 %v1646_v33, %v1557_v26  ;;  %v8187_v51 = vld [vmem:[%s9437_s1 + $0x7] ss:$0 sm:$0xff]  ;;  %v9658_v30 = vld [vmem:[#allocation32_spill] sm:$0xff] }
 0x224   : > { %v1846_v29 = vmul.f32 %v8137_v14, %v7882_v61  ;;  %v1758_v7 = vadd.f32 %v1746_v55, %v1657_v19  ;;  %v1948_v42 = vmul.f32 %v8155_v58, %v7952_v38  ;;  %v2148_v23 = vmul.f32 %v8187_v51, %v8059_v1  ;;  %v3125_v38 = vld [vmem:[%s7005_s14 + $0xf2] sm:$0xff]  ;;  %v3124_v1 = vld [vmem:[%s7005_s14 + $0xea] sm:$0xff] }
 0x225   : > { %v8180_v53 = vpop.permute.xlu1 %1826  ;;  %v1958_v5 = vadd.f32 %v1946_v59, %v1857_v20  ;;  %v1757_v61 = vadd.f32 %v1745_v63, %v1656_v28  ;;  %v1759_v10 = vadd.f32 %v1747_v3, %v1658_v11  ;;  %v1849_v55 = vmul.f32 %v8137_v14, %v7901_v0  ;;  %v3126_v11 = vld [vmem:[%s7005_s14 + $0xfa] sm:$0xff] }
 0x226   : > { %v8191_v44 = vpop.permute.xlu0 %1821  ;;  %3142 = vperm.xlu1 %6727, %v3123_v31   ;;  %v1947_v33 = vmul.f32 %v8155_v58, %v7943_v49  ;;  %v1760_v26 = vadd.f32 %v1748_v57, %v1659_v54  ;;  %v1859_v59 = vadd.f32 %v1847_v35, %v1758_v7  ;;  %v2049_v19 = vmul.f32 %v8173_v48, %v8015_v45  ;;  %v8212_v45 = vld [vmem:[%s9437_s1 + $0x8] ss:$0 sm:$0xff] }
 0x227   : > { %3137 = vperm.xlu0 %6726, %v3122_v17   ;;  %v2059_v52 = vadd.f32 %v2047_v39, %v1958_v5  ;;  %v1858_v22 = vadd.f32 %v1846_v29, %v1757_v61  ;;  %v1848_v63 = vmul.f32 %v8137_v14, %v7903_v12  ;;  %v1950_v3 = vmul.f32 %v8155_v58, %v7960_v62 }
 0x228   : > { %v2048_v0 = vmul.f32 %v8173_v48, %v8017_v9  ;;  %v1960_v31 = vadd.f32 %v1948_v42, %v1859_v59  ;;  %v2150_v20 = vmul.f32 %v8187_v51, %v8065_v18  ;;  %v1861_v62 = vadd.f32 %v1849_v55, %v1760_v26 }
 0x229   : > { %v2196_v49 = vpop.permute.xlu1 %2195  ;;  %v2160_v57 = vadd.f32 %v2148_v23, %v2059_v52  ;;  %v1959_v39 = vadd.f32 %v1947_v33, %v1858_v22  ;;  %v1949_v9 = vmul.f32 %v8155_v58, %v7950_v41  ;;  %v2149_v17 = vmul.f32 %v8187_v51, %v8067_v43  ;;  %v8231_v43 = vld [vmem:[%s9438_s2] ss:$0 sm:$0xff] }
 0x22a   : > { %v2249_v12 = vmul.f32 %v8212_v45, %v2196_v49  ;;  %v8215_v35 = vpop.permute.xlu0 %1831  ;;  %3152 = vperm.xlu1 %6727, %v3125_v38   ;;  %v2061_v18 = vadd.f32 %v2049_v19, %v1960_v31  ;;  %v2051_v28 = vmul.f32 %v8173_v48, %v8024_v60  ;;  %v1860_v29 = vadd.f32 %v1848_v63, %v1759_v10 }
 0x22b   : > { %3147 = vperm.xlu0 %6726, %v3124_v1   ;;  %v1962_v7 = vadd.f32 %v1950_v3, %v1861_v62  ;;  %v2060_v5 = vadd.f32 %v2048_v0, %v1959_v39  ;;  %v2050_v42 = vmul.f32 %v8173_v48, %v8026_v36  ;;  %v2152_v41 = vmul.f32 %v8187_v51, %v8071_v25  ;;  %v2826_v25 = vld [vmem:[%s7005_s14 + $0x100] sm:$0xff]  ;;  %v2827_v62 = vld [vmem:[%s7005_s14 + $0x108] sm:$0xff] }
 0x22c   : > { %v2261_v54 = vadd.f32 %v2249_v12, %v2160_v57  ;;  %v2162_v61 = vadd.f32 %v2150_v20, %v2061_v18  ;;  %v1961_v33 = vadd.f32 %v1949_v9, %v1860_v29  ;;  %v2151_v36 = vmul.f32 %v8187_v51, %v8073_v32  ;;  %v8256_v29 = vld [vmem:[%s7005_s14 + $0x110] sm:$0xff] }
 0x22d   : > { %v2206_v23 = vpop.permute.xlu1 %2205  ;;  %v2161_v38 = vadd.f32 %v2149_v17, %v2060_v5  ;;  %v2063_v59 = vadd.f32 %v2051_v28, %v1962_v7 }
 0x22e   : > { %v2280_v60 = vadd.f32 %v8231_v43, %v2261_v54  ;;  %v2251_v10 = vmul.f32 %v8212_v45, %v2206_v23  ;;  %v2201_v55 = vpop.permute.xlu0 %2200  ;;  %2859 = vperm.xlu1 %6727, %v8013_v46   ;;  %v2062_v1 = vadd.f32 %v2050_v42, %v1961_v33 }
 0x22f   : > { %v2250_v26 = vmul.f32 %v8212_v45, %v2201_v55  ;;  %3157 = vperm.xlu0 %6726, %v3126_v11   ;;  %v2164_v3 = vadd.f32 %v2152_v41, %v2063_v59 }
 0x230   : > { %v2292_v52 = vmax.f32 %v2280_v60, 0.0  ;;  %v2263_v19 = vadd.f32 %v2251_v10, %v2162_v61  ;;  %v2163_v32 = vadd.f32 %v2151_v36, %v2062_v1 }
 0x231   : > { %v2262_v22 = vadd.f32 %v2250_v26, %v2161_v38  ;;  %v2216_v63 = vpop.permute.xlu1 %2215  ;;  %v3026_v26 = vld [vmem:[%s7005_s14 + $0x101] sm:$0xff] }
 0x232   : > { %2304 = vst.msk [vmem:[#allocation2 + $0x6a] sm:$0xff] %vm385_vm0, %v2292_v52  ;;  %v2282_v46 = vadd.f32 %v8231_v43, %v2263_v19  ;;  %v2253_v0 = vmul.f32 %v8212_v45, %v2216_v63  ;;  %v2211_v49 = vpop.permute.xlu0 %2210  ;;  %2869 = vperm.xlu1 %6727, %v2826_v25   ;;  %v3028_v19 = vld [vmem:[%s7005_s14 + $0x111] sm:$0xff]  ;;  %v3027_v63 = vld [vmem:[%s7005_s14 + $0x109] sm:$0xff] }
 0x233   : > { %v2281_v31 = vadd.f32 %v8231_v43, %v2262_v22  ;;  %v2252_v57 = vmul.f32 %v8212_v45, %v2211_v49  ;;  %2864 = vperm.xlu0 %6726, %v8022_v27  }
 0x234   : > { %v2294_v20 = vmax.f32 %v2282_v46, 0.0  ;;  %v2265_v12 = vadd.f32 %v2253_v0, %v2164_v3 }
 0x235   : > { %v2293_v39 = vmax.f32 %v2281_v31, 0.0  ;;  %v2264_v9 = vadd.f32 %v2252_v57, %v2163_v32  ;;  %v8247_v17 = vpop.permute.xlu1 %2738  ;;  %v3127_v57 = vld [vmem:[%s7005_s14 + $0x102] sm:$0xff] }
 0x236   : > { %2306 = vst.msk [vmem:[#allocation2 + $0x7a] sm:$0xff] %vm385_vm0, %v2294_v20  ;;  %v2284_v18 = vadd.f32 %v8231_v43, %v2265_v12  ;;  %v8251_v28 = vpop.permute.xlu0 %2733  ;;  %2960 = vperm.xlu1 %6727, %v2826_v25   ;;  %v8271_v25 = vld [vmem:[%s7005_s14 + $0x118] sm:$0xff] }
 0x237   : > { %2305 = vst.msk [vmem:[#allocation2 + $0x72] sm:$0xff] %vm385_vm0, %v2293_v39  ;;  %v2283_v54 = vadd.f32 %v8231_v43, %v2264_v9  ;;  %2874 = vperm.xlu0 %6726, %v2827_v62   ;;  %v3737_v27 = vpop.f32.mrb[0].mxu0  ;;  %v3029_v20 = vld [vmem:[%s7005_s14 + $0x119] sm:$0xff] }
 0x238   : > { %v3837_v11 = vpop.f32.mrb[0].mxu1  ;;  %v2296_v7 = vmax.f32 %v2284_v18, 0.0  ;;  %v6333_v42 = vpop.f32.mrb[1].mxu0  ;;  %v3129_v9 = vld [vmem:[%s7005_s14 + $0x112] sm:$0xff]  ;;  %v3128_v18 = vld [vmem:[%s7005_s14 + $0x10a] sm:$0xff] }
 0x239   : > { %v8258_v5 = vadd.f32 %v3837_v11, %v3737_v27  ;;  %v6357_v23 = vpop.f32.mrb[1].mxu1  ;;  %v2295_v61 = vmax.f32 %v2283_v54, 0.0  ;;  %v8260_v41 = vpop.permute.xlu1 %2748  ;;  %v2323_v11 = vld [vmem:[%s7005_s14 + $0xfc] sm:$0xff] }
 0x23a   : > { %9611 = vst [vmem:[#allocation48_spill] sm:$0xff] %v8260_v41  ;;  %v3740_v60 = vpop.f32.mrb[2].mxu0  ;;  %2308 = vst.msk [vmem:[#allocation2 + $0x8a] sm:$0xff] %vm385_vm0, %v2296_v7  ;;  %v3840_v10 = vpop.f32.mrb[2].mxu1  ;;  %2970 = vperm.xlu1 %6727, %v8256_v29   ;;  %v3130_v7 = vld [vmem:[%s7005_s14 + $0x11a] sm:$0xff] }
 0x23b   : > { %9610 = vst [vmem:[#allocation37_spill] sm:$0xff] %v8258_v5  ;;  %v8263_v55 = vpop.permute.xlu0 %2743  ;;  %2307 = vst.msk [vmem:[#allocation2 + $0x82] sm:$0xff] %vm385_vm0, %v2295_v61  ;;  %v8267_v33 = vadd.f32 %v3840_v10, %v3740_v60  ;;  %v6334_v38 = vpop.f32.mrb[3].mxu0  ;;  %2965 = vperm.xlu0 %6726, %v2827_v62   ;;  %v3661_v23 = vld [vmem:[#allocation3 + $0x21] sm:$0xff] }
 0x23c   : > { %v6358_v36 = vpop.f32.mrb[3].mxu1  ;;  %v3642_v10 = vld [vmem:[#allocation3 + $0x20] sm:$0xff]  ;;  %v6734_v5 = vld [vmem:[%s9439_s3 + $0x28] sm:$0xff]  }
 0x23d   : > { %9612 = vst [vmem:[#allocation50_spill] sm:$0xff] %v8267_v33  ;;  %v8273_v59 = vpop.permute.xlu1 %1917  ;;  %v3382_v33 = vld [vmem:[%s7005_s14 + $0x121] sm:$0xff] }
 0x23e   : > { %3061 = vperm.xlu1 %6727, %v3026_v26   ;;  %v3579_v1 = vld [vmem:[#allocation2 + $0x6c] ss:$2 sm:$0xff]  ;;  %v3581_v22 = vld [vmem:[#allocation2 + $0x6d] ss:$2 sm:$0xff] }
 0x23f   : > { %v8275_v52 = vpop.permute.xlu0 %2753  ;;  %2975 = vperm.xlu0 %6726, %v8271_v25   ;;  %v3582_v32 = vmax.f32 %v3579_v1, %v3581_v22  ;;  %v2324_v1 = vld [vmem:[%s7005_s14 + $0x104] sm:$0xff] }
 0x240   : > { %9613 = vst [vmem:[#allocation61_spill] sm:$0xff] %v8275_v52 }
 0x241   : > { %v8280_v3 = vpop.permute.xlu1 %1927 }
 0x242   : > { %v3584_v46 = vld [vmem:[#allocation2 + $0x7e] ss:$2 sm:$0xff]  ;;  %v3586_v0 = vld [vmem:[#allocation2 + $0x7f] ss:$2 sm:$0xff]  ;;  %3071 = vperm.xlu1 %6727, %v3028_v19  }
 0x243   : > { %v8282_v49 = vpop.permute.xlu0 %1922  ;;  %v3587_v31 = vmax.f32 %v3584_v46, %v3586_v0  ;;  %3066 = vperm.xlu0 %6726, %v3027_v63   ;;  %v2424_v19 = vld [vmem:[%s7005_s14 + $0xfd] sm:$0xff]  ;;  %v3266_v46 = vld [vmem:[%s7005_s14 + $0x10e] sm:$0xff]  ;;  %v2425_v0 = vld [vmem:[%s7005_s14 + $0x105] sm:$0xff] }
 0x245   : > { %v3588_v12 = vmax.f32 %v3582_v32, %v3587_v31  ;;  %v8286_v62 = vpop.permute.xlu1 %2354 }
 0x246   : > { %9614 = vst [vmem:[#allocation62_spill] sm:$0xff] %v8286_v62  ;;  %3162 = vperm.xlu1 %6727, %v3127_v57   ;;  %v3295_v57 = vld [vmem:[%s7005_s14 + $0x10f] sm:$0xff] }
 0x247   : > { %v8288_v39 = vpop.permute.xlu0 %1932  ;;  %3589 = vst.msk [vmem:[#allocation3 + $0x29] sm:$0xff] %vm385_vm0, %v3588_v12  ;;  %3076 = vperm.xlu0 %6726, %v3029_v20   ;;  %v3267_v20 = vld [vmem:[%s7005_s14 + $0x116] sm:$0xff] }
 0x249   : > { %v8293_v54 = vpop.permute.xlu1 %2364 }
 0x24a   : > { %9615 = vst [vmem:[#allocation52_spill] sm:$0xff] %v8293_v54  ;;  %3172 = vperm.xlu1 %6727, %v3129_v9   ;;  %v1547_v54 = vmul.f32 %v8080_v13, %v7932_v24  ;;  %v1446_v24 = vmul.f32 %v8092_v2, %v7915_v8  ;;  %v9639_v8 = vld [vmem:[#allocation22_spill] sm:$0xff] }
 0x24b   : > { %v8295_v27 = vpop.permute.xlu0 %2359  ;;  %3167 = vperm.xlu0 %6726, %v3128_v18   ;;  %v3296_v18 = vld [vmem:[%s7005_s14 + $0x117] sm:$0xff] }
 0x24c   : > { %9616 = vst [vmem:[#allocation56_spill] sm:$0xff] %v8295_v27 }
 0x24d   : > { %v8299_v42 = vpop.permute.xlu1 %2455 }
 0x24e   : > { %9617 = vst [vmem:[#allocation51_spill] sm:$0xff] %v8299_v42  ;;  %2374 = vperm.xlu1 %6727, %v2323_v11   ;;  %v3662_v60 = vld [vmem:[#allocation3 + $0x29] sm:$0xff] }
 0x24f   : > { %v8301_v61 = vpop.permute.xlu0 %2369  ;;  %v3643_v38 = vld [vmem:[#allocation3 + $0x28] sm:$0xff]  ;;  %3177 = vperm.xlu0 %6726, %v3130_v7   ;;  %v3669_v36 = vpack.c.bf16 %v3662_v60, %v3661_v23 }
 0x250   : > { %9618 = vst [vmem:[#allocation55_spill] sm:$0xff] %v8301_v61  ;;  %v3650_v26 = vpack.c.bf16 %v3643_v38, %v3642_v10 }
 0x251   : > { %6340 = vmatmul.mubr.msk.bf16.gmra.mrb[8].mxu0 %vm385_vm0, %v3669_v36  ;;  %v8307_v22 = vpop.permute.xlu1 %2465  ;;  %v3353_v36 = vld [vmem:[%s7005_s14 + $0x120] sm:$0xff] }
 0x252   : > { %6364 = vmatmul.mubr.msk.bf16.gmra.mrb[8].mxu1 %vm385_vm0, %v3650_v26  ;;  %9619 = vst [vmem:[#allocation45_spill] sm:$0xff] %v8307_v22  ;;  %2475 = vperm.xlu1 %6727, %v2424_v19   ;;  %v3354_v19 = vld [vmem:[%s7005_s14 + $0x128] sm:$0xff] }
 0x253   : > { %v8309_v63 = vpop.permute.xlu0 %2460  ;;  %6343 = vmatprep.mubr.msk.bf16.mxu0 %vm6890_vm1, %v9566_v15  ;;  %2379 = vperm.xlu0 %6726, %v2324_v1  }
 0x254   : > { %9620 = vst [vmem:[#allocation38_spill] sm:$0xff] %v8309_v63  ;;  %6367 = vmatprep.mubr.msk.bf16.mxu1 %vm6890_vm1, %v9566_v15 }
 0x255   : > { %v8317_v32 = vpop.permute.xlu1 %2834 }
 0x256   : > { %9621 = vst [vmem:[#allocation44_spill] sm:$0xff] %v8317_v32  ;;  %3272 = vperm.xlu1 %6727, %v3266_v46  }
 0x257   : > { %v8319_v31 = vpop.permute.xlu0 %2470  ;;  %2480 = vperm.xlu0 %6726, %v2425_v0  }
 0x258   : > { %9622 = vst [vmem:[#allocation53_spill] sm:$0xff] %v8319_v31  ;;  %v1548_v31 = vmul.f32 %v8080_v13, %v7930_v21  ;;  %v8419_v21 = vld [vmem:[%s9437_s1 + $0x1] ss:$0 sm:$0xff] }
 0x259   : > { %v8323_v12 = vpop.permute.xlu1 %2844  ;;  %9636 = vst [vmem:[#allocation64_spill] sm:$0xff] %v8419_v21 }
 0x25a   : > { %9623 = vst [vmem:[#allocation47_spill] sm:$0xff] %v8323_v12  ;;  %3301 = vperm.xlu1 %6727, %v3295_v57  }
 0x25b   : > { %v8325_v9 = vpop.permute.xlu0 %2839  ;;  %3277 = vperm.xlu0 %6726, %v3267_v20  }
 0x25d   : > { %v8328_v11 = vpop.permute.xlu1 %2854 }
 0x25e   : > { %9624 = vst [vmem:[#allocation40_spill] sm:$0xff] %v8328_v11  ;;  %2576 = vperm.xlu1 %6727, %v8041_v37   ;;  %v9642_v11 = vld [vmem:[#allocation15_spill] sm:$0xff] }
 0x25f   : > { %v8330_v7 = vpop.permute.xlu0 %2849  ;;  %3306 = vperm.xlu0 %6726, %v3296_v18  }
 0x260   : > { %9625 = vst [vmem:[#allocation46_spill] sm:$0xff] %v8330_v7 }
 0x261   : > { %v8333_v23 = vpop.permute.xlu1 %2023 }
 0x262   : > { %3330 = vperm.xlu1 %6727, %v8256_v29  }
 0x263   : > { %v8335_v60 = vpop.permute.xlu0 %2018  ;;  %2581 = vperm.xlu0 %6726, %v8050_v56   ;;  %v6732_v56 = vld [vmem:[%s9439_s3 + $0x20] sm:$0xff]  }
 0x264   : > { %6376 = vmatpush3.bf16.msra.mxu0 %v6732_v56  ;;  %v8374_v56 = vld [vmem:[%s7005_s14 + $0x129] sm:$0xff] }
 0x265   : > { %v8339_v10 = vpop.permute.xlu1 %2033  ;;  %6377 = vmatprep.subr.bf16.mxu0 %v9566_v15 }
 0x266   : > { %2677 = vperm.xlu1 %6727, %v3266_v46   ;;  %v6733_v46 = vld [vmem:[%s9439_s3 + $0x30] sm:$0xff]  }
 0x267   : > { %v8341_v38 = vpop.permute.xlu0 %2028  ;;  %3335 = vperm.xlu0 %6726, %v8271_v25   ;;  %6400 = vmatpush3.bf16.msra.mxu1 %v6733_v46 }
 0x268   : > { %6401 = vmatprep.subr.bf16.mxu1 %v9566_v15  ;;  %6378 = vmatpush3.bf16.msra.mxu0 %v6734_v5 }
 0x269   : > { %v8345_v26 = vpop.permute.xlu1 %2561  ;;  %6423 = vmatprep.subr.bf16.mxu0 %v9566_v15 }
 0x26a   : > { %9626 = vst [vmem:[#allocation14_spill] sm:$0xff] %v8345_v26  ;;  %3359 = vperm.xlu1 %6727, %v3353_v36  }
 0x26b   : > { %v8347_v37 = vpop.permute.xlu0 %2556  ;;  %2682 = vperm.xlu0 %6726, %v3267_v20  }
 0x26c   : > { %9627 = vst [vmem:[#allocation39_spill] sm:$0xff] %v8347_v37  ;;  %v1549_v37 = vmul.f32 %v8080_v13, %v7939_v34 }
 0x26d   : > { %v8350_v1 = vpop.permute.xlu1 %2571 }
 0x26e   : > { %9628 = vst [vmem:[#allocation41_spill] sm:$0xff] %v8350_v1  ;;  %2778 = vperm.xlu1 %6727, %v3295_v57   ;;  %v6735_v1 = vld [vmem:[%s9439_s3 + $0x38] sm:$0xff]  }
 0x26f   : > { %v8358_v0 = vpop.permute.xlu0 %2566  ;;  %3364 = vperm.xlu0 %6726, %v3354_v19   ;;  %6402 = vmatpush3.bf16.msra.mxu1 %v6735_v1  ;;  %v8394_v1 = vld [vmem:[%s7005_s14 + $0x12a] sm:$0xff] }
 0x270   : > { %9629 = vst [vmem:[#allocation49_spill] sm:$0xff] %v8358_v0  ;;  %6447 = vmatprep.subr.bf16.mxu1 %v9566_v15  ;;  %v8385_v0 = vld [vmem:[%s7005_s14 + $0x122] sm:$0xff] }
 0x271   : > { %v8362_v20 = vpop.permute.xlu1 %2940 }
 0x272   : > { %9630 = vst [vmem:[#allocation57_spill] sm:$0xff] %v8362_v20  ;;  %3388 = vperm.xlu1 %6727, %v3382_v33  }
 0x273   : > { %v8371_v57 = vpop.permute.xlu0 %2935  ;;  %2783 = vperm.xlu0 %6726, %v3296_v18  }
 0x274   : > { %9631 = vst [vmem:[#allocation42_spill] sm:$0xff] %v8371_v57  ;;  %v9652_v57 = vld [vmem:[#allocation30_spill] sm:$0xff] }
 0x275   : > { %v8377_v46 = vpop.permute.xlu1 %2950 }
 0x276   : > { %9632 = vst [vmem:[#allocation58_spill] sm:$0xff] %v8377_v46  ;;  %2879 = vperm.xlu1 %6727, %v8256_v29   ;;  %v3440_v29 = vld [vmem:[%s7005_s14 + $0x132] sm:$0xff] }
 0x277   : > { %v8380_v61 = vpop.permute.xlu0 %2945  ;;  %3393 = vperm.xlu0 %6726, %v8374_v56  }
 0x278   : > { %9633 = vst [vmem:[#allocation59_spill] sm:$0xff] %v8380_v61  ;;  %v9643_v61 = vld [vmem:[#allocation23_spill] sm:$0xff] }
 0x279   : > { %v8387_v18 = vpop.permute.xlu1 %2119 }
 0x27a   : > { %3417 = vperm.xlu1 %6727, %v8385_v0  }
 0x27b   : > { %v8389_v5 = vpop.permute.xlu0 %2955  ;;  %2884 = vperm.xlu0 %6726, %v8271_v25   ;;  %v1550_v25 = vmul.f32 %v8080_v13, %v7937_v4  ;;  %v1449_v4 = vmul.f32 %v8092_v2, %v7921_v40  ;;  %v8430_v13 = vld [vmem:[%s9437_s1] ss:$0 sm:$0xff] }
 0x27c   : > { %9634 = vst [vmem:[#allocation60_spill] sm:$0xff] %v8389_v5  ;;  %v2493_v5 = vmul.f32 %v8419_v21, %v9639_v8  ;;  %v2393_v46 = vmul.f32 %v8430_v13, %v9642_v11  ;;  %v9647_v11 = vld [vmem:[#allocation16_spill] sm:$0xff] }
 0x27d   : > { %v8396_v26 = vpop.permute.xlu1 %2129  ;;  %v1562_v22 = vadd.f32 %v1550_v25, %v1449_v4  ;;  %v3469_v25 = vld [vmem:[%s7005_s14 + $0x133] sm:$0xff]  ;;  %v9646_v4 = vld [vmem:[#allocation27_spill] sm:$0xff]  ;;  %v1648_v8 = vmul.f32 %v8101_v16, %v9647_v11 }
 0x27e   : > { %2980 = vperm.xlu1 %6727, %v3353_v36   ;;  %v1447_v36 = vmul.f32 %v8092_v2, %v7913_v47  ;;  %v3441_v47 = vld [vmem:[%s7005_s14 + $0x13a] sm:$0xff] }
 0x27f   : > { %v8398_v15 = vpop.permute.xlu0 %2124  ;;  %3422 = vperm.xlu0 %6726, %v8394_v1  }
 0x281   : > { %v8404_v27 = vpop.permute.xlu1 %2657 }
 0x282   : > { %9635 = vst [vmem:[#allocation13_spill] sm:$0xff] %v8404_v27  ;;  %3446 = vperm.xlu1 %6727, %v3440_v29   ;;  %v9637_v27 = vld [vmem:[#allocation10_spill] sm:$0xff]  ;;  %v1560_v29 = vadd.f32 %v1548_v31, %v1447_v36  ;;  %v2492_v31 = vmul.f32 %v8419_v21, %v9643_v61  ;;  %v9644_v36 = vld [vmem:[#allocation24_spill] sm:$0xff]  ;;  %v9648_v61 = vld [vmem:[#allocation29_spill] sm:$0xff] }
 0x283   : > { %v8412_v62 = vpop.permute.xlu0 %2134  ;;  %2985 = vperm.xlu0 %6726, %v3354_v19   ;;  %v1448_v34 = vmul.f32 %v8092_v2, %v9637_v27  ;;  %v1559_v19 = vadd.f32 %v1547_v54, %v1446_v24  ;;  %v9641_v2 = vld [vmem:[#allocation11_spill] sm:$0xff]  ;;  %v2495_v54 = vmul.f32 %v8419_v21, %v9644_v36  ;;  %v9649_v36 = vld [vmem:[#allocation20_spill] sm:$0xff] }
 0x284   : > { %v2391_v27 = vmul.f32 %v8430_v13, %v9641_v2  ;;  %v1649_v2 = vmul.f32 %v8101_v16, %v9648_v61  ;;  %v9655_v61 = vld [vmem:[#allocation31_spill] sm:$0xff] }
 0x285   : > { %v8433_v63 = vpop.permute.xlu1 %2667  ;;  %v1561_v42 = vadd.f32 %v1549_v37, %v1448_v34  ;;  %v8450_v37 = vld [vmem:[%s9437_s1 + $0x2] ss:$0 sm:$0xff]  ;;  %v2494_v34 = vmul.f32 %v8419_v21, %v9646_v4  ;;  %v9654_v4 = vld [vmem:[#allocation21_spill] sm:$0xff] }
 0x286   : > { %9638 = vst [vmem:[#allocation10_spill] sm:$0xff] %v8433_v63  ;;  %3081 = vperm.xlu1 %6727, %v3382_v33   ;;  %v9645_v33 = vld [vmem:[#allocation12_spill] sm:$0xff]  ;;  %v9650_v63 = vld [vmem:[#allocation18_spill] sm:$0xff]  ;;  %v2395_v11 = vmul.f32 %v8430_v13, %v9654_v4  ;;  %v2594_v41 = vmul.f32 %v8450_v37, %v9655_v61  ;;  %v1661_v4 = vadd.f32 %v1649_v2, %v1560_v29 }
 0x287   : > { %v8437_v40 = vpop.permute.xlu0 %2662  ;;  %3451 = vperm.xlu0 %6726, %v3441_v47   ;;  %v2392_v24 = vmul.f32 %v8430_v13, %v9645_v33  ;;  %v2496_v52 = vmul.f32 %v8419_v21, %v9650_v63  ;;  %v9651_v47 = vld [vmem:[#allocation25_spill] sm:$0xff]  ;;  %v1651_v33 = vmul.f32 %v8101_v16, %v9652_v57  ;;  %v9659_v57 = vld [vmem:[#allocation19_spill] sm:$0xff]  ;;  %v1851_v61 = vmul.f32 %v8137_v14, %v8191_v44 }
 0x288   : > { %9640 = vst [vmem:[#allocation22_spill] sm:$0xff] %v8437_v40  ;;  %v2394_v40 = vmul.f32 %v8430_v13, %v9649_v36  ;;  %v1650_v7 = vmul.f32 %v8101_v16, %v9651_v47  ;;  %v9656_v36 = vld [vmem:[#allocation26_spill] sm:$0xff]  ;;  %v2504_v47 = vadd.f32 %v2492_v31, %v2391_v27  ;;  %v2593_v16 = vmul.f32 %v8450_v37, %v9658_v30 }
 0x289   : > { %v8469_v12 = vpop.permute.xlu1 %3036  ;;  %v2505_v20 = vadd.f32 %v2493_v5, %v2392_v24  ;;  %v1750_v32 = vmul.f32 %v8117_v50, %v9656_v36  ;;  %v8484_v5 = vadd.f32 %v2494_v34, %v2393_v46  ;;  %v1660_v24 = vadd.f32 %v1648_v8, %v1559_v19  ;;  %v3470_v36 = vld [vmem:[%s7005_s14 + $0x13b] sm:$0xff]  ;;  %v9660_v46 = vld [vmem:[#allocation28_spill] sm:$0xff] }
 0x28a   : > { %9653 = vst [vmem:[#allocation11_spill] sm:$0xff] %v8469_v12  ;;  %3475 = vperm.xlu1 %6727, %v3469_v25   ;;  %v2507_v21 = vadd.f32 %v2495_v54, %v2394_v40  ;;  %v1749_v12 = vmul.f32 %v8117_v50, %v9659_v57  ;;  %v1662_v40 = vadd.f32 %v1650_v7, %v1561_v42  ;;  %v9662_v7 = vld [vmem:[#allocation33_spill] sm:$0xff]  ;;  %v9663_v34 = vld [vmem:[#allocation54_spill] sm:$0xff] }
 0x28b   : > { %v8477_v63 = vpop.permute.xlu0 %2672  ;;  %3086 = vperm.xlu0 %6726, %v8374_v56   ;;  %v1663_v27 = vadd.f32 %v1651_v33, %v1562_v22  ;;  %v1850_v30 = vmul.f32 %v8137_v14, %v8148_v6  ;;  %v8495_v54 = vadd.f32 %v2594_v41, %v2505_v20  ;;  %v1762_v56 = vadd.f32 %v1750_v32, %v1661_v4  ;;  %v9661_v22 = vld [vmem:[#allocation17_spill] sm:$0xff] }
 0x28c   : > { %9657 = vst [vmem:[#allocation15_spill] sm:$0xff] %v8477_v63  ;;  %v8489_v63 = vadd.f32 %v2496_v52, %v2395_v11  ;;  %v1752_v29 = vmul.f32 %v8117_v50, %v9660_v46  ;;  %v1952_v44 = vmul.f32 %v8155_v58, %v8282_v49  ;;  %v8504_v52 = vadd.f32 %v2593_v16, %v2504_v47  ;;  %v3498_v32 = vld [vmem:[%s7005_s14 + $0x134] sm:$0xff] }
 0x28d   : > { %v8493_v31 = vpop.permute.xlu1 %3046  ;;  %v1761_v42 = vadd.f32 %v1749_v12, %v1660_v24  ;;  %v1751_v6 = vmul.f32 %v8117_v50, %v9661_v22  ;;  %v1951_v41 = vmul.f32 %v8155_v58, %v8273_v59  ;;  %v2596_v20 = vmul.f32 %v8450_v37, %v9662_v7  ;;  %v723_v7 = vld [vmem:[%s7005_s14 + $0x6a] sm:$0x3] }
 0x28e   : > { %3182 = vperm.xlu1 %6727, %v8385_v0   ;;  %v1863_v25 = vadd.f32 %v1851_v61, %v1762_v56  ;;  %v1853_v49 = vmul.f32 %v8137_v14, %v8215_v35  ;;  %v2053_v0 = vmul.f32 %v8173_v48, %v8333_v23  ;;  %v2595_v12 = vmul.f32 %v8450_v37, %v9663_v34  ;;  %v3499_v61 = vld [vmem:[%s7005_s14 + $0x13c] sm:$0xff] }
 0x28f   : > { %v8501_v19 = vpop.permute.xlu0 %3041  ;;  %3480 = vperm.xlu0 %6726, %v3470_v36   ;;  %v1862_v50 = vadd.f32 %v1850_v30, %v1761_v42  ;;  %v1852_v59 = vmul.f32 %v8137_v14, %v8180_v53  ;;  %v2052_v8 = vmul.f32 %v8173_v48, %v8335_v60  ;;  %v1764_v33 = vadd.f32 %v1752_v29, %v1663_v27  ;;  %v622_v60 = vld [vmem:[%s7005_s14 + $0x5a] sm:$0x3]  ;;  %v9664_v36 = vld [vmem:[#allocation63_spill] sm:$0xff] }
 0x290   : > { %v1964_v11 = vadd.f32 %v1952_v44, %v1863_v25  ;;  %v1954_v35 = vmul.f32 %v8155_v58, %v8288_v39  ;;  %v2154_v23 = vmul.f32 %v8187_v51, %v8398_v15  ;;  %v1763_v16 = vadd.f32 %v1751_v6, %v1662_v40  ;;  %v9665_v6 = vld [vmem:[#allocation43_spill] sm:$0xff]  ;;  %v9666_v25 = vld [vmem:[#allocation9_spill] sm:$0xff]  ;;  %v9667_v34 = vld [vmem:[#allocation34_spill] sm:$0xff] }
 0x291   : > { %v8523_v2 = vpop.permute.xlu1 %3056  ;;  %v1963_v57 = vadd.f32 %v1951_v41, %v1862_v50  ;;  %v1953_v14 = vmul.f32 %v8155_v58, %v8280_v3  ;;  %v2153_v53 = vmul.f32 %v8187_v51, %v8387_v18  ;;  %v2608_v24 = vadd.f32 %v2596_v20, %v2507_v21  ;;  %v8545_v58 = vld [vmem:[%s9437_s1 + $0x3] ss:$0 sm:$0xff] }
 0x292   : > { %3504 = vperm.xlu1 %6727, %v3498_v32   ;;  %v1865_v4 = vadd.f32 %v1853_v49, %v1764_v33  ;;  %v2065_v39 = vadd.f32 %v2053_v0, %v1964_v11  ;;  %v2055_v15 = vmul.f32 %v8173_v48, %v8339_v10  ;;  %v2597_v40 = vmul.f32 %v8450_v37, %v9664_v36  ;;  %v9668_v33 = vld [vmem:[#allocation35_spill] sm:$0xff] }
 0x293   : > { %v8529_v47 = vpop.permute.xlu0 %3051  ;;  %3187 = vperm.xlu0 %6726, %v8394_v1   ;;  %v1864_v3 = vadd.f32 %v1852_v59, %v1763_v16  ;;  %v2064_v18 = vadd.f32 %v2052_v8, %v1963_v57  ;;  %v2054_v1 = vmul.f32 %v8173_v48, %v8341_v38  ;;  %v2156_v10 = vmul.f32 %v8187_v51, %v8412_v62  ;;  %v824_v48 = vld [vmem:[%s7005_s14 + $0x6b] sm:$0x3]  ;;  %v1026_v57 = vld [vmem:[%s7005_s14 + $0x7c] sm:$0x3] }
 0x294   : > { %v1966_v27 = vadd.f32 %v1954_v35, %v1865_v4  ;;  %v2166_v30 = vadd.f32 %v2154_v23, %v2065_v39  ;;  %v2155_v42 = vmul.f32 %v8187_v51, %v8396_v26  ;;  %v2607_v38 = vadd.f32 %v2595_v12, %v8484_v5  ;;  %v8568_v51 = vld [vmem:[%s9437_s1 + $0x4] ss:$0 sm:$0xff] }
 0x295   : > { %v2226_v21 = vpop.permute.xlu1 %2225  ;;  %v1965_v29 = vadd.f32 %v1953_v14, %v1864_v3  ;;  %v2165_v44 = vadd.f32 %v2153_v53, %v2064_v18  ;;  %v2695_v41 = vmul.f32 %v8545_v58, %v9665_v6  ;;  %v8561_v20 = vadd.f32 %v2597_v40, %v8489_v63 }
 0x296   : > { %v2255_v56 = vmul.f32 %v8212_v45, %v2226_v21  ;;  %681 = vperm.xlu1 %6727, %v622_v60   ;;  %v2067_v32 = vadd.f32 %v2055_v15, %v1966_v27  ;;  %v2694_v49 = vmul.f32 %v8545_v58, %v9666_v25  ;;  %v2697_v12 = vmul.f32 %v8545_v58, %v9667_v34  ;;  %v8585_v60 = vld [vmem:[%s9437_s1 + $0x5] ss:$0 sm:$0xff]  ;;  %v925_v15 = vld [vmem:[%s7005_s14 + $0x6c] sm:$0x3] }
 0x297   : > { %v2221_v46 = vpop.permute.xlu0 %2220  ;;  %3509 = vperm.xlu0 %6726, %v3499_v61   ;;  %v2066_v26 = vadd.f32 %v2054_v1, %v1965_v29  ;;  %v2696_v11 = vmul.f32 %v8545_v58, %v9668_v33  ;;  %v2707_v14 = vadd.f32 %v2695_v41, %v8495_v54  ;;  %v2796_v53 = vmul.f32 %v8568_v51, %v8247_v17  ;;  %v8594_v54 = vld [vmem:[%s9437_s1 + $0x6] ss:$0 sm:$0xff]  ;;  %v9669_v27 = vld [vmem:[#allocation36_spill] sm:$0xff] }
 0x298   : > { %v2254_v22 = vmul.f32 %v8212_v45, %v2221_v46  ;;  %v2267_v62 = vadd.f32 %v2255_v56, %v2166_v30  ;;  %v2168_v50 = vadd.f32 %v2156_v10, %v2067_v32  ;;  %v2706_v61 = vadd.f32 %v2694_v49, %v8504_v52  ;;  %v9670_v10 = vld [vmem:[#allocation44_spill] sm:$0xff]  ;;  %v9673_v41 = vld [vmem:[#allocation47_spill] sm:$0xff]  ;;  %v9674_v32 = vld [vmem:[#allocation42_spill] sm:$0xff] }
 0x299   : > { %v2236_v0 = vpop.permute.xlu1 %2235  ;;  %v2167_v35 = vadd.f32 %v2155_v42, %v2066_v26  ;;  %v2709_v3 = vadd.f32 %v2697_v12, %v2608_v24  ;;  %v2797_v18 = vmul.f32 %v8568_v51, %v8263_v55  ;;  %v2897_v52 = vmul.f32 %v8585_v60, %v8325_v9  ;;  %v1228_v9 = vld [vmem:[%s7005_s14 + $0x7e] sm:$0x3]  ;;  %v9671_v46 = vld [vmem:[#allocation48_spill] sm:$0xff] }
 0x29a   : > { %v2266_v5 = vadd.f32 %v2254_v22, %v2165_v44  ;;  %v2286_v63 = vadd.f32 %v8231_v43, %v2267_v62  ;;  %v2257_v59 = vmul.f32 %v8212_v45, %v2236_v0  ;;  %883 = vperm.xlu1 %6727, %v824_v48   ;;  %v2708_v21 = vadd.f32 %v2696_v11, %v2607_v38  ;;  %v9672_v44 = vld [vmem:[#allocation57_spill] sm:$0xff]  ;;  %v8620_v22 = vld [vmem:[%s9437_s1 + $0x7] ss:$0 sm:$0xff]  ;;  %v1127_v38 = vld [vmem:[%s7005_s14 + $0x7d] sm:$0x3] }
 0x29b   : > { %v2231_v8 = vpop.permute.xlu0 %2230  ;;  %782 = vperm.xlu0 %6726, %v723_v7   ;;  %v2698_v30 = vmul.f32 %v8545_v58, %v9669_v27  ;;  %v2896_v24 = vmul.f32 %v8585_v60, %v9670_v10  ;;  %v2808_v56 = vadd.f32 %v2796_v53, %v2707_v14  ;;  %v2798_v29 = vmul.f32 %v8568_v51, %v9671_v46  ;;  %v9678_v11 = vld [vmem:[#allocation11_spill] sm:$0xff]  ;;  %v9679_v53 = vld [vmem:[#allocation58_spill] sm:$0xff] }
 0x29c   : > { %v2285_v23 = vadd.f32 %v8231_v43, %v2266_v5  ;;  %v2256_v16 = vmul.f32 %v8212_v45, %v2231_v8  ;;  %v2298_v4 = vmax.f32 %v2286_v63, 0.0  ;;  %v2269_v39 = vadd.f32 %v2257_v59, %v2168_v50  ;;  %v9675_v5 = vld [vmem:[#allocation46_spill] sm:$0xff]  ;;  %v9676_v50 = vld [vmem:[#allocation61_spill] sm:$0xff]  ;;  %v9677_v8 = vld [vmem:[#allocation59_spill] sm:$0xff] }
 0x29d   : > { %v2795_v45 = vmul.f32 %v8568_v51, %v8251_v28  ;;  %v8596_v40 = vpop.permute.xlu1 %2763  ;;  %v2998_v42 = vmul.f32 %v8594_v54, %v9672_v44  ;;  %v2997_v62 = vmul.f32 %v8594_v54, %v9674_v32  ;;  %v2809_v49 = vadd.f32 %v2797_v18, %v2708_v21 }
 0x29e   : > { %v2297_v36 = vmax.f32 %v2285_v23, 0.0  ;;  %v2268_v17 = vadd.f32 %v2256_v16, %v2167_v35  ;;  %2310 = vst.msk [vmem:[#allocation2 + $0x9a] sm:$0xff] %vm385_vm0, %v2298_v4  ;;  %v2288_v28 = vadd.f32 %v8231_v43, %v2269_v39  ;;  %1085 = vperm.xlu1 %6727, %v1026_v57   ;;  %v2909_v26 = vadd.f32 %v2897_v52, %v2808_v56  ;;  %v1474_v23 = vld [vmem:[%s7005_s14 + $0xb3] sm:$0x3] }
 0x29f   : > { %v8604_v1 = vpop.permute.xlu0 %2758  ;;  %984 = vperm.xlu0 %6726, %v925_v15   ;;  %v2807_v6 = vadd.f32 %v2795_v45, %v2706_v61  ;;  %v2899_v0 = vmul.f32 %v8585_v60, %v9675_v5  ;;  %v3099_v34 = vmul.f32 %v8620_v22, %v8501_v19  ;;  %v2799_v63 = vmul.f32 %v8568_v51, %v9676_v50  ;;  %v8646_v19 = vld [vmem:[%s9437_s1 + $0x8] ss:$0 sm:$0xff]  ;;  %v1373_v39 = vld [vmem:[%s7005_s14 + $0xb2] sm:$0x3]  ;;  %v9680_v61 = vld [vmem:[#allocation40_spill] sm:$0xff] }
 0x2a0   : > { %2309 = vst.msk [vmem:[#allocation2 + $0x92] sm:$0xff] %vm385_vm0, %v2297_v36  ;;  %v2287_v55 = vadd.f32 %v8231_v43, %v2268_v17  ;;  %v2300_v48 = vmax.f32 %v2288_v28, 0.0  ;;  %v2898_v43 = vmul.f32 %v8585_v60, %v9673_v41  ;;  %v2999_v33 = vmul.f32 %v8594_v54, %v9677_v8 }
 0x2a1   : > { %v8627_v25 = vpop.permute.xlu1 %2773  ;;  %v2908_v59 = vadd.f32 %v2896_v24, %v2807_v6  ;;  %v3098_v35 = vmul.f32 %v8620_v22, %v9678_v11  ;;  %v2710_v16 = vadd.f32 %v2698_v30, %v8561_v20  ;;  %v2810_v57 = vadd.f32 %v2798_v29, %v2709_v3  ;;  %v8663_v24 = vld [vmem:[%s9438_s2] ss:$0 sm:$0xff]  ;;  %v1575_v29 = vld [vmem:[%s7005_s14 + $0xb4] sm:$0x3] }
 0x2a2   : > { %v2299_v7 = vmax.f32 %v2287_v55, 0.0  ;;  %2312 = vst.msk [vmem:[#allocation2 + $0xaa] sm:$0xff] %vm385_vm0, %v2300_v48  ;;  %1287 = vperm.xlu1 %6727, %v1228_v9   ;;  %v3010_v14 = vadd.f32 %v2998_v42, %v2909_v26  ;;  %v3000_v4 = vmul.f32 %v8594_v54, %v9679_v53  ;;  %v2910_v15 = vadd.f32 %v2898_v43, %v2809_v49  ;;  %v1676_v55 = vld [vmem:[%s7005_s14 + $0xc4] sm:$0x3]  ;;  %v9681_v42 = vld [vmem:[#allocation60_spill] sm:$0xff] }
 0x2a3   : > { %v8634_v12 = vpop.permute.xlu0 %2768  ;;  %1186 = vperm.xlu0 %6726, %v1127_v38   ;;  %v2900_v45 = vmul.f32 %v8585_v60, %v9680_v61  ;;  %v3009_v36 = vadd.f32 %v2997_v62, %v2908_v59  ;;  %v3100_v17 = vmul.f32 %v8620_v22, %v8493_v31  ;;  %v2911_v52 = vadd.f32 %v2899_v0, %v2810_v57  ;;  %v1777_v57 = vld [vmem:[%s7005_s14 + $0xc5] sm:$0x3] }
 0x2a4   : > { %2311 = vst.msk [vmem:[#allocation2 + $0xa2] sm:$0xff] %vm385_vm0, %v2299_v7  ;;  %v3111_v28 = vadd.f32 %v3099_v34, %v3010_v14  ;;  %v3101_v20 = vmul.f32 %v8620_v22, %v8529_v47  ;;  %v2811_v27 = vadd.f32 %v2799_v63, %v2710_v16  ;;  %v3011_v30 = vadd.f32 %v2999_v33, %v2910_v15 }
 0x2a5   : > { %v3143_v18 = vpop.permute.xlu1 %3142  ;;  %v3110_v10 = vadd.f32 %v3098_v35, %v3009_v36  ;;  %v3012_v9 = vadd.f32 %v3000_v4, %v2911_v52  ;;  %v3001_v48 = vmul.f32 %v8594_v54, %v9681_v42  ;;  %v3102_v43 = vmul.f32 %v8620_v22, %v8523_v2  ;;  %v1878_v2 = vld [vmem:[%s7005_s14 + $0xc6] sm:$0x3] }
 0x2a6   : > { %v3200_v3 = vmul.f32 %v8646_v19, %v3143_v18  ;;  %1533 = vperm.xlu1 %6727, %v1474_v23   ;;  %v2912_v44 = vadd.f32 %v2900_v45, %v2811_v27  ;;  %v3112_v38 = vadd.f32 %v3100_v17, %v3011_v30  ;;  %v2426_v27 = vld [vmem:[%s7005_s14 + $0x10d] sm:$0x3] }
 0x2a7   : > { %v3138_v21 = vpop.permute.xlu0 %3137  ;;  %1432 = vperm.xlu0 %6726, %v1373_v39   ;;  %v3591_v56 = vld [vmem:[#allocation2 + $0x90] ss:$2 sm:$0xff]  ;;  %v3593_v46 = vld [vmem:[#allocation2 + $0x91] ss:$2 sm:$0xff]  ;;  %v3113_v32 = vadd.f32 %v3101_v20, %v3012_v9 }
 0x2a8   : > { %v3199_v31 = vmul.f32 %v8646_v19, %v3138_v21  ;;  %v3212_v47 = vadd.f32 %v3200_v3, %v3111_v28  ;;  %v3594_v0 = vmax.f32 %v3591_v56, %v3593_v46  ;;  %v3013_v14 = vadd.f32 %v3001_v48, %v2912_v44  ;;  %v9682_v48 = vld [vmem:[#allocation51_spill] sm:$0xff] }
 0x2a9   : > { %v3153_v41 = vpop.permute.xlu1 %3152 }
 0x2aa   : > { %v3211_v6 = vadd.f32 %v3199_v31, %v3110_v10  ;;  %v3231_v49 = vadd.f32 %v8663_v24, %v3212_v47  ;;  %v3202_v26 = vmul.f32 %v8646_v19, %v3153_v41  ;;  %1735 = vperm.xlu1 %6727, %v1676_v55   ;;  %v3745_v59 = vpop.f32.mrb[4].mxu0  ;;  %v3114_v18 = vadd.f32 %v3102_v43, %v3013_v14  ;;  %v2325_v10 = vld [vmem:[%s7005_s14 + $0x10c] sm:$0x3]  ;;  %v3297_v47 = vld [vmem:[%s7005_s14 + $0x11f] sm:$0x3]  ;;  %v9684_v43 = vld [vmem:[#allocation45_spill] sm:$0xff] }
 0x2ab   : > { %v3596_v62 = vld [vmem:[#allocation2 + $0xa2] ss:$2 sm:$0xff]  ;;  %v3598_v7 = vld [vmem:[#allocation2 + $0xa3] ss:$2 sm:$0xff]  ;;  %v3148_v5 = vpop.permute.xlu0 %3147  ;;  %1634 = vperm.xlu0 %6726, %v1575_v29   ;;  %v3845_v8 = vpop.f32.mrb[4].mxu1 }
 0x2ac   : > { %v3599_v34 = vmax.f32 %v3596_v62, %v3598_v7  ;;  %v3230_v50 = vadd.f32 %v8663_v24, %v3211_v6  ;;  %v3201_v63 = vmul.f32 %v8646_v19, %v3148_v5  ;;  %v3243_v33 = vmax.f32 %v3231_v49, 0.0  ;;  %v6337_v23 = vpop.f32.mrb[5].mxu0  ;;  %v6361_v16 = vpop.f32.mrb[5].mxu1  ;;  %v3268_v29 = vld [vmem:[%s7005_s14 + $0x11e] sm:$0x3] }
 0x2ad   : > { %v3214_v11 = vadd.f32 %v3202_v26, %v3113_v32  ;;  %v8677_v35 = vadd.f32 %v3845_v8, %v3745_v59  ;;  %v8680_v15 = vpop.permute.xlu1 %2859  ;;  %v3748_v61 = vpop.f32.mrb[6].mxu0  ;;  %v9685_v62 = vld [vmem:[#allocation38_spill] sm:$0xff]  ;;  %v9689_v8 = vld [vmem:[#allocation56_spill] sm:$0xff] }
 0x2ae   : > { %v3600_v53 = vmax.f32 %v3594_v0, %v3599_v34  ;;  %v3242_v4 = vmax.f32 %v3230_v50, 0.0  ;;  %v3213_v39 = vadd.f32 %v3201_v63, %v3112_v38  ;;  %3255 = vst.msk [vmem:[#allocation2 + $0xbc] sm:$0xff] %vm385_vm0, %v3243_v33  ;;  %v3848_v36 = vpop.f32.mrb[6].mxu1  ;;  %1937 = vperm.xlu1 %6727, %v1878_v2   ;;  %v6338_v3 = vpop.f32.mrb[7].mxu0  ;;  %v9683_v38 = vld [vmem:[#allocation64_spill] sm:$0xff]  ;;  %v9686_v26 = vld [vmem:[#allocation62_spill] sm:$0xff]  ;;  %v2397_v2 = vmul.f32 %v8430_v13, %v9689_v8 }
 0x2af   : > { %v3233_v45 = vadd.f32 %v8663_v24, %v3214_v11  ;;  %v3158_v17 = vpop.permute.xlu0 %3157  ;;  %v8687_v28 = vadd.f32 %v3848_v36, %v3748_v61  ;;  %v6362_v21 = vpop.f32.mrb[7].mxu1  ;;  %1836 = vperm.xlu0 %6726, %v1777_v57   ;;  %v2497_v6 = vmul.f32 %v9683_v38, %v9682_v48  ;;  %v2499_v32 = vmul.f32 %v9683_v38, %v9684_v43  ;;  %v3326_v49 = vld [vmem:[%s7005_s14 + $0x120] sm:$0x3]  ;;  %v9687_v0 = vld [vmem:[#allocation39_spill] sm:$0xff]  ;;  %v2527_v50 = vld [vmem:[%s7005_s14 + $0x10e] sm:$0x3] }
 0x2b0   : > { %3601 = vst.msk [vmem:[#allocation3 + $0x33] sm:$0xff] %vm385_vm0, %v3600_v53  ;;  %3254 = vst.msk [vmem:[#allocation2 + $0xb4] sm:$0xff] %vm385_vm0, %v3242_v4  ;;  %v3232_v52 = vadd.f32 %v8663_v24, %v3213_v39  ;;  %v3203_v20 = vmul.f32 %v8646_v19, %v3158_v17  ;;  %v2498_v7 = vmul.f32 %v9683_v38, %v9685_v62  ;;  %v9688_v63 = vld [vmem:[#allocation52_spill] sm:$0xff]  ;;  %v9690_v33 = vld [vmem:[#allocation53_spill] sm:$0xff] }
 0x2b1   : > { %v3245_v30 = vmax.f32 %v3233_v45, 0.0  ;;  %v8692_v9 = vpop.permute.xlu1 %2869  ;;  %v2396_v5 = vmul.f32 %v8430_v13, %v9686_v26  ;;  %v2598_v34 = vmul.f32 %v8450_v37, %v9687_v0  ;;  %v2398_v59 = vmul.f32 %v8430_v13, %v9688_v63  ;;  %v9691_v23 = vld [vmem:[#allocation14_spill] sm:$0xff]  ;;  %v9692_v53 = vld [vmem:[#allocation49_spill] sm:$0xff]  ;;  %v9694_v36 = vld [vmem:[#allocation55_spill] sm:$0xff] }
 0x2b2   : > { %v3244_v31 = vmax.f32 %v3232_v52, 0.0  ;;  %v3215_v55 = vadd.f32 %v3203_v20, %v3114_v18  ;;  %2485 = vperm.xlu1 %6727, %v2426_v27   ;;  %v2500_v11 = vmul.f32 %v9683_v38, %v9690_v33  ;;  %v2599_v16 = vmul.f32 %v8450_v37, %v9691_v23  ;;  %v9693_v39 = vld [vmem:[#allocation13_spill] sm:$0xff]  ;;  %v3355_v20 = vld [vmem:[%s7005_s14 + $0x130] sm:$0x3]  ;;  %v9695_v21 = vld [vmem:[#allocation10_spill] sm:$0xff] }
 0x2b3   : > { %3257 = vst.msk [vmem:[#allocation2 + $0xcc] sm:$0xff] %vm385_vm0, %v3245_v30  ;;  %v8695_v56 = vpop.permute.xlu0 %2864  ;;  %2384 = vperm.xlu0 %6726, %v2325_v10   ;;  %v2509_v14 = vadd.f32 %v2497_v6, %v2396_v5  ;;  %v2600_v4 = vmul.f32 %v8450_v37, %v9692_v53  ;;  %v2699_v61 = vmul.f32 %v8545_v58, %v9693_v39  ;;  %v9696_v30 = vld [vmem:[#allocation22_spill] sm:$0xff]  ;;  %v9697_v6 = vld [vmem:[#allocation41_spill] sm:$0xff] }
 0x2b4   : > { %3256 = vst.msk [vmem:[#allocation2 + $0xc4] sm:$0xff] %vm385_vm0, %v3244_v31  ;;  %v3234_v46 = vadd.f32 %v8663_v24, %v3215_v55  ;;  %v2399_v17 = vmul.f32 %v8430_v13, %v9694_v36  ;;  %v2511_v18 = vadd.f32 %v2499_v32, %v2398_v59  ;;  %v2510_v52 = vadd.f32 %v2498_v7, %v2397_v2  ;;  %v3384_v63 = vld [vmem:[%s7005_s14 + $0x131] sm:$0x3] }
 0x2b5   : > { %v2961_v42 = vpop.permute.xlu1 %2960  ;;  %v2610_v3 = vadd.f32 %v2598_v34, %v2509_v14  ;;  %v2701_v27 = vmul.f32 %v8545_v58, %v9695_v21  ;;  %v2700_v10 = vmul.f32 %v8545_v58, %v9696_v30  ;;  %v2800_v31 = vmul.f32 %v8568_v51, %v8604_v1 }
 0x2b6   : > { %v3246_v44 = vmax.f32 %v3234_v46, 0.0  ;;  %3311 = vperm.xlu1 %6727, %v3297_v47   ;;  %v2628_v47 = vld [vmem:[%s7005_s14 + $0x11e] sm:$0x3]  ;;  %v2601_v43 = vmul.f32 %v8450_v37, %v9697_v6  ;;  %v2612_v32 = vadd.f32 %v2600_v4, %v2511_v18  ;;  %v2901_v7 = vmul.f32 %v8585_v60, %v8680_v15  ;;  %v1979_v6 = vld [vmem:[%s7005_s14 + $0xd6] sm:$0x3] }
 0x2b7   : > { %v8703_v41 = vpop.permute.xlu0 %2874  ;;  %3282 = vperm.xlu0 %6726, %v3268_v29   ;;  %v3603_v55 = vld [vmem:[#allocation2 + $0xb4] ss:$2 sm:$0xff]  ;;  %v3605_v46 = vld [vmem:[#allocation2 + $0xb5] ss:$2 sm:$0xff]  ;;  %v2512_v29 = vadd.f32 %v2500_v11, %v2399_v17  ;;  %v2711_v62 = vadd.f32 %v2699_v61, %v2610_v3  ;;  %v2801_v1 = vmul.f32 %v8568_v51, %v8596_v40  ;;  %v2802_v0 = vmul.f32 %v8568_v51, %v8634_v12 }
 0x2b8   : > { %3258 = vst.msk [vmem:[#allocation2 + $0xd4] sm:$0xff] %vm385_vm0, %v3246_v44  ;;  %v2611_v44 = vadd.f32 %v2599_v16, %v2510_v52  ;;  %v3606_v34 = vmax.f32 %v3603_v55, %v3605_v46  ;;  %v2713_v59 = vadd.f32 %v2701_v27, %v2612_v32  ;;  %v3002_v33 = vmul.f32 %v8594_v54, %v2961_v42  ;;  %v2729_v15 = vld [vmem:[%s7005_s14 + $0x11f] sm:$0x3]  ;;  %v9698_v11 = vld [vmem:[#allocation15_spill] sm:$0xff] }
 0x2b9   : > { %v2971_v57 = vpop.permute.xlu1 %2970  ;;  %v2812_v2 = vadd.f32 %v2800_v31, %v2711_v62  ;;  %v2702_v23 = vmul.f32 %v8545_v58, %v9698_v11  ;;  %v2903_v40 = vmul.f32 %v8585_v60, %v8692_v9  ;;  %v2902_v12 = vmul.f32 %v8585_v60, %v8695_v56  ;;  %v3413_v9 = vld [vmem:[%s7005_s14 + $0x132] sm:$0x3] }
 0x2ba   : > { %3340 = vperm.xlu1 %6727, %v3326_v49   ;;  %v2712_v8 = vadd.f32 %v2700_v10, %v2611_v44  ;;  %v2613_v42 = vadd.f32 %v2601_v43, %v2512_v29  ;;  %v2803_v36 = vmul.f32 %v8568_v51, %v8627_v25  ;;  %v2814_v17 = vadd.f32 %v2802_v0, %v2713_v59  ;;  %v3663_v62 = vld [vmem:[#allocation3 + $0x31] sm:$0xff] }
 0x2bb   : > { %v2966_v45 = vpop.permute.xlu0 %2965  ;;  %2586 = vperm.xlu0 %6726, %v2527_v50   ;;  %v2913_v53 = vadd.f32 %v2901_v7, %v2812_v2  ;;  %v3004_v56 = vmul.f32 %v8594_v54, %v2971_v57  ;;  %v2904_v30 = vmul.f32 %v8585_v60, %v8703_v41 }
 0x2bc   : > { %v2813_v61 = vadd.f32 %v2801_v1, %v2712_v8  ;;  %v3003_v52 = vmul.f32 %v8594_v54, %v2966_v45  ;;  %v2714_v3 = vadd.f32 %v2702_v23, %v2613_v42  ;;  %v2915_v21 = vadd.f32 %v2903_v40, %v2814_v17  ;;  %v2931_v45 = vld [vmem:[%s7005_s14 + $0x130] sm:$0x3]  ;;  %v3442_v23 = vld [vmem:[%s7005_s14 + $0x142] sm:$0x3] }
 0x2bd   : > { %v3062_v48 = vpop.permute.xlu1 %3061  ;;  %v3014_v18 = vadd.f32 %v3002_v33, %v2913_v53  ;;  %v2080_v33 = vld [vmem:[%s7005_s14 + $0xd7] sm:$0x3] }
 0x2be   : > { %3369 = vperm.xlu1 %6727, %v3355_v20   ;;  %v3103_v4 = vmul.f32 %v8620_v22, %v3062_v48  ;;  %v2830_v20 = vld [vmem:[%s7005_s14 + $0x120] sm:$0x3]  ;;  %v2914_v27 = vadd.f32 %v2902_v12, %v2813_v61  ;;  %v3016_v29 = vadd.f32 %v3004_v56, %v2915_v21  ;;  %v3133_v21 = vld [vmem:[%s7005_s14 + $0x132] sm:$0x3] }
 0x2bf   : > { %v3608_v49 = vld [vmem:[#allocation2 + $0xc6] ss:$2 sm:$0xff]  ;;  %v3610_v26 = vld [vmem:[#allocation2 + $0xc7] ss:$2 sm:$0xff]  ;;  %v2976_v5 = vpop.permute.xlu0 %2975  ;;  %2687 = vperm.xlu0 %6726, %v2628_v47   ;;  %v2815_v47 = vadd.f32 %v2803_v36, %v2714_v3  ;;  %v3471_v36 = vld [vmem:[%s7005_s14 + $0x143] sm:$0x3] }
 0x2c0   : > { %v3611_v50 = vmax.f32 %v3608_v49, %v3610_v26  ;;  %v3115_v10 = vadd.f32 %v3103_v4, %v3014_v18  ;;  %v3015_v44 = vadd.f32 %v3003_v52, %v2914_v27  ;;  %v3005_v41 = vmul.f32 %v8594_v54, %v2976_v5  ;;  %v2181_v27 = vld [vmem:[%s7005_s14 + $0xd8] sm:$0x3] }
 0x2c1   : > { %v3072_v14 = vpop.permute.xlu1 %3071  ;;  %v2916_v43 = vadd.f32 %v2904_v30, %v2815_v47  ;;  %v9699_v4 = vmov 0.0  }
 0x2c2   : > { %v3612_v16 = vmax.f32 %v3606_v34, %v3611_v50  ;;  %3398 = vperm.xlu1 %6727, %v3384_v63   ;;  %v3105_v31 = vmul.f32 %v8620_v22, %v3072_v14  ;;  %v3644_v50 = vld [vmem:[#allocation3 + $0x30] sm:$0xff]  ;;  %402 = vst.msk [vmem:[#allocation5] sm:$0xff] %vm401_vm2, %v9699_v4  ;;  %403 = vst.msk [vmem:[#allocation5 + $0x8] sm:$0xff] %vm401_vm2, %v9699_v4 }
 0x2c3   : > { %v3067_v39 = vpop.permute.xlu0 %3066  ;;  %2788 = vperm.xlu0 %6726, %v2729_v15   ;;  %404 = vst.msk [vmem:[#allocation5 + $0x10] sm:$0xff] %vm401_vm2, %v9699_v4  ;;  %405 = vst.msk [vmem:[#allocation5 + $0x18] sm:$0xff] %vm401_vm2, %v9699_v4 }
 0x2c4   : > { %3613 = vst.msk [vmem:[#allocation3 + $0x3d] sm:$0xff] %vm385_vm0, %v3612_v16  ;;  %v3104_v55 = vmul.f32 %v8620_v22, %v3067_v39  ;;  %v3117_v7 = vadd.f32 %v3105_v31, %v3016_v29  ;;  %v3017_v16 = vadd.f32 %v3005_v41, %v2916_v43  ;;  %v3500_v31 = vld [vmem:[%s7005_s14 + $0x144] sm:$0x3] }
 0x2c5   : > { %v3163_v25 = vpop.permute.xlu1 %3162  ;;  %406 = vst.msk [vmem:[#allocation5 + $0x20] sm:$0xff] %vm401_vm2, %v9699_v4 }
 0x2c6   : > { %v3204_v46 = vmul.f32 %v8646_v19, %v3163_v25  ;;  %3427 = vperm.xlu1 %6727, %v3413_v9   ;;  %v3116_v49 = vadd.f32 %v3104_v55, %v3015_v44  ;;  %v3032_v9 = vld [vmem:[%s7005_s14 + $0x131] sm:$0x3]  ;;  %s9394_s14 = scalar_lea.hbm %s9447_s11, %s6193_s13 }
 0x2c7   : > { %v3077_v57 = vpop.permute.xlu0 %3076  ;;  %2889 = vperm.xlu0 %6726, %v2830_v20  }
 0x2c8   : > { %v3216_v48 = vadd.f32 %v3204_v46, %v3115_v10  ;;  %v3106_v59 = vmul.f32 %v8620_v22, %v3077_v57 }
 0x2c9   : > { %v3173_v32 = vpop.permute.xlu1 %3172 }
 0x2ca   : > { %v3235_v26 = vadd.f32 %v8663_v24, %v3216_v48  ;;  %v3206_v1 = vmul.f32 %v8646_v19, %v3173_v32  ;;  %2990 = vperm.xlu1 %6727, %v2931_v45   ;;  %v3118_v39 = vadd.f32 %v3106_v59, %v3017_v16 }
 0x2cb   : > { %v3168_v0 = vpop.permute.xlu0 %3167  ;;  %v3664_v34 = vld [vmem:[#allocation3 + $0x39] sm:$0xff]  ;;  %2038 = vperm.xlu0 %6726, %v1979_v6  }
 0x2cc   : > { %v3645_v63 = vld [vmem:[#allocation3 + $0x38] sm:$0xff]  ;;  %v3205_v8 = vmul.f32 %v8646_v19, %v3168_v0  ;;  %v3670_v5 = vpack.c.bf16 %v3664_v34, %v3663_v62  ;;  %v3247_v15 = vmax.f32 %v3235_v26, 0.0  ;;  %v3218_v11 = vadd.f32 %v3206_v1, %v3117_v7 }
 0x2cd   : > { %v3651_v2 = vpack.c.bf16 %v3645_v63, %v3644_v50  ;;  %v8779_v12 = vpop.permute.xlu1 %2374 }
 0x2ce   : > { %v3217_v40 = vadd.f32 %v3205_v8, %v3116_v49  ;;  %6344 = vmatmul.mubr.msk.bf16.gmra.mrb[12].mxu0 %vm385_vm0, %v3670_v5  ;;  %3259 = vst.msk [vmem:[#allocation2 + $0xdc] sm:$0xff] %vm385_vm0, %v3247_v15  ;;  %v3237_v14 = vadd.f32 %v8663_v24, %v3218_v11  ;;  %2139 = vperm.xlu1 %6727, %v2080_v33   ;;  %v3876_v33 = vld [vmem:[#allocation3 + $0x2] sm:$0xff]  ;;  %v3877_v15 = vld [vmem:[#allocation3 + $0xa] sm:$0xff] }
 0x2cf   : > { %6368 = vmatmul.mubr.msk.bf16.gmra.mrb[12].mxu1 %vm385_vm0, %v3651_v2  ;;  %v3178_v53 = vpop.permute.xlu0 %3177  ;;  %6347 = vmatprep.mubr.msk.bf16.mxu0 %vm6890_vm1, %v9699_v4 }
 0x2d0   : > { %v3236_v42 = vadd.f32 %v8663_v24, %v3217_v40  ;;  %v3207_v61 = vmul.f32 %v8646_v19, %v3178_v53  ;;  %3456 = vperm.xlu0 %6726, %v3442_v23   ;;  %6371 = vmatprep.mubr.msk.bf16.mxu1 %vm6890_vm1, %v9699_v4  ;;  %v3249_v17 = vmax.f32 %v3237_v14, 0.0  ;;  %v4006_v23 = vld [vmem:[#allocation3 + $0x12] sm:$0xff]  ;;  %v3886_v40 = vpack.c.bf16 %v3877_v15, %v3876_v33  ;;  %v6736_v14 = vld [vmem:[%s9439_s3 + $0x40] sm:$0xff]  }
 0x2d1   : > { %v8791_v52 = vpop.permute.xlu1 %2475  ;;  %v4015_v53 = vpack.c.bf16 %v4006_v23, %v3877_v15 }
 0x2d2   : > { %v3248_v18 = vmax.f32 %v3236_v42, 0.0  ;;  %v3219_v56 = vadd.f32 %v3207_v61, %v3118_v39  ;;  %3261 = vst.msk [vmem:[#allocation2 + $0xec] sm:$0xff] %vm385_vm0, %v3249_v17  ;;  %3485 = vperm.xlu1 %6727, %v3471_v36   ;;  %v6738_v39 = vld [vmem:[%s9439_s3 + $0x50] sm:$0xff]   ;;  %v6737_v36 = vld [vmem:[%s9439_s3 + $0x48] sm:$0xff]   ;;  %v3879_v17 = vld [vmem:[#allocation3 + $0x1a] sm:$0xff] }
 0x2d3   : > { %v8794_v20 = vpop.permute.xlu0 %2379 }
 0x2d4   : > { %3260 = vst.msk [vmem:[#allocation2 + $0xe4] sm:$0xff] %vm385_vm0, %v3248_v18  ;;  %v3238_v3 = vadd.f32 %v8663_v24, %v3219_v56  ;;  %3091 = vperm.xlu0 %6726, %v3032_v9   ;;  %v6739_v9 = vld [vmem:[%s9439_s3 + $0x58] sm:$0xff]   ;;  %v4008_v56 = vld [vmem:[#allocation3 + $0x22] sm:$0xff] }
 0x2d5   : > { %v8800_v25 = vpop.permute.xlu1 %3272 }
 0x2d6   : > { %v3250_v30 = vmax.f32 %v3238_v3, 0.0  ;;  %3192 = vperm.xlu1 %6727, %v3133_v21   ;;  %v3887_v21 = vpack.c.bf16 %v3879_v17, %v4006_v23 }
 0x2d7   : > { %v8802_v10 = vpop.permute.xlu0 %2480 }
 0x2d8   : > { %3262 = vst.msk [vmem:[#allocation2 + $0xf4] sm:$0xff] %vm385_vm0, %v3250_v30  ;;  %2240 = vperm.xlu0 %6726, %v2181_v27   ;;  %v4016_v27 = vpack.c.bf16 %v4008_v56, %v3879_v17 }
 0x2d9   : > { %v8806_v55 = vpop.permute.xlu1 %3301 }
 0x2db   : > { %v8808_v46 = vpop.permute.xlu0 %3277  ;;  %v3615_v57 = vld [vmem:[#allocation2 + $0xd8] ss:$2 sm:$0xff]  ;;  %v3617_v47 = vld [vmem:[#allocation2 + $0xd9] ss:$2 sm:$0xff] }
 0x2dc   : > { %3514 = vperm.xlu0 %6726, %v3500_v31   ;;  %v3618_v6 = vmax.f32 %v3615_v57, %v3617_v47  ;;  %v2501_v31 = vmul.f32 %v9683_v38, %v8791_v52  ;;  %v6052_v57 = vld [vmem:[%s9437_s1 + $0x1] ss:$0 sm:$0xff]  ;;  %v6051_v52 = vld [vmem:[%s9437_s1] ss:$0 sm:$0xff] }
 0x2dd   : > { %v8810_v45 = vpop.permute.xlu1 %2576 }
 0x2df   : > { %v3620_v29 = vld [vmem:[#allocation2 + $0xea] ss:$2 sm:$0xff]  ;;  %v3622_v44 = vld [vmem:[#allocation2 + $0xeb] ss:$2 sm:$0xff]  ;;  %v8812_v48 = vpop.permute.xlu0 %3306 }
 0x2e0   : > { %v3623_v43 = vmax.f32 %v3620_v29, %v3622_v44  ;;  %v2400_v29 = vmul.f32 %v8430_v13, %v8779_v12  ;;  %v2602_v44 = vmul.f32 %v8450_v37, %v8810_v45  ;;  %v3289_v45 = vmul.f32 %v6051_v52, %v8800_v25 }
 0x2e1   : > { %v8814_v32 = vpop.permute.xlu1 %3330 }
 0x2e2   : > { %v3624_v41 = vmax.f32 %v3618_v6, %v3623_v43  ;;  %v6053_v6 = vld [vmem:[%s9437_s1 + $0x2] ss:$0 sm:$0xff]  ;;  %v3881_v43 = vld [vmem:[#allocation3 + $0x2a] sm:$0xff] }
 0x2e3   : > { %v8816_v62 = vpop.permute.xlu0 %2581  ;;  %v3347_v33 = vmul.f32 %v6053_v6, %v8814_v32  ;;  %v3888_v15 = vpack.c.bf16 %v3881_v43, %v4008_v56  ;;  %v3319_v32 = vmul.f32 %v6052_v57, %v8812_v48  ;;  %v3883_v48 = vld [vmem:[#allocation3 + $0x3a] sm:$0xff] }
 0x2e4   : > { %3625 = vst.msk [vmem:[#allocation3 + $0x47] sm:$0xff] %vm385_vm0, %v3624_v41  ;;  %v3318_v41 = vmul.f32 %v6052_v57, %v8806_v55  ;;  %v2603_v25 = vmul.f32 %v8450_v37, %v8816_v62 }
 0x2e5   : > { %v8819_v7 = vpop.permute.xlu1 %2677 }
 0x2e6   : > { %v2703_v12 = vmul.f32 %v8545_v58, %v8819_v7  ;;  %v6055_v7 = vld [vmem:[%s9437_s1 + $0x4] ss:$0 sm:$0xff] }
 0x2e7   : > { %v8821_v49 = vpop.permute.xlu0 %3335 }
 0x2e9   : > { %v8823_v26 = vpop.permute.xlu1 %3359 }
 0x2eb   : > { %v8825_v1 = vpop.permute.xlu0 %2682  ;;  %v3665_v0 = vld [vmem:[#allocation3 + $0x41] sm:$0xff]  ;;  %v3666_v34 = vld [vmem:[#allocation3 + $0x49] sm:$0xff] }
 0x2ec   : > { %v3646_v50 = vld [vmem:[#allocation3 + $0x40] sm:$0xff]  ;;  %v3671_v63 = vpack.c.bf16 %v3666_v34, %v3665_v0  ;;  %v3647_v59 = vld [vmem:[#allocation3 + $0x48] sm:$0xff]  ;;  %v4010_v34 = vld [vmem:[#allocation3 + $0x32] sm:$0xff]  ;;  %v2704_v37 = vmul.f32 %v8545_v58, %v8825_v1 }
 0x2ed   : > { %v3652_v8 = vpack.c.bf16 %v3647_v59, %v3646_v50  ;;  %v2779_v5 = vpop.permute.xlu1 %2778  ;;  %v2513_v50 = vadd.f32 %v2501_v31, %v2400_v29 }
 0x2ee   : > { %6348 = vmatmul.mubr.msk.bf16.gmra.mrb[16].mxu0 %vm385_vm0, %v3671_v63  ;;  %v6054_v63 = vld [vmem:[%s9437_s1 + $0x3] ss:$0 sm:$0xff]  ;;  %v2804_v23 = vmul.f32 %v8568_v51, %v2779_v5 }
 0x2ef   : > { %6372 = vmatmul.mubr.msk.bf16.gmra.mrb[16].mxu1 %vm385_vm0, %v3652_v8  ;;  %v8829_v2 = vpop.permute.xlu0 %3364  ;;  %6379 = vmatprep.mubr.msk.bf16.mxu0 %vm6890_vm1, %v9699_v4  ;;  %v2502_v8 = vmul.f32 %v9683_v38, %v8802_v10  ;;  %v2614_v55 = vadd.f32 %v2602_v44, %v2513_v50  ;;  %v3376_v38 = vmul.f32 %v6054_v63, %v8823_v26 }
 0x2f0   : > { %6403 = vmatprep.mubr.msk.bf16.mxu1 %vm6890_vm1, %v9699_v4  ;;  %v3290_v26 = vmul.f32 %v6051_v52, %v8808_v46 }
 0x2f1   : > { %v8835_v11 = vpop.permute.xlu1 %3388  ;;  %v2715_v5 = vadd.f32 %v2703_v12, %v2614_v55 }
 0x2f2   : > { %v3405_v62 = vmul.f32 %v6055_v7, %v8835_v11  ;;  %v8927_v11 = vld [vmem:[#allocation3 + $0x42] sm:$0xff]  ;;  %v3322_v31 = vadd.f32 %v3319_v32, %v3290_v26 }
 0x2f3   : > { %v8837_v16 = vpop.permute.xlu0 %2783  ;;  %v2816_v17 = vadd.f32 %v2804_v23, %v2715_v5 }
 0x2f5   : > { %v2880_v42 = vpop.permute.xlu1 %2879 }
 0x2f6   : > { %6380 = vmatmul.mubr.msk.bf16.vlgmr.msra.gmra.mrb[20].mxu0 %vm385_vm0, %v3886_v40  ;;  %v4017_v40 = vpack.c.bf16 %v4010_v34, %v3881_v43  ;;  %v4018_v43 = vpack.c.bf16 %v8927_v11, %v3883_v48 }
 0x2f7   : > { %6404 = vmatmul.mubr.msk.bf16.vlgmr.msra.gmra.mrb[20].mxu1 %vm385_vm0, %v4015_v53  ;;  %v8847_v61 = vpop.permute.xlu0 %3393  ;;  %6383 = vmatprep.mubr.msk.bf16.mxu0 %vm6890_vm1, %v9699_v4  ;;  %v3321_v53 = vadd.f32 %v3318_v41, %v3289_v45 }
 0x2f8   : > { %6407 = vmatprep.mubr.msk.bf16.mxu1 %vm6890_vm1, %v9699_v4  ;;  %6424 = vmatpush3.bf16.msra.mxu0 %v6736_v14  ;;  %v2401_v14 = vmul.f32 %v8430_v13, %v8794_v20  ;;  %v3406_v50 = vmul.f32 %v6055_v7, %v8847_v61 }
 0x2f9   : > { %6425 = vmatprep.subr.bf16.mxu0 %v9699_v4  ;;  %6448 = vmatpush3.bf16.msra.mxu1 %v6738_v39  ;;  %v8860_v18 = vpop.permute.xlu1 %3417  ;;  %v2905_v39 = vmul.f32 %v8585_v60, %v2880_v42  ;;  %v3350_v20 = vadd.f32 %v3347_v33, %v3321_v53  ;;  %v3348_v42 = vmul.f32 %v6053_v6, %v8821_v49 }
 0x2fa   : > { %6449 = vmatprep.subr.bf16.mxu1 %v9699_v4  ;;  %v2514_v13 = vadd.f32 %v2502_v8, %v2401_v14  ;;  %v3434_v58 = vmul.f32 %v8585_v60, %v8860_v18  ;;  %v3889_v49 = vpack.c.bf16 %v3883_v48, %v4010_v34 }
 0x2fb   : > { %v8863_v3 = vpop.permute.xlu0 %2884  ;;  %v2917_v57 = vadd.f32 %v2905_v39, %v2816_v17 }
 0x2fc   : > { %6426 = vmatpush3.bf16.msra.mxu0 %v6737_v36  ;;  %v2615_v56 = vadd.f32 %v2603_v25, %v2514_v13  ;;  %v2906_v6 = vmul.f32 %v8585_v60, %v8863_v3 }
 0x2fd   : > { %6450 = vmatpush3.bf16.msra.mxu1 %v6739_v9  ;;  %6471 = vmatprep.subr.bf16.mxu0 %v9699_v4  ;;  %v2981_v30 = vpop.permute.xlu1 %2980 }
 0x2fe   : > { %6384 = vmatmul.mubr.msk.bf16.gmra.mrb[24].mxu0 %vm385_vm0, %v3887_v21  ;;  %6495 = vmatprep.subr.bf16.mxu1 %v9699_v4  ;;  %v3006_v9 = vmul.f32 %v8594_v54, %v2981_v30  ;;  %v3379_v21 = vadd.f32 %v3376_v38, %v3350_v20  ;;  %v2716_v52 = vadd.f32 %v2704_v37, %v2615_v56 }
 0x2ff   : > { %6408 = vmatmul.mubr.msk.bf16.gmra.mrb[24].mxu1 %vm385_vm0, %v4016_v27  ;;  %v8874_v47 = vpop.permute.xlu0 %3422  ;;  %6387 = vmatprep.mubr.msk.bf16.mxu0 %vm6890_vm1, %v9699_v4  ;;  %v2805_v27 = vmul.f32 %v8568_v51, %v8837_v16  ;;  %v3377_v30 = vmul.f32 %v6054_v63, %v8829_v2  ;;  %v3351_v51 = vadd.f32 %v3348_v42, %v3322_v31 }
 0x300   : > { %6411 = vmatprep.mubr.msk.bf16.mxu1 %vm6890_vm1, %v9699_v4  ;;  %v3408_v44 = vadd.f32 %v3405_v62, %v3379_v21  ;;  %v3018_v16 = vadd.f32 %v3006_v9, %v2917_v57  ;;  %v3435_v61 = vmul.f32 %v8585_v60, %v8874_v47 }
 0x301   : > { %v3447_v0 = vpop.permute.xlu1 %3446  ;;  %v2817_v41 = vadd.f32 %v2805_v27, %v2716_v52 }
 0x302   : > { %v3463_v18 = vmul.f32 %v8594_v54, %v3447_v0  ;;  %v3437_v12 = vadd.f32 %v3434_v58, %v3408_v44  ;;  %v3380_v0 = vadd.f32 %v3377_v30, %v3351_v51 }
 0x303   : > { %v2986_v59 = vpop.permute.xlu0 %2985  ;;  %v2918_v33 = vadd.f32 %v2906_v6, %v2817_v41 }
 0x304   : > { %v3007_v45 = vmul.f32 %v8594_v54, %v2986_v59  ;;  %v3409_v23 = vadd.f32 %v3406_v50, %v3380_v0 }
 0x305   : > { %v3082_v10 = vpop.permute.xlu1 %3081 }
 0x306   : > { %6388 = vmatmul.mubr.msk.bf16.gmra.mrb[28].mxu0 %vm385_vm0, %v3888_v15  ;;  %v3107_v46 = vmul.f32 %v8620_v22, %v3082_v10  ;;  %v3466_v15 = vadd.f32 %v3463_v18, %v3437_v12  ;;  %v3019_v7 = vadd.f32 %v3007_v45, %v2918_v33  ;;  %v3438_v32 = vadd.f32 %v3435_v61, %v3409_v23 }
 0x307   : > { %6412 = vmatmul.mubr.msk.bf16.gmra.mrb[28].mxu1 %vm385_vm0, %v4017_v40  ;;  %v3452_v36 = vpop.permute.xlu0 %3451  ;;  %6391 = vmatprep.mubr.msk.bf16.mxu0 %vm6890_vm1, %v9699_v4 }
 0x308   : > { %6415 = vmatprep.mubr.msk.bf16.mxu1 %vm6890_vm1, %v9699_v4  ;;  %v3119_v2 = vadd.f32 %v3107_v46, %v3018_v16  ;;  %v3464_v40 = vmul.f32 %v8594_v54, %v3452_v36 }
 0x309   : > { %v3476_v1 = vpop.permute.xlu1 %3475 }
 0x30a   : > { %v3492_v63 = vmul.f32 %v8620_v22, %v3476_v1  ;;  %v3467_v20 = vadd.f32 %v3464_v40, %v3438_v32  ;;  %v4263_v32 = vld [vmem:[#allocation3 + $0xc] sm:$0xff] }
 0x30b   : > { %v3087_v29 = vpop.permute.xlu0 %3086 }
 0x30c   : > { %v3108_v59 = vmul.f32 %v8620_v22, %v3087_v29  ;;  %v3495_v53 = vadd.f32 %v3492_v63, %v3466_v15 }
 0x30d   : > { %v3183_v34 = vpop.permute.xlu1 %3182 }
 0x30e   : > { %6392 = vmatmul.mubr.msk.bf16.gmra.mrb[32].mxu0 %vm385_vm0, %v3889_v49  ;;  %v3208_v3 = vmul.f32 %v8646_v19, %v3183_v34  ;;  %v3120_v60 = vadd.f32 %v3108_v59, %v3019_v7 }
 0x30f   : > { %6416 = vmatmul.mubr.msk.bf16.gmra.mrb[32].mxu1 %vm385_vm0, %v4018_v43  ;;  %v3481_v8 = vpop.permute.xlu0 %3480  ;;  %6395 = vmatprep.mubr.msk.bf16.mxu0 %vm6890_vm1, %v9699_v4 }
 0x310   : > { %6419 = vmatprep.mubr.msk.bf16.mxu1 %vm6890_vm1, %v9699_v4  ;;  %v3220_v55 = vadd.f32 %v3208_v3, %v3119_v2  ;;  %v3493_v47 = vmul.f32 %v8620_v22, %v3481_v8 }
 0x311   : > { %v3505_v14 = vpop.permute.xlu1 %3504 }
 0x312   : > { %v3239_v25 = vadd.f32 %v8663_v24, %v3220_v55  ;;  %v3521_v38 = vmul.f32 %v8646_v19, %v3505_v14  ;;  %v3496_v48 = vadd.f32 %v3493_v47, %v3467_v20  ;;  %v6741_v20 = vld [vmem:[%s9439_s3 + $0x68] sm:$0xff]  }
 0x313   : > { %v3188_v10 = vpop.permute.xlu0 %3187 }
 0x314   : > { %v3209_v5 = vmul.f32 %v8646_v19, %v3188_v10  ;;  %v3251_v39 = vmax.f32 %v3239_v25, 0.0  ;;  %v3524_v13 = vadd.f32 %v3521_v38, %v3495_v53  ;;  %v4135_v53 = vld [vmem:[#allocation3 + $0x13] sm:$0xff]  ;;  %v4134_v10 = vld [vmem:[#allocation3 + $0xb] sm:$0xff] }
 0x315   : > { %v682_v62 = vpop.permute.xlu1 %681  ;;  %v8973_v25 = vld [vmem:[#allocation3 + $0x14] sm:$0xff]  ;;  %v4144_v47 = vpack.c.bf16 %v4135_v53, %v4134_v10 }
 0x316   : > { %v3221_v37 = vadd.f32 %v3209_v5, %v3120_v60  ;;  %3263 = vst.msk [vmem:[#allocation2 + $0xfc] sm:$0xff] %vm385_vm0, %v3251_v39  ;;  %v3534_v54 = vadd.f32 %v8663_v24, %v3524_v13  ;;  %v4273_v5 = vpack.c.bf16 %v8973_v25, %v4263_v32  ;;  %v6742_v39 = vld [vmem:[%s9439_s3 + $0x70] sm:$0xff]   ;;  %v4137_v62 = vld [vmem:[#allocation3 + $0x23] sm:$0xff] }
 0x317   : > { %v3510_v36 = vpop.permute.xlu0 %3509  ;;  %v4525_v10 = vld [vmem:[#allocation3 + $0x35] sm:$0xff] }
 0x318   : > { %v3240_v26 = vadd.f32 %v8663_v24, %v3221_v37  ;;  %v3522_v42 = vmul.f32 %v8646_v19, %v3510_v36  ;;  %v3537_v17 = vmax.f32 %v3534_v54, 0.0  ;;  %v8992_v54 = vld [vmem:[#allocation3 + $0x24] sm:$0xff]  ;;  %v6743_v36 = vld [vmem:[%s9439_s3 + $0x78] sm:$0xff]  }
 0x319   : > { %v884_v56 = vpop.permute.xlu1 %883 }
 0x31a   : > { %v3252_v9 = vmax.f32 %v3240_v26, 0.0  ;;  %v3525_v22 = vadd.f32 %v3522_v42, %v3496_v48  ;;  %3540 = vst.msk [vmem:[#allocation2 + $0x10e] sm:$0xff] %vm385_vm0, %v3537_v17  ;;  %v4136_v26 = vld [vmem:[#allocation3 + $0x1b] sm:$0xff] }
 0x31b   : > { %v783_v21 = vpop.permute.xlu0 %782  ;;  %v4265_v42 = vld [vmem:[#allocation3 + $0x1c] sm:$0xff] }
 0x31c   : > { %3264 = vst.msk [vmem:[#allocation2 + $0x104] sm:$0xff] %vm385_vm0, %v3252_v9  ;;  %v3535_v27 = vadd.f32 %v8663_v24, %v3525_v22  ;;  %v4145_v9 = vpack.c.bf16 %v4137_v62, %v4136_v26  ;;  %v4274_v22 = vpack.c.bf16 %v8992_v54, %v4265_v42 }
 0x31d   : > { %v1086_v1 = vpop.permute.xlu1 %1085 }
 0x31e   : > { %v3538_v58 = vmax.f32 %v3535_v27, 0.0  ;;  %v4139_v27 = vld [vmem:[#allocation3 + $0x33] sm:$0xff] }
 0x31f   : > { %v985_v31 = vpop.permute.xlu0 %984  ;;  %v9006_v1 = vld [vmem:[#allocation3 + $0x34] sm:$0xff] }
 0x320   : > { %3541 = vst.msk [vmem:[#allocation2 + $0x116] sm:$0xff] %vm385_vm0, %v3538_v58  ;;  %v4267_v58 = vld [vmem:[#allocation3 + $0x2c] sm:$0xff] }
 0x321   : > { %v1288_v57 = vpop.permute.xlu1 %1287  ;;  %v4138_v31 = vld [vmem:[#allocation3 + $0x2b] sm:$0xff]  ;;  %v4403_v53 = vpack.c.bf16 %v4267_v58, %v8992_v54 }
 0x323   : > { %v1187_v46 = vpop.permute.xlu0 %1186  ;;  %v3627_v29 = vld [vmem:[#allocation2 + $0xfc] ss:$2 sm:$0xff]  ;;  %v3629_v19 = vld [vmem:[#allocation2 + $0xfd] ss:$2 sm:$0xff] }
 0x324   : > { %v3753_v49 = vpop.f32.mrb[8].mxu0  ;;  %v3630_v24 = vmax.f32 %v3627_v29, %v3629_v19  ;;  %v4146_v46 = vpack.c.bf16 %v4139_v27, %v4138_v31  ;;  %v4275_v29 = vpack.c.bf16 %v9006_v1, %v4267_v58 }
 0x325   : > { %v3853_v52 = vpop.f32.mrb[8].mxu1  ;;  %v6341_v44 = vpop.f32.mrb[9].mxu0 }
 0x326   : > { %v8961_v30 = vadd.f32 %v3853_v52, %v3753_v49  ;;  %v6365_v6 = vpop.f32.mrb[9].mxu1  ;;  %v1534_v18 = vpop.permute.xlu1 %1533  ;;  %v4141_v44 = vld [vmem:[#allocation3 + $0x43] sm:$0xff] }
 0x327   : > { %v3632_v51 = vld [vmem:[#allocation2 + $0x10e] ss:$2 sm:$0xff]  ;;  %v3634_v16 = vld [vmem:[#allocation2 + $0x10f] ss:$2 sm:$0xff]  ;;  %v3756_v43 = vpop.f32.mrb[10].mxu0  ;;  %v3856_v50 = vpop.f32.mrb[10].mxu1 }
 0x328   : > { %v3635_v41 = vmax.f32 %v3632_v51, %v3634_v16  ;;  %v1433_v12 = vpop.permute.xlu0 %1432  ;;  %v8963_v45 = vadd.f32 %v3856_v50, %v3756_v43  ;;  %v6342_v34 = vpop.f32.mrb[11].mxu0  ;;  %v4270_v6 = vld [vmem:[#allocation3 + $0x44] sm:$0xff]  ;;  %v4140_v16 = vld [vmem:[#allocation3 + $0x3b] sm:$0xff] }
 0x329   : > { %v6366_v2 = vpop.f32.mrb[11].mxu1  ;;  %v4269_v18 = vld [vmem:[#allocation3 + $0x3c] sm:$0xff] }
 0x32a   : > { %v3636_v63 = vmax.f32 %v3630_v24, %v3635_v41  ;;  %v1736_v3 = vpop.permute.xlu1 %1735  ;;  %v4147_v24 = vpack.c.bf16 %v4141_v44, %v4140_v16  ;;  %v4276_v41 = vpack.c.bf16 %v4270_v6, %v4269_v18  ;;  %v4404_v32 = vpack.c.bf16 %v4269_v18, %v9006_v1  ;;  %v4659_v18 = vld [vmem:[#allocation3 + $0x5e] sm:$0xff] }
 0x32c   : > { %3637 = vst.msk [vmem:[#allocation3 + $0x51] sm:$0xff] %vm385_vm0, %v3636_v63  ;;  %v1635_v8 = vpop.permute.xlu0 %1634 }
 0x32e   : > { %v1938_v0 = vpop.permute.xlu1 %1937 }
 0x330   : > { %v1837_v33 = vpop.permute.xlu0 %1836 }
 0x332   : > { %v2486_v61 = vpop.permute.xlu1 %2485 }
 0x333   : > { %v3885_v59 = vld [vmem:[#allocation3 + $0x4a] sm:$0xff]  ;;  %v4014_v15 = vld [vmem:[#allocation3 + $0x52] sm:$0xff]  ;;  %v4522_v61 = vld [vmem:[#allocation3 + $0x1d] sm:$0xff] }
 0x334   : > { %v2385_v55 = vpop.permute.xlu0 %2384  ;;  %v3890_v23 = vpack.c.bf16 %v3885_v59, %v8927_v11  ;;  %v4019_v7 = vpack.c.bf16 %v4014_v15, %v3885_v59  ;;  %v6740_v11 = vld [vmem:[%s9439_s3 + $0x60] sm:$0xff]   ;;  %v4142_v34 = vld [vmem:[#allocation3 + $0x4b] sm:$0xff]  ;;  %v4143_v2 = vld [vmem:[#allocation3 + $0x53] sm:$0xff] }
 0x335   : > { %v4271_v63 = vld [vmem:[#allocation3 + $0x4c] sm:$0xff]  ;;  %v4272_v3 = vld [vmem:[#allocation3 + $0x54] sm:$0xff]  ;;  %v4148_v0 = vpack.c.bf16 %v4143_v2, %v4142_v34  ;;  %v6744_v15 = vld [vmem:[%s9439_s3 + $0x80] sm:$0xff]   ;;  %v4402_v55 = vpack.c.bf16 %v4265_v42, %v8973_v25 }
 0x336   : > { %6396 = vmatmul.mubr.msk.bf16.gmra.mrb[36].mxu0 %vm385_vm0, %v3890_v23  ;;  %6420 = vmatmul.mubr.msk.bf16.gmra.mrb[36].mxu1 %vm385_vm0, %v4019_v7  ;;  %v3312_v40 = vpop.permute.xlu1 %3311  ;;  %v4277_v33 = vpack.c.bf16 %v4272_v3, %v4271_v63  ;;  %v4521_v59 = vld [vmem:[#allocation3 + $0x15] sm:$0xff]  ;;  %v6745_v7 = vld [vmem:[%s9439_s3 + $0x88] sm:$0xff]  }
 0x337   : > { %6427 = vmatprep.mubr.msk.bf16.mxu0 %vm6890_vm1, %v9699_v4  ;;  %6451 = vmatprep.mubr.msk.bf16.mxu1 %vm6890_vm1, %v9699_v4  ;;  %v4531_v23 = vpack.c.bf16 %v4522_v61, %v4521_v59  ;;  %v4524_v40 = vld [vmem:[#allocation3 + $0x2d] sm:$0xff]  ;;  %v4658_v16 = vld [vmem:[#allocation3 + $0x56] sm:$0xff] }
 0x338   : > { %v3283_v14 = vpop.permute.xlu0 %3282  ;;  %v4653_v42 = vld [vmem:[#allocation3 + $0x2e] sm:$0xff] }
 0x339   : > { %v4523_v14 = vld [vmem:[#allocation3 + $0x25] sm:$0xff]  ;;  %v4657_v1 = vld [vmem:[#allocation3 + $0x4e] sm:$0xff] }
 0x33a   : > { %v3341_v38 = vpop.permute.xlu1 %3340  ;;  %v4532_v25 = vpack.c.bf16 %v4524_v40, %v4523_v14  ;;  %v9700_v61 = vld [vmem:[#allocation37_spill] sm:$0xff]  ;;  %v9701_v14 = vld [vmem:[#allocation50_spill] sm:$0xff] }
 0x33b   : > { %v4526_v38 = vld [vmem:[#allocation3 + $0x3d] sm:$0xff] }
 0x33c   : > { %v2587_v60 = vpop.permute.xlu0 %2586 }
 0x33d   : > { %v4528_v60 = vld [vmem:[#allocation3 + $0x4d] sm:$0xff] }
 0x33e   : > { %6428 = vmatmul.mubr.msk.bf16.vlgmr.msra.gmra.mrb[40].mxu0 %vm385_vm0, %v4144_v47  ;;  %6452 = vmatmul.mubr.msk.bf16.vlgmr.msra.gmra.mrb[40].mxu1 %vm385_vm0, %v4273_v5  ;;  %v3370_v13 = vpop.permute.xlu1 %3369  ;;  %v4527_v47 = vld [vmem:[#allocation3 + $0x45] sm:$0xff]  ;;  %v4405_v5 = vpack.c.bf16 %v4271_v63, %v4270_v6 }
 0x33f   : > { %6472 = vmatpush3.bf16.msra.mxu0 %v6740_v11  ;;  %6431 = vmatprep.mubr.msk.bf16.mxu0 %vm6890_vm1, %v9699_v4  ;;  %v4533_v11 = vpack.c.bf16 %v4526_v38, %v4525_v10  ;;  %v4401_v13 = vld [vmem:[#allocation3 + $0x5c] sm:$0xff] }
 0x340   : > { %v2688_v37 = vpop.permute.xlu0 %2687  ;;  %6455 = vmatprep.mubr.msk.bf16.mxu1 %vm6890_vm1, %v9699_v4  ;;  %6473 = vmatprep.subr.bf16.mxu0 %v9699_v4  ;;  %v4406_v62 = vpack.c.bf16 %v4401_v13, %v4272_v3 }
 0x341   : > { %6496 = vmatpush3.bf16.msra.mxu1 %v6742_v39  ;;  %v4534_v39 = vpack.c.bf16 %v4528_v60, %v4527_v47  ;;  %v4530_v37 = vld [vmem:[#allocation3 + $0x5d] sm:$0xff] }
 0x342   : > { %6497 = vmatprep.subr.bf16.mxu1 %v9699_v4  ;;  %v3399_v48 = vpop.permute.xlu1 %3398 }
 0x343   : > { %6474 = vmatpush3.bf16.msra.mxu0 %v6741_v20  ;;  %v4529_v20 = vld [vmem:[#allocation3 + $0x55] sm:$0xff] }
 0x344   : > { %v2789_v17 = vpop.permute.xlu0 %2788  ;;  %6519 = vmatprep.subr.bf16.mxu0 %v9699_v4  ;;  %v4535_v54 = vpack.c.bf16 %v4530_v37, %v4529_v20  ;;  %v4650_v48 = vld [vmem:[#allocation3 + $0x16] sm:$0xff] }
 0x345   : > { %6498 = vmatpush3.bf16.msra.mxu1 %v6743_v36  ;;  %v4651_v36 = vld [vmem:[#allocation3 + $0x1e] sm:$0xff]  ;;  %v4652_v17 = vld [vmem:[#allocation3 + $0x26] sm:$0xff] }
 0x346   : > { %6432 = vmatmul.mubr.msk.bf16.gmra.mrb[44].mxu0 %vm385_vm0, %v4145_v9  ;;  %6456 = vmatmul.mubr.msk.bf16.gmra.mrb[44].mxu1 %vm385_vm0, %v4274_v22  ;;  %v3428_v56 = vpop.permute.xlu1 %3427  ;;  %v4660_v26 = vpack.c.bf16 %v4651_v36, %v4650_v48  ;;  %v4661_v9 = vpack.c.bf16 %v4653_v42, %v4652_v17  ;;  %v4654_v22 = vld [vmem:[#allocation3 + $0x36] sm:$0xff] }
 0x347   : > { %6435 = vmatprep.mubr.msk.bf16.mxu0 %vm6890_vm1, %v9699_v4  ;;  %6459 = vmatprep.mubr.msk.bf16.mxu1 %vm6890_vm1, %v9699_v4  ;;  %v4655_v56 = vld [vmem:[#allocation3 + $0x3e] sm:$0xff] }
 0x348   : > { %v2890_v21 = vpop.permute.xlu0 %2889 }
 0x349   : > { %v4662_v21 = vpack.c.bf16 %v4655_v56, %v4654_v22 }
 0x34a   : > { %v2991_v57 = vpop.permute.xlu1 %2990 }
 0x34c   : > { %v2039_v19 = vpop.permute.xlu0 %2038 }
 0x34e   : > { %6436 = vmatmul.mubr.msk.bf16.gmra.mrb[48].mxu0 %vm385_vm0, %v4146_v46  ;;  %6460 = vmatmul.mubr.msk.bf16.gmra.mrb[48].mxu1 %vm385_vm0, %v4275_v29  ;;  %v2140_v49 = vpop.permute.xlu1 %2139 }
 0x34f   : > { %6439 = vmatprep.mubr.msk.bf16.mxu0 %vm6890_vm1, %v9699_v4  ;;  %6463 = vmatprep.mubr.msk.bf16.mxu1 %vm6890_vm1, %v9699_v4  ;;  %v4656_v49 = vld [vmem:[#allocation3 + $0x46] sm:$0xff] }
 0x350   : > { %v3457_v52 = vpop.permute.xlu0 %3456 }
 0x352   : > { %v3486_v51 = vpop.permute.xlu1 %3485 }
 0x353   : > { %v4663_v51 = vpack.c.bf16 %v4657_v1, %v4656_v49 }
 0x354   : > { %v3092_v43 = vpop.permute.xlu0 %3091 }
 0x355   : > { %v4664_v43 = vpack.c.bf16 %v4659_v18, %v4658_v16 }
 0x356   : > { %6440 = vmatmul.mubr.msk.bf16.gmra.mrb[52].mxu0 %vm385_vm0, %v4147_v24  ;;  %6464 = vmatmul.mubr.msk.bf16.gmra.mrb[52].mxu1 %vm385_vm0, %v4276_v41  ;;  %v3193_v50 = vpop.permute.xlu1 %3192 }
 0x357   : > { %6443 = vmatprep.mubr.msk.bf16.mxu0 %vm6890_vm1, %v9699_v4  ;;  %6467 = vmatprep.mubr.msk.bf16.mxu1 %vm6890_vm1, %v9699_v4 }
 0x358   : > { %v2241_v12 = vpop.permute.xlu0 %2240 }
 0x35c   : > { %v3515_v8 = vpop.permute.xlu0 %3514 }
 0x35e   : > { %6444 = vmatmul.mubr.msk.bf16.gmra.mrb[56].mxu0 %vm385_vm0, %v4148_v0  ;;  %6468 = vmatmul.mubr.msk.bf16.gmra.mrb[56].mxu1 %vm385_vm0, %v4277_v33 }
 0x35f   : > { %6475 = vmatprep.mubr.msk.bf16.mxu0 %vm6890_vm1, %v9699_v4  ;;  %6499 = vmatprep.mubr.msk.bf16.mxu1 %vm6890_vm1, %v9699_v4 }
 0x366   : > { %6476 = vmatmul.mubr.msk.bf16.vlgmr.msra.gmra.mrb[60].mxu0 %vm385_vm0, %v4402_v55  ;;  %6500 = vmatmul.mubr.msk.bf16.vlgmr.msra.gmra.mrb[60].mxu1 %vm385_vm0, %v4531_v23 }
 0x367   : > { %6520 = vmatpush3.bf16.msra.mxu0 %v6744_v15  ;;  %6479 = vmatprep.mubr.msk.bf16.mxu0 %vm6890_vm1, %v9699_v4 }
 0x368   : > { %6503 = vmatprep.mubr.msk.bf16.mxu1 %vm6890_vm1, %v9699_v4  ;;  %6521 = vmatprep.subr.bf16.mxu0 %v9699_v4 }
 0x36b   : > { %6522 = vmatpush3.bf16.msra.mxu0 %v6745_v7 }
 0x36e   : > { %6480 = vmatmul.mubr.msk.bf16.gmra.mrb[64].mxu0 %vm385_vm0, %v4403_v53  ;;  %6504 = vmatmul.mubr.msk.bf16.gmra.mrb[64].mxu1 %vm385_vm0, %v4532_v25 }
 0x36f   : > { %6483 = vmatprep.mubr.msk.bf16.mxu0 %vm6890_vm1, %v9699_v4  ;;  %6507 = vmatprep.mubr.msk.bf16.mxu1 %vm6890_vm1, %v9699_v4 }
 0x376   : > { %6484 = vmatmul.mubr.msk.bf16.gmra.mrb[68].mxu0 %vm385_vm0, %v4404_v32  ;;  %6508 = vmatmul.mubr.msk.bf16.gmra.mrb[68].mxu1 %vm385_vm0, %v4533_v11 }
 0x377   : > { %6487 = vmatprep.mubr.msk.bf16.mxu0 %vm6890_vm1, %v9699_v4  ;;  %6511 = vmatprep.mubr.msk.bf16.mxu1 %vm6890_vm1, %v9699_v4 }
 0x37e   : > { %6488 = vmatmul.mubr.msk.bf16.gmra.mrb[72].mxu0 %vm385_vm0, %v4405_v5  ;;  %6512 = vmatmul.mubr.msk.bf16.gmra.mrb[72].mxu1 %vm385_vm0, %v4534_v39 }
 0x37f   : > { %6491 = vmatprep.mubr.msk.bf16.mxu0 %vm6890_vm1, %v9699_v4  ;;  %6515 = vmatprep.mubr.msk.bf16.mxu1 %vm6890_vm1, %v9699_v4 }
 0x386   : > { %6492 = vmatmul.mubr.msk.bf16.gmra.mrb[76].mxu0 %vm385_vm0, %v4406_v62  ;;  %6516 = vmatmul.mubr.msk.bf16.gmra.mrb[76].mxu1 %vm385_vm0, %v4535_v54 }
 0x387   : > { %6523 = vmatprep.mubr.msk.bf16.mxu0 %vm6890_vm1, %v9699_v4 }
 0x38e   : > { %6524 = vmatmul.mubr.msk.bf16.vlgmr.msra.gmra.mrb[80].mxu0 %vm385_vm0, %v4660_v26 }
 0x38f   : > { %6527 = vmatprep.mubr.msk.bf16.mxu0 %vm6890_vm1, %v9699_v4 }
 0x396   : > { %6528 = vmatmul.mubr.msk.bf16.gmra.mrb[84].mxu0 %vm385_vm0, %v4661_v9 }
 0x397   : > { %6531 = vmatprep.mubr.msk.bf16.mxu0 %vm6890_vm1, %v9699_v4 }
 0x39e   : > { %6532 = vmatmul.mubr.msk.bf16.gmra.mrb[88].mxu0 %vm385_vm0, %v4662_v21 }
 0x39f   : > { %6535 = vmatprep.mubr.msk.bf16.mxu0 %vm6890_vm1, %v9699_v4 }
 0x3a1   : > { %v3761_v27 = vpop.f32.mrb[12].mxu0 }
 0x3a2   : > { %v3861_v58 = vpop.f32.mrb[12].mxu1  ;;  %v6345_v57 = vpop.f32.mrb[13].mxu0 }
 0x3a3   : > { %v9074_v31 = vadd.f32 %v3861_v58, %v3761_v27  ;;  %v6369_v46 = vpop.f32.mrb[13].mxu1  ;;  %v3764_v29 = vpop.f32.mrb[14].mxu0 }
 0x3a4   : > { %v3864_v19 = vpop.f32.mrb[14].mxu1  ;;  %v6346_v44 = vpop.f32.mrb[15].mxu0 }
 0x3a5   : > { %v9076_v52 = vadd.f32 %v3864_v19, %v3764_v29  ;;  %v6370_v6 = vpop.f32.mrb[15].mxu1 }
 0x3a6   : > { %6536 = vmatmul.mubr.msk.bf16.gmra.mrb[92].mxu0 %vm385_vm0, %v4663_v51 }
 0x3a7   : > { %6539 = vmatprep.mubr.msk.bf16.mxu0 %vm6890_vm1, %v9699_v4 }
 0x3ae   : > { %6540 = vmatmul.mubr.msk.bf16.gmra.mrb[96].mxu0 %vm385_vm0, %v4664_v43  ;;  %v6746_v43 = vld [vmem:[%s9441_s5 + $0x20] sm:$0xff]  }
 0x3af   : > { %6543 = vmatprep.subr.bf16.mxu1 %v6746_v43 }
 0x3b0   : > { %6544 = vmatpush3.bf16.msra.mxu1 %v6746_v43 }
 0x3c1   : > { %v3769_v24 = vpop.f32.mrb[16].mxu0 }
 0x3c2   : > { %v3869_v41 = vpop.f32.mrb[16].mxu1  ;;  %v6349_v50 = vpop.f32.mrb[17].mxu0 }
 0x3c3   : > { %v9082_v12 = vadd.f32 %v3869_v41, %v3769_v24  ;;  %v6373_v34 = vpop.f32.mrb[17].mxu1  ;;  %v3772_v2 = vpop.f32.mrb[18].mxu0 }
 0x3c4   : > { %v3872_v63 = vpop.f32.mrb[18].mxu1  ;;  %v6350_v3 = vpop.f32.mrb[19].mxu0 }
 0x3c5   : > { %v9084_v8 = vadd.f32 %v3872_v63, %v3772_v2  ;;  %v6374_v0 = vpop.f32.mrb[19].mxu1 }
 0x3c9   : > { %v3956_v33 = vpop.f32.mrb[20].mxu0 }
 0x3ca   : > { %v3995_v59 = vadd.f32 %v3956_v33, %v9700_v61  ;;  %v4085_v15 = vpop.f32.mrb[20].mxu1  ;;  %v6381_v55 = vpop.f32.mrb[21].mxu0 }
 0x3cb   : > { %v6405_v23 = vpop.f32.mrb[21].mxu1  ;;  %v3959_v7 = vpop.f32.mrb[22].mxu0 }
 0x3cc   : > { %v9087_v40 = vadd.f32 %v4085_v15, %v3995_v59  ;;  %v3996_v53 = vadd.f32 %v3959_v7, %v9701_v14  ;;  %v4088_v25 = vpop.f32.mrb[22].mxu1  ;;  %v6382_v38 = vpop.f32.mrb[23].mxu0  ;;  %v6748_v23 = vld [vmem:[%s9441_s5 + $0x30] sm:$0xff]  }
 0x3cd   : > { %v6406_v10 = vpop.f32.mrb[23].mxu1 }
 0x3ce   : > { %v9090_v32 = vadd.f32 %v4088_v25, %v3996_v53 }
 0x3d1   : > { %v3964_v11 = vpop.f32.mrb[24].mxu0 }
 0x3d2   : > { %v3997_v60 = vadd.f32 %v3964_v11, %v8677_v35  ;;  %v4093_v47 = vpop.f32.mrb[24].mxu1  ;;  %v6385_v5 = vpop.f32.mrb[25].mxu0 }
 0x3d3   : > { %v6409_v39 = vpop.f32.mrb[25].mxu1  ;;  %v3967_v13 = vpop.f32.mrb[26].mxu0 }
 0x3d4   : > { %v9093_v20 = vadd.f32 %v4093_v47, %v3997_v60  ;;  %v3998_v37 = vadd.f32 %v3967_v13, %v8687_v28  ;;  %v4096_v62 = vpop.f32.mrb[26].mxu1  ;;  %v6386_v54 = vpop.f32.mrb[27].mxu0  ;;  %v6749_v47 = vld [vmem:[%s9441_s5 + $0x38] sm:$0xff]   ;;  %v6753_v39 = vld [vmem:[%s9441_s5 + $0x70] sm:$0xff]  }
 0x3d5   : > { %v6410_v36 = vpop.f32.mrb[27].mxu1 }
 0x3d6   : > { %v9096_v48 = vadd.f32 %v4096_v62, %v3998_v37 }
 0x3d9   : > { %v3972_v26 = vpop.f32.mrb[28].mxu0 }
 0x3da   : > { %v3999_v42 = vadd.f32 %v3972_v26, %v8961_v30  ;;  %v4101_v17 = vpop.f32.mrb[28].mxu1  ;;  %v6389_v9 = vpop.f32.mrb[29].mxu0 }
 0x3db   : > { %v6413_v22 = vpop.f32.mrb[29].mxu1  ;;  %v3975_v35 = vpop.f32.mrb[30].mxu0 }
 0x3dc   : > { %v9099_v56 = vadd.f32 %v4101_v17, %v3999_v42  ;;  %v4000_v21 = vadd.f32 %v3975_v35, %v8963_v45  ;;  %v4104_v27 = vpop.f32.mrb[30].mxu1  ;;  %v6390_v58 = vpop.f32.mrb[31].mxu0 }
 0x3dd   : > { %v6414_v1 = vpop.f32.mrb[31].mxu1 }
 0x3de   : > { %v9102_v28 = vadd.f32 %v4104_v27, %v4000_v21  ;;  %v6755_v21 = vld [vmem:[%s9441_s5 + $0x78] sm:$0xff]  }
 0x3e1   : > { %v3980_v30 = vpop.f32.mrb[32].mxu0 }
 0x3e2   : > { %v4001_v45 = vadd.f32 %v3980_v30, %v9074_v31  ;;  %v4109_v57 = vpop.f32.mrb[32].mxu1  ;;  %v6393_v46 = vpop.f32.mrb[33].mxu0  ;;  %v6747_v31 = vld [vmem:[%s9441_s5 + $0x28] sm:$0xff]  }
 0x3e3   : > { %v6417_v29 = vpop.f32.mrb[33].mxu1  ;;  %v3983_v19 = vpop.f32.mrb[34].mxu0  ;;  %6545 = vmatprep.subr.bf16.mxu1 %v6747_v31 }
 0x3e4   : > { %v9115_v49 = vadd.f32 %v4109_v57, %v4001_v45  ;;  %v4002_v44 = vadd.f32 %v3983_v19, %v9076_v52  ;;  %v4112_v6 = vpop.f32.mrb[34].mxu1  ;;  %v6394_v51 = vpop.f32.mrb[35].mxu0  ;;  %6546 = vmatpush3.bf16.msra.mxu1 %v6747_v31 }
 0x3e5   : > { %v6418_v16 = vpop.f32.mrb[35].mxu1  ;;  %6547 = vmatprep.subr.bf16.mxu1 %v6748_v23 }
 0x3e6   : > { %v9118_v18 = vadd.f32 %v4112_v6, %v4002_v44 }
 0x3e8   : > { %6548 = vmatpush3.bf16.msra.mxu1 %v6748_v23 }
 0x3e9   : > { %6549 = vmatprep.subr.bf16.mxu1 %v6749_v47 }
 0x3ec   : > { %6550 = vmatpush3.bf16.msra.mxu1 %v6749_v47 }
 0x409   : > { %v3988_v24 = vpop.f32.mrb[36].mxu0  ;;  %v4117_v52 = vpop.f32.mrb[36].mxu1 }
 0x40a   : > { %v4003_v41 = vadd.f32 %v3988_v24, %v9082_v12  ;;  %v6397_v50 = vpop.f32.mrb[37].mxu0  ;;  %v6421_v34 = vpop.f32.mrb[37].mxu1  ;;  %v6750_v12 = vld [vmem:[%s9441_s5 + $0x60] sm:$0xff]  }
 0x40b   : > { %v3991_v2 = vpop.f32.mrb[38].mxu0  ;;  %v4120_v63 = vpop.f32.mrb[38].mxu1  ;;  %6579 = vmatprep.subr.bf16.mxu0 %v6750_v12 }
 0x40c   : > { %v9127_v3 = vadd.f32 %v4117_v52, %v4003_v41  ;;  %v4004_v0 = vadd.f32 %v3991_v2, %v9084_v8  ;;  %v6398_v33 = vpop.f32.mrb[39].mxu0  ;;  %v6422_v61 = vpop.f32.mrb[39].mxu1  ;;  %6580 = vmatpush3.bf16.msra.mxu0 %v6750_v12 }
 0x40e   : > { %v9130_v59 = vadd.f32 %v4120_v63, %v4004_v0 }
 0x411   : > { %v4214_v15 = vpop.f32.mrb[40].mxu0  ;;  %v4343_v55 = vpop.f32.mrb[40].mxu1 }
 0x412   : > { %v4253_v7 = vadd.f32 %v4214_v15, %v9087_v40  ;;  %v6429_v14 = vpop.f32.mrb[41].mxu0  ;;  %v6453_v53 = vpop.f32.mrb[41].mxu1  ;;  %v6751_v40 = vld [vmem:[%s9441_s5 + $0x68] sm:$0xff]  }
 0x413   : > { %v4217_v25 = vpop.f32.mrb[42].mxu0  ;;  %v4346_v8 = vpop.f32.mrb[42].mxu1  ;;  %6581 = vmatprep.subr.bf16.mxu0 %v6751_v40 }
 0x414   : > { %v9139_v38 = vadd.f32 %v4343_v55, %v4253_v7  ;;  %v4254_v10 = vadd.f32 %v4217_v25, %v9090_v32  ;;  %v6430_v11 = vpop.f32.mrb[43].mxu0  ;;  %v6454_v60 = vpop.f32.mrb[43].mxu1  ;;  %v9153_v32 = vld [vmem:[%s9441_s5] sm:$0xff]   ;;  %6582 = vmatpush3.bf16.msra.mxu0 %v6751_v40 }
 0x415   : > { %6555 = vmatprep.subr.bf16.mxu1 %v9153_v32  ;;  %6583 = vmatprep.subr.bf16.mxu0 %v6753_v39 }
 0x416   : > { %v9148_v5 = vadd.f32 %v4346_v8, %v4254_v10 }
 0x418   : > { %6584 = vmatpush3.bf16.msra.mxu0 %v6753_v39 }
 0x419   : > { %v4222_v13 = vpop.f32.mrb[44].mxu0  ;;  %v4351_v37 = vpop.f32.mrb[44].mxu1  ;;  %6585 = vmatprep.subr.bf16.mxu0 %v6755_v21 }
 0x41a   : > { %v4255_v62 = vadd.f32 %v4222_v13, %v9093_v20  ;;  %v6433_v54 = vpop.f32.mrb[45].mxu0  ;;  %v6457_v36 = vpop.f32.mrb[45].mxu1  ;;  %v9167_v20 = vld [vmem:[%s9441_s5 + $0xa0] sm:$0xff]  }
 0x41b   : > { %v4225_v26 = vpop.f32.mrb[46].mxu0  ;;  %v4354_v42 = vpop.f32.mrb[46].mxu1 }
 0x41c   : > { %v4384_v17 = vadd.f32 %v4351_v37, %v4255_v62  ;;  %v4256_v9 = vadd.f32 %v4225_v26, %v9096_v48  ;;  %v6434_v22 = vpop.f32.mrb[47].mxu0  ;;  %v6458_v35 = vpop.f32.mrb[47].mxu1  ;;  %6586 = vmatpush3.bf16.msra.mxu0 %v6755_v21 }
 0x41d   : > { %6603 = vmatprep.subr.bf16.mxu0 %v9167_v20 }
 0x41e   : > { %v4385_v27 = vadd.f32 %v4354_v42, %v4256_v9 }
 0x421   : > { %v4230_v58 = vpop.f32.mrb[48].mxu0  ;;  %v4359_v1 = vpop.f32.mrb[48].mxu1 }
 0x422   : > { %v4257_v30 = vadd.f32 %v4230_v58, %v9099_v56  ;;  %v6437_v48 = vpop.f32.mrb[49].mxu0  ;;  %v6461_v45 = vpop.f32.mrb[49].mxu1 }
 0x423   : > { %v4233_v57 = vpop.f32.mrb[50].mxu0  ;;  %v4362_v46 = vpop.f32.mrb[50].mxu1 }
 0x424   : > { %v4386_v29 = vadd.f32 %v4359_v1, %v4257_v30  ;;  %v4258_v19 = vadd.f32 %v4233_v57, %v9102_v28  ;;  %v6438_v44 = vpop.f32.mrb[51].mxu0  ;;  %v6462_v6 = vpop.f32.mrb[51].mxu1 }
 0x426   : > { %v4387_v51 = vadd.f32 %v4362_v46, %v4258_v19 }
 0x429   : > { %v4238_v16 = vpop.f32.mrb[52].mxu0  ;;  %v4367_v43 = vpop.f32.mrb[52].mxu1 }
 0x42a   : > { %v4259_v31 = vadd.f32 %v4238_v16, %v9115_v49  ;;  %v6441_v24 = vpop.f32.mrb[53].mxu0  ;;  %v6465_v52 = vpop.f32.mrb[53].mxu1 }
 0x42b   : > { %v4241_v41 = vpop.f32.mrb[54].mxu0  ;;  %v4370_v56 = vpop.f32.mrb[54].mxu1 }
 0x42c   : > { %v4388_v50 = vadd.f32 %v4367_v43, %v4259_v31  ;;  %v4260_v34 = vadd.f32 %v4241_v41, %v9118_v18  ;;  %v6442_v2 = vpop.f32.mrb[55].mxu0  ;;  %v6466_v63 = vpop.f32.mrb[55].mxu1 }
 0x42e   : > { %v4389_v0 = vadd.f32 %v4370_v56, %v4260_v34 }
 0x431   : > { %v4246_v33 = vpop.f32.mrb[56].mxu0  ;;  %v4375_v61 = vpop.f32.mrb[56].mxu1 }
 0x432   : > { %v4261_v28 = vadd.f32 %v4246_v33, %v9127_v3  ;;  %v6445_v15 = vpop.f32.mrb[57].mxu0  ;;  %v6469_v55 = vpop.f32.mrb[57].mxu1 }
 0x433   : > { %v4249_v23 = vpop.f32.mrb[58].mxu0  ;;  %v4378_v12 = vpop.f32.mrb[58].mxu1 }
 0x434   : > { %v4390_v7 = vadd.f32 %v4375_v61, %v4261_v28  ;;  %v4262_v49 = vadd.f32 %v4249_v23, %v9130_v59  ;;  %v6446_v14 = vpop.f32.mrb[59].mxu0  ;;  %v6470_v53 = vpop.f32.mrb[59].mxu1 }
 0x436   : > { %v4391_v25 = vadd.f32 %v4378_v12, %v4262_v49 }
 0x439   : > { %v4472_v8 = vpop.f32.mrb[60].mxu0  ;;  %v4601_v10 = vpop.f32.mrb[60].mxu1 }
 0x43a   : > { %v4511_v18 = vadd.f32 %v4472_v8, %v9139_v38  ;;  %v6477_v11 = vpop.f32.mrb[61].mxu0  ;;  %v6501_v60 = vpop.f32.mrb[61].mxu1 }
 0x43b   : > { %v4475_v47 = vpop.f32.mrb[62].mxu0  ;;  %v4604_v40 = vpop.f32.mrb[62].mxu1 }
 0x43c   : > { %v4640_v39 = vadd.f32 %v4601_v10, %v4511_v18  ;;  %v4512_v3 = vadd.f32 %v4475_v47, %v9148_v5  ;;  %v6478_v13 = vpop.f32.mrb[63].mxu0  ;;  %v6502_v37 = vpop.f32.mrb[63].mxu1 }
 0x43e   : > { %v4641_v62 = vadd.f32 %v4604_v40, %v4512_v3 }
 0x441   : > { %v4480_v54 = vpop.f32.mrb[64].mxu0  ;;  %v4609_v36 = vpop.f32.mrb[64].mxu1 }
 0x442   : > { %v4513_v59 = vadd.f32 %v4480_v54, %v4384_v17  ;;  %v6481_v26 = vpop.f32.mrb[65].mxu0  ;;  %v6505_v42 = vpop.f32.mrb[65].mxu1 }
 0x443   : > { %v4483_v9 = vpop.f32.mrb[66].mxu0  ;;  %v4612_v22 = vpop.f32.mrb[66].mxu1 }
 0x444   : > { %v4642_v35 = vadd.f32 %v4609_v36, %v4513_v59  ;;  %v4514_v21 = vadd.f32 %v4483_v9, %v4385_v27  ;;  %v6482_v38 = vpop.f32.mrb[67].mxu0  ;;  %v6506_v58 = vpop.f32.mrb[67].mxu1 }
 0x446   : > { %v4643_v1 = vadd.f32 %v4612_v22, %v4514_v21 }
 0x449   : > { %v4488_v30 = vpop.f32.mrb[68].mxu0  ;;  %v4617_v48 = vpop.f32.mrb[68].mxu1 }
 0x44a   : > { %v4515_v45 = vadd.f32 %v4488_v30, %v4386_v29  ;;  %v6485_v57 = vpop.f32.mrb[69].mxu0  ;;  %v6509_v5 = vpop.f32.mrb[69].mxu1 }
 0x44b   : > { %v4491_v46 = vpop.f32.mrb[70].mxu0  ;;  %v4620_v19 = vpop.f32.mrb[70].mxu1 }
 0x44c   : > { %v4644_v44 = vadd.f32 %v4617_v48, %v4515_v45  ;;  %v4516_v6 = vadd.f32 %v4491_v46, %v4387_v51  ;;  %v6486_v16 = vpop.f32.mrb[71].mxu0  ;;  %v6510_v17 = vpop.f32.mrb[71].mxu1 }
 0x44e   : > { %v4645_v43 = vadd.f32 %v4620_v19, %v4516_v6 }
 0x451   : > { %v4496_v31 = vpop.f32.mrb[72].mxu0  ;;  %v4625_v24 = vpop.f32.mrb[72].mxu1 }
 0x452   : > { %v4517_v52 = vadd.f32 %v4496_v31, %v4388_v50  ;;  %v6489_v41 = vpop.f32.mrb[73].mxu0  ;;  %v6513_v27 = vpop.f32.mrb[73].mxu1 }
 0x453   : > { %v4499_v56 = vpop.f32.mrb[74].mxu0  ;;  %v4628_v34 = vpop.f32.mrb[74].mxu1 }
 0x454   : > { %v4646_v2 = vadd.f32 %v4625_v24, %v4517_v52  ;;  %v4518_v63 = vadd.f32 %v4499_v56, %v4389_v0  ;;  %v6490_v33 = vpop.f32.mrb[75].mxu0  ;;  %v6514_v29 = vpop.f32.mrb[75].mxu1  ;;  %v9187_v0 = vld [vmem:[%s9440_s4] ss:$0 sm:$0xff] }
 0x456   : > { %v9178_v61 = vadd.f32 %v4628_v34, %v4518_v63 }
 0x459   : > { %v4504_v28 = vpop.f32.mrb[76].mxu0  ;;  %v4633_v15 = vpop.f32.mrb[76].mxu1 }
 0x45a   : > { %v4519_v55 = vadd.f32 %v4504_v28, %v4390_v7  ;;  %v6493_v51 = vpop.f32.mrb[77].mxu0  ;;  %v6517_v23 = vpop.f32.mrb[77].mxu1 }
 0x45b   : > { %v4507_v12 = vpop.f32.mrb[78].mxu0  ;;  %v4636_v49 = vpop.f32.mrb[78].mxu1 }
 0x45c   : > { %v9180_v14 = vadd.f32 %v4633_v15, %v4519_v55  ;;  %v4520_v50 = vadd.f32 %v4507_v12, %v4391_v25  ;;  %v6494_v53 = vpop.f32.mrb[79].mxu0  ;;  %v6518_v8 = vpop.f32.mrb[79].mxu1 }
 0x45e   : > { %v9182_v10 = vadd.f32 %v4636_v49, %v4520_v50 }
 0x461   : > { %v4730_v18 = vpop.f32.mrb[80].mxu0 }
 0x462   : > { %v4769_v11 = vadd.f32 %v4730_v18, %v4640_v39  ;;  %v6525_v60 = vpop.f32.mrb[81].mxu0 }
 0x463   : > { %v4733_v7 = vpop.f32.mrb[82].mxu0 }
 0x464   : > { %v4786_v47 = vadd.f32 %v9187_v0, %v4769_v11  ;;  %v4770_v40 = vadd.f32 %v4733_v7, %v4641_v62  ;;  %v6526_v3 = vpop.f32.mrb[83].mxu0 }
 0x466   : > { %v4796_v13 = vmax.f32 %v4786_v47, 0.0  ;;  %v4787_v25 = vadd.f32 %v9187_v0, %v4770_v40 }
 0x468   : > { %4806 = vst.msk [vmem:[#allocation4] sm:$0xff] %vm401_vm2, %v4796_v13  ;;  %v4797_v37 = vmax.f32 %v4787_v25, 0.0 }
 0x469   : > { %v4738_v54 = vpop.f32.mrb[84].mxu0 }
 0x46a   : > { %4807 = vst.msk [vmem:[#allocation4 + $0x8] sm:$0xff] %vm401_vm2, %v4797_v37  ;;  %v4771_v36 = vadd.f32 %v4738_v54, %v4642_v35  ;;  %v6529_v59 = vpop.f32.mrb[85].mxu0 }
 0x46b   : > { %v4741_v26 = vpop.f32.mrb[86].mxu0 }
 0x46c   : > { %v4788_v39 = vadd.f32 %v9187_v0, %v4771_v36  ;;  %v4772_v42 = vadd.f32 %v4741_v26, %v4643_v1  ;;  %v6530_v9 = vpop.f32.mrb[87].mxu0 }
 0x46e   : > { %v4798_v22 = vmax.f32 %v4788_v39, 0.0  ;;  %v4789_v62 = vadd.f32 %v9187_v0, %v4772_v42 }
 0x46f   : > { %v4816_v5 = vld [vmem:[#allocation4] ss:$2 sm:$0xf]  ;;  %v4818_v46 = vld [vmem:[#allocation4 + $0x1] ss:$2 sm:$0xf] }
 0x470   : > { %4808 = vst.msk [vmem:[#allocation4 + $0x10] sm:$0xff] %vm401_vm2, %v4798_v22  ;;  %v4799_v21 = vmax.f32 %v4789_v62, 0.0  ;;  %v4819_v17 = vmax.f32 %v4816_v5, %v4818_v46  ;;  %v6754_v5 = vld [vmem:[%s9441_s5 + $0x8] sm:$0xff]  }
 0x471   : > { %v4746_v38 = vpop.f32.mrb[88].mxu0 }
 0x472   : > { %4809 = vst.msk [vmem:[#allocation4 + $0x18] sm:$0xff] %vm401_vm2, %v4799_v21  ;;  %v4773_v58 = vadd.f32 %v4746_v38, %v4644_v44  ;;  %v6533_v30 = vpop.f32.mrb[89].mxu0 }
 0x473   : > { %v4749_v48 = vpop.f32.mrb[90].mxu0 }
 0x474   : > { %v4790_v35 = vadd.f32 %v9187_v0, %v4773_v58  ;;  %v4774_v45 = vadd.f32 %v4749_v48, %v4645_v43  ;;  %v6534_v57 = vpop.f32.mrb[91].mxu0 }
 0x476   : > { %v4800_v1 = vmax.f32 %v4790_v35, 0.0  ;;  %v4791_v19 = vadd.f32 %v9187_v0, %v4774_v45 }
 0x477   : > { %v4821_v6 = vld [vmem:[#allocation4 + $0xa] ss:$2 sm:$0xf]  ;;  %v4823_v16 = vld [vmem:[#allocation4 + $0xb] ss:$2 sm:$0xf] }
 0x478   : > { %v4824_v31 = vmax.f32 %v4821_v6, %v4823_v16  ;;  %4810 = vst.msk [vmem:[#allocation4 + $0x20] sm:$0xff] %vm401_vm2, %v4800_v1  ;;  %v4801_v24 = vmax.f32 %v4791_v19, 0.0  ;;  %v6756_v1 = vld [vmem:[%s9441_s5 + $0x10] sm:$0xff]  }
 0x479   : > { %v4754_v44 = vpop.f32.mrb[92].mxu0  ;;  %v4828_v43 = vld [vmem:[#allocation4 + $0x14] ss:$2 sm:$0xf] }
 0x47a   : > { %v4825_v52 = vmax.f32 %v4819_v17, %v4824_v31  ;;  %4811 = vst.msk [vmem:[#allocation4 + $0x28] sm:$0xff] %vm401_vm2, %v4801_v24  ;;  %v4775_v41 = vadd.f32 %v4754_v44, %v4646_v2  ;;  %v6537_v27 = vpop.f32.mrb[93].mxu0  ;;  %v4830_v34 = vld [vmem:[#allocation4 + $0x15] ss:$2 sm:$0xf]  ;;  %v6758_v31 = vld [vmem:[%s9441_s5 + $0x18] sm:$0xff]  }
 0x47b   : > { %v4757_v56 = vpop.f32.mrb[94].mxu0  ;;  %v4831_v51 = vmax.f32 %v4828_v43, %v4830_v34  ;;  %v6759_v17 = vld [vmem:[%s9441_s5 + $0xa8] sm:$0xff]   ;;  %v6761_v24 = vld [vmem:[%s9441_s5 + $0xb0] sm:$0xff]   ;;  %v6763_v43 = vld [vmem:[%s9441_s5 + $0xb8] sm:$0xff]  }
 0x47c   : > { %4826 = vst.msk [vmem:[#allocation5 + $0x7] sm:$0xf] %vm407_vm3, %v4825_v52  ;;  %v4792_v63 = vadd.f32 %v9187_v0, %v4775_v41  ;;  %v4776_v33 = vadd.f32 %v4757_v56, %v9178_v61  ;;  %v6538_v29 = vpop.f32.mrb[95].mxu0  ;;  %v6760_v52 = vld [vmem:[%s9441_s5 + $0x40] sm:$0xff]   ;;  %v6762_v27 = vld [vmem:[%s9441_s5 + $0x48] sm:$0xff]  }
 0x47d   : > { %v6771_v34 = vld [vmem:[%s9441_s5 + $0xe0] sm:$0xff]  }
 0x47e   : > { %v4793_v55 = vadd.f32 %v9187_v0, %v4776_v33  ;;  %v4802_v12 = vmax.f32 %v4792_v63, 0.0  ;;  %v6764_v63 = vld [vmem:[%s9441_s5 + $0x50] sm:$0xff]  }
 0x47f   : > { %v4833_v28 = vld [vmem:[#allocation4 + $0x1e] ss:$2 sm:$0xf]  ;;  %v4835_v15 = vld [vmem:[#allocation4 + $0x1f] ss:$2 sm:$0xf] }
 0x480   : > { %v4836_v23 = vmax.f32 %v4833_v28, %v4835_v15  ;;  %4812 = vst.msk [vmem:[#allocation4 + $0x30] sm:$0xff] %vm401_vm2, %v4802_v12  ;;  %v4803_v2 = vmax.f32 %v4793_v55, 0.0  ;;  %v6773_v55 = vld [vmem:[%s9441_s5 + $0xe8] sm:$0xff]   ;;  %v6775_v12 = vld [vmem:[%s9441_s5 + $0xf0] sm:$0xff]  }
 0x481   : > { %v4762_v50 = vpop.f32.mrb[96].mxu0  ;;  %v4840_v40 = vld [vmem:[#allocation4 + $0x28] ss:$2 sm:$0xf] }
 0x482   : > { %v4837_v49 = vmax.f32 %v4831_v51, %v4836_v23  ;;  %v4777_v53 = vadd.f32 %v4762_v50, %v9180_v14  ;;  %v6541_v8 = vpop.f32.mrb[97].mxu0  ;;  %4813 = vst.msk [vmem:[#allocation4 + $0x38] sm:$0xff] %vm401_vm2, %v4803_v2  ;;  %v4842_v3 = vld [vmem:[#allocation4 + $0x29] ss:$2 sm:$0xf] }
 0x483   : > { %v4765_v61 = vpop.f32.mrb[98].mxu0  ;;  %v4843_v37 = vmax.f32 %v4840_v40, %v4842_v3  ;;  %v4876_v36 = vld [vmem:[#allocation5 + $0x1] sm:$0xff]  ;;  %v6765_v23 = vld [vmem:[%s9441_s5 + $0x58] sm:$0xff]  }
 0x484   : > { %4838 = vst.msk [vmem:[#allocation5 + $0xd] sm:$0xf] %vm407_vm3, %v4837_v49  ;;  %v4794_v18 = vadd.f32 %v9187_v0, %v4777_v53  ;;  %v4778_v11 = vadd.f32 %v4765_v61, %v9182_v10  ;;  %v6542_v60 = vpop.f32.mrb[99].mxu0  ;;  %v4863_v57 = vld [vmem:[#allocation5] sm:$0xff]  ;;  %v6767_v61 = vld [vmem:[%s9441_s5 + $0x88] sm:$0xff]   ;;  %v6769_v40 = vld [vmem:[%s9441_s5 + $0x98] sm:$0xff]  }
 0x485   : > { %v6766_v49 = vld [vmem:[%s9441_s5 + $0x80] sm:$0xff]  }
 0x486   : > { %v4804_v7 = vmax.f32 %v4794_v18, 0.0  ;;  %v4795_v47 = vadd.f32 %v9187_v0, %v4778_v11  ;;  %v6777_v18 = vld [vmem:[%s9441_s5 + $0xf8] sm:$0xff]   ;;  %v6770_v3 = vld [vmem:[%s9441_s5 + $0xc0] sm:$0xff]  }
 0x487   : > { %v5517_v60 = vld [vmem:[#allocation5 + $0x1d] sm:$0xff] }
 0x488   : > { %4814 = vst.msk [vmem:[#allocation4 + $0x40] sm:$0xff] %vm401_vm2, %v4804_v7  ;;  %v4805_v13 = vmax.f32 %v4795_v47, 0.0  ;;  %v6768_v7 = vld [vmem:[%s9441_s5 + $0x90] sm:$0xff]   ;;  %v5519_v47 = vpack.c.bf16 %v5517_v60, %v5517_v60 }
 0x489   : > { %v4845_v14 = vld [vmem:[#allocation4 + $0x32] ss:$2 sm:$0xf]  ;;  %v4847_v25 = vld [vmem:[#allocation4 + $0x33] ss:$2 sm:$0xf] }
 0x48a   : > { %4815 = vst.msk [vmem:[#allocation4 + $0x48] sm:$0xff] %vm401_vm2, %v4805_v13  ;;  %v4848_v54 = vmax.f32 %v4845_v14, %v4847_v25 }
 0x48b   : > { %v4877_v59 = vld [vmem:[#allocation5 + $0x9] sm:$0xff] }
 0x48c   : > { %v4879_v26 = vpack.c.bf16 %v4877_v59, %v4876_v36  ;;  %v4849_v39 = vmax.f32 %v4843_v37, %v4848_v54  ;;  %v4864_v38 = vld [vmem:[#allocation5 + $0x8] sm:$0xff]  ;;  %v6774_v59 = vld [vmem:[%s9441_s5 + $0xd0] sm:$0xff]  }
 0x48d   : > { %v5139_v30 = vld [vmem:[#allocation5 + $0x6] sm:$0xff]  ;;  %v4866_v46 = vpack.c.bf16 %v4864_v38, %v4863_v57 }
 0x48e   : > { %6551 = vmatprep.mubr.msk.bf16.mxu1 %vm401_vm2, %v4879_v26  ;;  %4850 = vst.msk [vmem:[#allocation5 + $0x13] sm:$0xf] %vm407_vm3, %v4849_v39  ;;  %v5046_v44 = vld [vmem:[#allocation5 + $0xa] sm:$0xff]  ;;  %v6776_v26 = vld [vmem:[%s9441_s5 + $0xd8] sm:$0xff]   ;;  %v6778_v39 = vld [vmem:[%s9441_s5 + $0x100] sm:$0xff]  }
 0x48f   : > { %v4852_v10 = vld [vmem:[#allocation4 + $0x3c] ss:$2 sm:$0xf]  ;;  %v4854_v0 = vld [vmem:[#allocation4 + $0x3d] ss:$2 sm:$0xf] }
 0x490   : > { %v4855_v22 = vmax.f32 %v4852_v10, %v4854_v0  ;;  %v5233_v8 = vld [vmem:[#allocation5 + $0x7] sm:$0xff] }
 0x491   : > { %v4857_v42 = vld [vmem:[#allocation4 + $0x46] ss:$2 sm:$0xf]  ;;  %v4859_v9 = vld [vmem:[#allocation4 + $0x47] ss:$2 sm:$0xf] }
 0x492   : > { %v4860_v62 = vmax.f32 %v4857_v42, %v4859_v9  ;;  %v6772_v54 = vld [vmem:[%s9441_s5 + $0xc8] sm:$0xff]  }
 0x493   : > { %v6779_v42 = vld [vmem:[%s9441_s5 + $0x108] sm:$0xff]  }
 0x494   : > { %v4861_v21 = vmax.f32 %v4855_v22, %v4860_v62  ;;  %v6780_v22 = vld [vmem:[%s9441_s5 + $0x110] sm:$0xff]   ;;  %v6781_v62 = vld [vmem:[%s9441_s5 + $0x118] sm:$0xff]   ;;  %v6787_v57 = vld [vmem:[%s9443_s7 + $0x28] sm:$0xff]  }
 0x495   : > { %v4878_v58 = vld [vmem:[#allocation5 + $0x11] sm:$0xff] }
 0x496   : > { %4862 = vst.msk [vmem:[#allocation5 + $0x19] sm:$0xf] %vm407_vm3, %v4861_v21  ;;  %v9217_v48 = vld [vmem:[#allocation5 + $0xe] sm:$0xff]  ;;  %v4880_v35 = vpack.c.bf16 %v4878_v58, %v4878_v58  ;;  %v5611_v21 = vld [vmem:[#allocation5 + $0x1e] sm:$0xff] }
 0x497   : > { %v5142_v45 = vpack.c.bf16 %v9217_v48, %v5139_v30  ;;  %v5328_v19 = vld [vmem:[#allocation5 + $0x10] sm:$0xff]  ;;  %v6782_v58 = vld [vmem:[%s9443_s7] sm:$0xff]   ;;  %v6783_v30 = vld [vmem:[%s9443_s7 + $0x8] sm:$0xff]  }
 0x498   : > { %6552 = vmatmul.mubr.msk.bf16.vlgmr.msra.gmra.mrb[80].mxu1 %vm401_vm2, %v4880_v35  ;;  %v4867_v41 = vpack.c.bf16 %v5328_v19, %v5328_v19  ;;  %v5515_v15 = vld [vmem:[#allocation5 + $0xd] sm:$0xff]  ;;  %v6785_v35 = vld [vmem:[%s9443_s7 + $0x18] sm:$0xff]  }
 0x499   : > { %6587 = vmatprep.mubr.msk.bf16.mxu0 %vm401_vm2, %v5142_v45  ;;  %6556 = vmatpush3.bf16.msra.mxu1 %v9153_v32  ;;  %v5330_v32 = vpack.c.bf16 %v5328_v19, %v4864_v38  ;;  %v5234_v50 = vld [vmem:[#allocation5 + $0xf] sm:$0xff]  ;;  %v5613_v38 = vpack.c.bf16 %v5611_v21, %v5611_v21  ;;  %v6786_v45 = vld [vmem:[%s9443_s7 + $0x20] sm:$0xff]  }
 0x49a   : > { %6563 = vmatprep.mubr.msk.bf16.mxu1 %vm401_vm2, %v4866_v46  ;;  %6557 = vmatprep.subr.bf16.mxu1 %v6754_v5  ;;  %v5236_v11 = vpack.c.bf16 %v5234_v50, %v5233_v8  ;;  %v5421_v37 = vld [vmem:[#allocation5 + $0xc] sm:$0xff]  ;;  %v6789_v46 = vld [vmem:[%s9443_s7 + $0x38] sm:$0xff]  }
 0x49b   : > { %v6791_v19 = vld [vmem:[%s9445_s9 + $0x8] sm:$0xff]  }
 0x49d   : > { %v9230_v6 = vld [vmem:[#allocation5 + $0x16] sm:$0xff]  ;;  %6558 = vmatpush3.bf16.msra.mxu1 %v6754_v5 }
 0x49e   : > { %v5143_v16 = vpack.c.bf16 %v9230_v6, %v9230_v6  ;;  %6559 = vmatprep.subr.bf16.mxu1 %v6756_v1  ;;  %v5329_v33 = vld [vmem:[#allocation5 + $0x18] sm:$0xff]  ;;  %v5612_v9 = vpack.c.bf16 %v9230_v6, %v9217_v48  ;;  %v6784_v48 = vld [vmem:[%s9443_s7 + $0x10] sm:$0xff]  }
 0x49f   : > { %v5516_v29 = vld [vmem:[#allocation5 + $0x15] sm:$0xff]  ;;  %v5331_v28 = vpack.c.bf16 %v5329_v33, %v5329_v33 }
 0x4a0   : > { %6588 = vmatmul.mubr.msk.bf16.vlgmr.msra.gmra.mrb[100].mxu0 %vm401_vm2, %v5143_v16  ;;  %v5518_v51 = vpack.c.bf16 %v5516_v29, %v5515_v15  ;;  %v5047_v2 = vld [vmem:[#allocation5 + $0x12] sm:$0xff]  ;;  %v5423_v10 = vld [vmem:[#allocation5 + $0x1c] sm:$0xff] }
 0x4a1   : > { %6604 = vmatpush3.bf16.msra.mxu0 %v9167_v20  ;;  %6611 = vmatprep.mubr.msk.bf16.mxu0 %vm401_vm2, %v5330_v32  ;;  %v5045_v20 = vld [vmem:[#allocation5 + $0x2] sm:$0xff]  ;;  %v5049_v53 = vpack.c.bf16 %v5047_v2, %v5047_v2  ;;  %v5235_v13 = vld [vmem:[#allocation5 + $0x17] sm:$0xff]  ;;  %v5425_v0 = vpack.c.bf16 %v5423_v10, %v5423_v10 }
 0x4a2   : > { %6560 = vmatpush3.bf16.msra.mxu1 %v6756_v1  ;;  %6605 = vmatprep.subr.bf16.mxu0 %v6759_v17  ;;  %v5048_v56 = vpack.c.bf16 %v5046_v44, %v5045_v20  ;;  %v5422_v14 = vld [vmem:[#allocation5 + $0x14] sm:$0xff]  ;;  %v5237_v25 = vpack.c.bf16 %v5235_v13, %v5235_v13  ;;  %v6790_v1 = vld [vmem:[%s9445_s9] sm:$0xff]  }
 0x4a3   : > { %6561 = vmatprep.subr.bf16.mxu1 %v6758_v31  ;;  %v5424_v36 = vpack.c.bf16 %v5422_v14, %v5421_v37  ;;  %v6788_v5 = vld [vmem:[%s9443_s7 + $0x30] sm:$0xff]  }
 0x4a5   : > { %6606 = vmatpush3.bf16.msra.mxu0 %v6759_v17 }
 0x4a6   : > { %6562 = vmatpush3.bf16.msra.mxu1 %v6758_v31  ;;  %6607 = vmatprep.subr.bf16.mxu0 %v6761_v24 }
 0x4a7   : > { %6567 = vmatprep.subr.bf16.mxu1 %v6760_v52 }
 0x4a9   : > { %6564 = vmatmul.mubr.msk.bf16.vlgmr.msra.gmra.mrb[84].mxu1 %vm401_vm2, %v4867_v41  ;;  %6608 = vmatpush3.bf16.msra.mxu0 %v6761_v24 }
 0x4aa   : > { %6568 = vmatpush3.bf16.msra.mxu1 %v6760_v52  ;;  %6575 = vmatprep.mubr.msk.bf16.mxu1 %vm401_vm2, %v5048_v56 }
 0x4ab   : > { %6569 = vmatprep.subr.bf16.mxu1 %v6762_v27  ;;  %6609 = vmatprep.subr.bf16.mxu0 %v6763_v43 }
 0x4ad   : > { %6610 = vmatpush3.bf16.msra.mxu0 %v6763_v43 }
 0x4ae   : > { %6570 = vmatpush3.bf16.msra.mxu1 %v6762_v27  ;;  %6627 = vmatprep.subr.bf16.mxu0 %v6771_v34 }
 0x4af   : > { %6571 = vmatprep.subr.bf16.mxu1 %v6764_v63 }
 0x4b0   : > { %6612 = vmatmul.mubr.msk.bf16.vlgmr.msra.gmra.mrb[104].mxu0 %vm401_vm2, %v5331_v28 }
 0x4b1   : > { %6635 = vmatprep.mubr.msk.bf16.mxu0 %vm401_vm2, %v5518_v51  ;;  %6628 = vmatpush3.bf16.msra.mxu0 %v6771_v34 }
 0x4b2   : > { %6572 = vmatpush3.bf16.msra.mxu1 %v6764_v63  ;;  %6629 = vmatprep.subr.bf16.mxu0 %v6773_v55 }
 0x4b3   : > { %6573 = vmatprep.subr.bf16.mxu1 %v6765_v23 }
 0x4b5   : > { %6630 = vmatpush3.bf16.msra.mxu0 %v6773_v55 }
 0x4b6   : > { %6574 = vmatpush3.bf16.msra.mxu1 %v6765_v23  ;;  %6631 = vmatprep.subr.bf16.mxu0 %v6775_v12 }
 0x4b7   : > { %6591 = vmatprep.subr.bf16.mxu1 %v6766_v49 }
 0x4b9   : > { %6576 = vmatmul.mubr.msk.bf16.vlgmr.msra.gmra.mrb[88].mxu1 %vm401_vm2, %v5049_v53  ;;  %6632 = vmatpush3.bf16.msra.mxu0 %v6775_v12 }
 0x4ba   : > { %6592 = vmatpush3.bf16.msra.mxu1 %v6766_v49  ;;  %6599 = vmatprep.mubr.msk.bf16.mxu1 %vm401_vm2, %v5236_v11 }
 0x4bb   : > { %6593 = vmatprep.subr.bf16.mxu1 %v6767_v61  ;;  %6633 = vmatprep.subr.bf16.mxu0 %v6777_v18 }
 0x4bd   : > { %6634 = vmatpush3.bf16.msra.mxu0 %v6777_v18 }
 0x4be   : > { %6594 = vmatpush3.bf16.msra.mxu1 %v6767_v61  ;;  %6651 = vmatprep.subr.bf16.mxu0 %v9699_v4 }
 0x4bf   : > { %6595 = vmatprep.subr.bf16.mxu1 %v6768_v7 }
 0x4c0   : > { %6636 = vmatmul.mubr.msk.bf16.vlgmr.msra.gmra.mrb[108].mxu0 %vm401_vm2, %v5519_v47 }
 0x4c1   : > { %6667 = vmatprep.mubr.msk.bf16.mxu0 %vm6890_vm1, %v9699_v4  ;;  %6652 = vmatpush3.bf16.msra.mxu0 %v6782_v58 }
 0x4c2   : > { %6596 = vmatpush3.bf16.msra.mxu1 %v6768_v7  ;;  %6653 = vmatprep.subr.bf16.mxu0 %v9699_v4 }
 0x4c3   : > { %6597 = vmatprep.subr.bf16.mxu1 %v6769_v40 }
 0x4c5   : > { %6654 = vmatpush3.bf16.msra.mxu0 %v6783_v30  ;;  %v6179_v30 = vld [vmem:[%s9442_s6] ss:$0 sm:$0xff] }
 0x4c6   : > { %6598 = vmatpush3.bf16.msra.mxu1 %v6769_v40  ;;  %6655 = vmatprep.subr.bf16.mxu0 %v9699_v4 }
 0x4c7   : > { %6615 = vmatprep.subr.bf16.mxu1 %v6770_v3 }
 0x4c9   : > { %6600 = vmatmul.mubr.msk.bf16.vlgmr.msra.gmra.mrb[92].mxu1 %vm401_vm2, %v5237_v25  ;;  %6656 = vmatpush3.bf16.msra.mxu0 %v6784_v48 }
 0x4ca   : > { %6616 = vmatpush3.bf16.msra.mxu1 %v6770_v3  ;;  %6623 = vmatprep.mubr.msk.bf16.mxu1 %vm401_vm2, %v5424_v36 }
 0x4cb   : > { %6617 = vmatprep.subr.bf16.mxu1 %v6772_v54  ;;  %6657 = vmatprep.subr.bf16.mxu0 %v9699_v4 }
 0x4cd   : > { %6658 = vmatpush3.bf16.msra.mxu0 %v6785_v35 }
 0x4ce   : > { %6618 = vmatpush3.bf16.msra.mxu1 %v6772_v54  ;;  %6659 = vmatprep.subr.bf16.mxu0 %v9699_v4 }
 0x4cf   : > { %6619 = vmatprep.subr.bf16.mxu1 %v6774_v59 }
 0x4d1   : > { %6660 = vmatpush3.bf16.msra.mxu0 %v6786_v45 }
 0x4d2   : > { %6620 = vmatpush3.bf16.msra.mxu1 %v6774_v59  ;;  %6661 = vmatprep.subr.bf16.mxu0 %v9699_v4 }
 0x4d3   : > { %6621 = vmatprep.subr.bf16.mxu1 %v6776_v26 }
 0x4d5   : > { %6662 = vmatpush3.bf16.msra.mxu0 %v6787_v57 }
 0x4d6   : > { %6622 = vmatpush3.bf16.msra.mxu1 %v6776_v26  ;;  %6663 = vmatprep.subr.bf16.mxu0 %v9699_v4 }
 0x4d7   : > { %6639 = vmatprep.subr.bf16.mxu1 %v6778_v39 }
 0x4d9   : > { %6624 = vmatmul.mubr.msk.bf16.vlgmr.msra.gmra.mrb[96].mxu1 %vm401_vm2, %v5425_v0  ;;  %6664 = vmatpush3.bf16.msra.mxu0 %v6788_v5 }
 0x4da   : > { %6640 = vmatpush3.bf16.msra.mxu1 %v6778_v39  ;;  %6647 = vmatprep.mubr.msk.bf16.mxu1 %vm401_vm2, %v5612_v9 }
 0x4db   : > { %6641 = vmatprep.subr.bf16.mxu1 %v6779_v42  ;;  %6665 = vmatprep.subr.bf16.mxu0 %v9699_v4 }
 0x4dd   : > { %6666 = vmatpush3.bf16.msra.mxu0 %v6789_v46 }
 0x4de   : > { %6642 = vmatpush3.bf16.msra.mxu1 %v6779_v42 }
 0x4df   : > { %6643 = vmatprep.subr.bf16.mxu1 %v6780_v22 }
 0x4e2   : > { %6644 = vmatpush3.bf16.msra.mxu1 %v6780_v22 }
 0x4e3   : > { %6645 = vmatprep.subr.bf16.mxu1 %v6781_v62 }
 0x4e6   : > { %6646 = vmatpush3.bf16.msra.mxu1 %v6781_v62 }
 0x4e7   : > { %6671 = vmatprep.subr.bf16.mxu1 %v9699_v4 }
 0x4e9   : > { %6648 = vmatmul.mubr.msk.bf16.vlgmr.msra.gmra.mrb[100].mxu1 %vm401_vm2, %v5613_v38 }
 0x4ea   : > { %6679 = vmatprep.mubr.msk.bf16.mxu1 %vm6890_vm1, %v9699_v4  ;;  %6672 = vmatpush3.bf16.msra.mxu1 %v6790_v1 }
 0x4eb   : > { %6673 = vmatprep.subr.bf16.mxu1 %v9699_v4 }
 0x4ee   : > { %6674 = vmatpush3.bf16.msra.mxu1 %v6791_v19 }
 0x4ef   : > { %6675 = vmatprep.subr.bf16.mxu1 %v9699_v4 }
 0x56b   : > { %v6553_v6 = vpop.f32.mrb[80].mxu1 }
 0x56c   : > { %v4953_v16 = vpop.f32.mrb[81].mxu1 }
 0x56d   : > { %v6554_v17 = vpop.f32.mrb[82].mxu1 }
 0x56e   : > { %v4956_v32 = vpop.f32.mrb[83].mxu1 }
 0x573   : > { %v6589_v31 = vpop.f32.mrb[100].mxu0 }
 0x574   : > { %v5216_v24 = vpop.f32.mrb[101].mxu0 }
 0x575   : > { %v6590_v52 = vpop.f32.mrb[102].mxu0 }
 0x576   : > { %v5219_v44 = vpop.f32.mrb[103].mxu0 }
 0x57c   : > { %v6565_v41 = vpop.f32.mrb[84].mxu1 }
 0x57d   : > { %v5040_v20 = vadd.f32 %v6565_v41, %v6553_v6  ;;  %v5031_v27 = vpop.f32.mrb[85].mxu1 }
 0x57e   : > { %v5032_v43 = vadd.f32 %v5031_v27, %v4953_v16  ;;  %v6566_v56 = vpop.f32.mrb[86].mxu1 }
 0x57f   : > { %v5034_v34 = vpop.f32.mrb[87].mxu1 }
 0x580   : > { %v5035_v63 = vadd.f32 %v5034_v34, %v4956_v32 }
 0x583   : > { %v6613_v33 = vpop.f32.mrb[104].mxu0 }
 0x584   : > { %v5404_v29 = vpop.f32.mrb[105].mxu0 }
 0x585   : > { %v6614_v28 = vpop.f32.mrb[106].mxu0 }
 0x586   : > { %v5407_v15 = vpop.f32.mrb[107].mxu0 }
 0x58c   : > { %v6577_v55 = vpop.f32.mrb[88].mxu1 }
 0x58d   : > { %v5138_v51 = vadd.f32 %v6577_v55, %v5040_v20  ;;  %v5122_v23 = vpop.f32.mrb[89].mxu1 }
 0x58e   : > { %v5136_v12 = vadd.f32 %v5122_v23, %v5032_v43  ;;  %v6578_v49 = vpop.f32.mrb[90].mxu1 }
 0x58f   : > { %v5125_v2 = vpop.f32.mrb[91].mxu1  ;;  %v5232_v50 = vadd.f32 %v6589_v31, %v5138_v51 }
 0x590   : > { %v5137_v53 = vadd.f32 %v5125_v2, %v5035_v63  ;;  %v5230_v8 = vadd.f32 %v5216_v24, %v5136_v12 }
 0x592   : > { %v5231_v61 = vadd.f32 %v5219_v44, %v5137_v53 }
 0x593   : > { %v6637_v18 = vpop.f32.mrb[108].mxu0 }
 0x594   : > { %v5592_v11 = vpop.f32.mrb[109].mxu0 }
 0x595   : > { %v6638_v60 = vpop.f32.mrb[110].mxu0 }
 0x596   : > { %v5595_v7 = vpop.f32.mrb[111].mxu0 }
 0x59c   : > { %v6601_v47 = vpop.f32.mrb[92].mxu1 }
 0x59d   : > { %v5326_v40 = vadd.f32 %v6601_v47, %v5232_v50  ;;  %v5310_v3 = vpop.f32.mrb[93].mxu1 }
 0x59e   : > { %v5324_v13 = vadd.f32 %v5310_v3, %v5230_v8  ;;  %v6602_v14 = vpop.f32.mrb[94].mxu1 }
 0x59f   : > { %v5313_v25 = vpop.f32.mrb[95].mxu1  ;;  %v5420_v37 = vadd.f32 %v6613_v33, %v5326_v40 }
 0x5a0   : > { %v5325_v54 = vadd.f32 %v5313_v25, %v5231_v61  ;;  %v5418_v36 = vadd.f32 %v5404_v29, %v5324_v13 }
 0x5a2   : > { %v5419_v59 = vadd.f32 %v5407_v15, %v5325_v54 }
 0x5ac   : > { %v6625_v26 = vpop.f32.mrb[96].mxu1 }
 0x5ad   : > { %v5514_v39 = vadd.f32 %v6625_v26, %v5420_v37  ;;  %v5498_v10 = vpop.f32.mrb[97].mxu1  ;;  %v6793_v26 = vld [vmem:[%s9445_s9 + $0x18] sm:$0xff]  }
 0x5ae   : > { %v5512_v0 = vadd.f32 %v5498_v10, %v5418_v36  ;;  %v6626_v42 = vpop.f32.mrb[98].mxu1 }
 0x5af   : > { %v5608_v9 = vadd.f32 %v6637_v18, %v5514_v39  ;;  %v5501_v22 = vpop.f32.mrb[99].mxu1  ;;  %v5779_v39 = vld [vmem:[%s9444_s8] sm:$0x1] }
 0x5b0   : > { %v5513_v62 = vadd.f32 %v5501_v22, %v5419_v59  ;;  %v5606_v21 = vadd.f32 %v5592_v11, %v5512_v0  ;;  %v6792_v59 = vld [vmem:[%s9445_s9 + $0x10] sm:$0xff]  }
 0x5b1   : > { %6676 = vmatpush3.bf16.msra.mxu1 %v6792_v59 }
 0x5b2   : > { %v5607_v38 = vadd.f32 %v5595_v7, %v5513_v62  ;;  %6677 = vmatprep.subr.bf16.mxu1 %v9699_v4  ;;  %v5878_v4 = vld [vmem:[%s9446_s10] sm:$0x1] }
 0x5b5   : > { %6678 = vmatpush3.bf16.msra.mxu1 %v6793_v26 }
 0x5bc   : > { %v6649_v58 = vpop.f32.mrb[100].mxu1 }
 0x5bd   : > { %v5702_v48 = vadd.f32 %v6649_v58, %v5608_v9  ;;  %v5686_v35 = vpop.f32.mrb[101].mxu1 }
 0x5be   : > { %v5700_v45 = vadd.f32 %v5686_v35, %v5606_v21  ;;  %v6650_v57 = vpop.f32.mrb[102].mxu1 }
 0x5bf   : > { %v5712_v5 = vadd.f32 %v6179_v30, %v5702_v48  ;;  %v5689_v46 = vpop.f32.mrb[103].mxu1 }
 0x5c0   : > { %v5710_v1 = vadd.f32 %v6179_v30, %v5700_v45  ;;  %v5701_v19 = vadd.f32 %v5689_v46, %v5607_v38 }
 0x5c1   : > { %v5715_v6 = vmax.f32 %v5712_v5, 0.0 }
 0x5c2   : > { %v5713_v16 = vmax.f32 %v5710_v1, 0.0  ;;  %v5711_v17 = vadd.f32 %v6179_v30, %v5701_v19 }
 0x5c3   : > { %v5751_v32 = vrot.slane %v5715_v6, 2 }
 0x5c4   : > { %v5717_v31 = vsel %vm5716_vm4, %v5713_v16, 0.0  ;;  %v5714_v24 = vmax.f32 %v5711_v17, 0.0  ;;  %v5728_v20 = vrot.slane %v5713_v16, 6 }
 0x5c5   : > { %v5753_v52 = vsel %vm5716_vm4, %v5751_v32, 0.0  ;;  %v5718_v44 = vrot.slane %v5717_v31, 4 }
 0x5c6   : > { %v5754_v41 = vrot.slane %v5753_v52, 4  ;;  %v5729_v27 = vrot.slane %v5714_v24, 6  ;;  %v5740_v43 = vrot.slane %v5714_v24, 4 }
 0x5c7   : > { %v5719_v56 = vadd.f32 %v5718_v44, %v5717_v31 }
 0x5c8   : > { %v5755_v34 = vadd.f32 %v5754_v41, %v5753_v52  ;;  %v5730_v63 = vsel %vm5727_vm5, %v5728_v20, %v5729_v27  ;;  %v5742_v33 = vsel %vm5716_vm4, %v5740_v43, 0.0 }
 0x5c9   : > { %v5720_v29 = vrot.slane %v5719_v56, 2  ;;  %v5732_v28 = vsel %vm5716_vm4, %v5730_v63, 0.0  ;;  %v5743_v15 = vrot.slane %v5742_v33, 4 }
 0x5ca   : > { %v5733_v55 = vrot.slane %v5732_v28, 4  ;;  %v5756_v23 = vrot.slane %v5755_v34, 2 }
 0x5cb   : > { %v5744_v51 = vadd.f32 %v5743_v15, %v5742_v33  ;;  %v5721_v12 = vadd.f32 %v5720_v29, %v5719_v56 }
 0x5cc   : > { %v5734_v49 = vadd.f32 %v5733_v55, %v5732_v28  ;;  %v5757_v8 = vadd.f32 %v5756_v23, %v5755_v34 }
 0x5cd   : > { %v5745_v2 = vrot.slane %v5744_v51, 2  ;;  %v5722_v61 = vrot.slane %v5721_v12, 1 }
 0x5ce   : > { %v5735_v50 = vrot.slane %v5734_v49, 2  ;;  %v5758_v7 = vrot.slane %v5757_v8, 1 }
 0x5cf   : > { %v5746_v53 = vadd.f32 %v5745_v2, %v5744_v51  ;;  %v5723_v47 = vadd.f32 %v5722_v61, %v5721_v12 }
 0x5d0   : > { %v5736_v18 = vadd.f32 %v5735_v50, %v5734_v49  ;;  %v5759_v25 = vadd.f32 %v5758_v7, %v5757_v8 }
 0x5d1   : > { %v5747_v60 = vrot.slane %v5746_v53, 1 }
 0x5d2   : > { %v5737_v11 = vrot.slane %v5736_v18, 1 }
 0x5d3   : > { %v5748_v3 = vadd.f32 %v5747_v60, %v5746_v53 }
 0x5d4   : > { %v5738_v40 = vadd.f32 %v5737_v11, %v5736_v18 }
 0x5d6   : > { %v5739_v13 = vadd.f32 %v5738_v40, %v5723_v47 }
 0x5d8   : > { %v5749_v14 = vadd.f32 %v5748_v3, %v5739_v13 }
 0x5da   : > { %v5760_v37 = vadd.f32 %v5759_v25, %v5749_v14 }
 0x5dc   : > { %v5761_v54 = vmul.f32 0.0625, %v5760_v37 }
 0x5de   : > { %v5762_v36 = vpack.c.bf16 %v5761_v54, %v5761_v54 }
 0x5e0   : > { %6668 = vmatmul.mubr.bf16.vlgmr.msra.gmra.mrb[112].mxu0 %v5762_v36 }
 0x6b3   : > { %v5862_v10 = vpop.f32.mrb[112].mxu0 }
 0x6b4   : > { %v5863_v0 = vadd.f32 %v5862_v10, %v5779_v39  ;;  %v6669_v42 = vpop.f32.mrb[113].mxu0 }
 0x6b5   : > { %v5865_v9 = vpop.f32.mrb[114].mxu0 }
 0x6b6   : > { %v5868_v22 = vmax.f32 %v5863_v0, 0.0  ;;  %v6670_v62 = vpop.f32.mrb[115].mxu0 }
 0x6b8   : > { %v5869_v21 = vpack.c.bf16 %v5868_v22, %v5868_v22 }
 0x6ba   : > { %6680 = vmatmul.mubr.msk.bf16.vlgmr.msra.gmra.mrb[104].mxu1 %vm401_vm2, %v5869_v21 }
 0x78d   : > { %v5940_v38 = vpop.f32.mrb[104].mxu1 }
 0x78e   : > { %v5941_v58 = vadd.f32 %v5940_v38, %v5878_v4  ;;  %v6681_v30 = vpop.f32.mrb[105].mxu1 }
 0x78f   : > { %v5943_v48 = vpop.f32.mrb[106].mxu1 }
 0x790   : > { %v6682_v35 = vpop.f32.mrb[107].mxu1  ;;  %5947 = vst.msk [vmem:[%s378_s15] sm:$0x1] %vm5946_vm6, %v5941_v58 }
 0x791   : > { %6837 = shalt.err (!%p6834_p3)
}
 0x792   : > { %s6838_s29 = scalar_lea.hbm %s9394_s14, 16  ;;  %s6842_s24 = scalar_lea.hbm %s9447_s11, 32 }
 0x793   : > { %p6839_p4 = scmp.ne.s32.totalorder %s9394_s14, %s6838_s29  ;;  %p6843_p9 = scmp.lt.u32.totalorder %s9394_s14, %s9447_s11 }
 0x794   : > { %p6844_p10 = scmp.lt.u32.totalorder %s6842_s24, %s6838_s29  ;;  %p6846_p12 = scmp.lt.u32.totalorder %s6838_s29, %s9394_s14 }
 0x795   : > { %p6840_p7 = pnand %p6839_p4, %p6990_p5 }
 0x796   : > { %p6845_p11 = por %p6844_p10, %p6843_p9 }
 0x797   : > { %p6841_p8 = pneg %p6840_p7 }
 0x798   : > { %p6847_p13 = por %p6846_p12, %p6845_p11 }
 0x79a   : > { %p6848_p0 = pnand %p6847_p13, %p6841_p8 }
 0x79c   : > { %6851 = shalt.err (!%p6848_p0)
}
 0x79d   : > { %6684 = dma.vmem_to_hbm [thread:$0]  (%p6990_p5), %s9396_s16, 16, %s9394_s14, %s5949_s21  }
 0x79e PF: > { %p6690_p1 = scmp.ge.s32.totalorder %s6886_s20, 2  ;;  %s5973_s25 = sand.u32 1, %s6874_s17  }
 0x79f   : > { %s5974_s22 = scalar_lea.sflag [#allocation7], %s5973_s25 }
 0x7a0   : > { %p6687_p2 = pnand %p6690_p1, %p6994_p6 }
 0x7a2   : > { %6869 = dma.done.wait (!%p6687_p2), %s5974_s22, 16  }
 0x7a3   : > { %6871 = vsyncadd (!%p6687_p2), %s5974_s22, 4294967280  ;;  %p21_p3 = scmp.ge.s32.totalorder %s6977_s23, 4   ;;  %s9702_s17 = smov %s6878_s18 }
 0x7a4   : > { %s9703_s18 = smov %s6882_s19  ;;  %s9704_s19 = smov %s6988_s26 }
 0x7a5   : > { %s9705_s20 = smov %s6977_s23  ;;  %23 = sbr.rel (!%p21_p3) target bundleno = 3 (0x3), region = 145 }
 0x7ac   :  { %5978 = vsyncpa [#allocation7], 1 }
 0x7ad   :  { %5980 = vsyncpa [#allocation7 + $0x1], 1 }

</bundles_post_ra>
